<compile_context>
chip_gen: v6e
topology: v6e:2x2x1
jax: 0.10.0
libtpu: 0.0.40
codegen_flags: <defaults>
</compile_context>

<pallas_src>
import functools
import math

import jax
import jax.numpy as jnp
from jax import lax
from jax.experimental import pallas as pl
from jax.experimental.pallas import tpu as pltpu


def _layernorm(z, w, b, eps):
    u = jnp.mean(z, axis=-1, keepdims=True)
    s = jnp.mean((z - u) ** 2, axis=-1, keepdims=True)
    return (z - u) * lax.rsqrt(s + eps) * w + b


def _gelu(h):
    c = math.sqrt(2.0 / math.pi)
    return 0.5 * h * (1.0 + jnp.tanh(c * (h + 0.044715 * h * h * h)))


def block_kernel(x_ref,
                 ln1w_ref, ln1b_ref,
                 wq_ref, bq_ref, wkv_ref, bkv_ref,
                 wao_ref, bao_ref,
                 ln2w_ref, ln2b_ref,
                 wfc_ref, bfc_ref,
                 wmp_ref, bmp_ref,
                 y_ref, present_ref,
                 k_scratch, v_scratch, m_scr, l_scr, acc_scr,
                 *, n_head, eps, scale, tq):
    qi = pl.program_id(1)
    C = x_ref.shape[-1]
    Dh = C // n_head
    cdtype = wq_ref.dtype                      # bf16 compute dtype for MXU inputs

    q0 = pl.multiple_of(qi * tq, tq)

    # ---- ln_1 of this query tile (computed once, reused for Q and K/V) ----
    x_t = x_ref[0]                                            # (tq, C) f32
    h1_t = _layernorm(x_t, ln1w_ref[...], ln1b_ref[...], eps)
    h1_c = h1_t.astype(cdtype)

    # ---- K/V projection for THIS tile; append to head-major scratch ----
    kv_t = jnp.dot(h1_c, wkv_ref[...],
                   preferred_element_type=jnp.float32) + bkv_ref[...]   # (tq, 2C)
    k_t = kv_t[:, :C]
    v_t = kv_t[:, C:]

    # lane-dense per-tile 'present' stores (full-C width, written exactly once)
    present_ref[0, 0, :, :] = k_t.astype(present_ref.dtype)
    present_ref[1, 0, :, :] = v_t.astype(present_ref.dtype)

    # persistent bf16 head-major K/V scratch, filled tile-by-tile over the
    # (sequential, "arbitrary") q grid axis
    k_scratch[:, pl.ds(q0, tq), :] = (
        k_t.reshape(tq, n_head, Dh).transpose(1, 0, 2).astype(cdtype))
    v_scratch[:, pl.ds(q0, tq), :] = (
        v_t.reshape(tq, n_head, Dh).transpose(1, 0, 2).astype(cdtype))

    # ---- Q projection for this tile ----
    q_t = jnp.dot(h1_c, wq_ref[...],
                  preferred_element_type=jnp.float32) + bq_ref[...]      # (tq, C)
    if scale:
        q_t = q_t * (1.0 / math.sqrt(Dh))      # fold scale into Q, not scores
    q_h = q_t.reshape(tq, n_head, Dh).transpose(1, 0, 2).astype(cdtype)  # (H,tq,Dh)

    # ---- causal flash attention over key tiles 0..qi (online softmax) ----
    row = q0 + lax.broadcasted_iota(jnp.int32, (tq, tq), 0)

    m_scr[...] = jnp.full(m_scr.shape, -1e30, jnp.float32)
    l_scr[...] = jnp.zeros(l_scr.shape, jnp.float32)
    acc_scr[...] = jnp.zeros(acc_scr.shape, jnp.float32)

    @pl.loop(0, qi + 1)            # key tiles above the diagonal are skipped
    def _(j):
        k0 = pl.multiple_of(j * tq, tq)
        k_blk = k_scratch[:, pl.ds(k0, tq), :]                # (H, tq, Dh) bf16
        v_blk = v_scratch[:, pl.ds(k0, tq), :]                # (H, tq, Dh) bf16

        s = jnp.einsum('hqd,hkd->hqk', q_h, k_blk,
                       preferred_element_type=jnp.float32)    # (H, tq, tq) f32
        col = k0 + lax.broadcasted_iota(jnp.int32, (tq, tq), 1)
        s = jnp.where((col <= row)[None, :, :], s, -1e10)     # matches torch mask

        m_prev = m_scr[...]
        m_new = jnp.maximum(m_prev, jnp.max(s, axis=-1, keepdims=True))
        alpha = jnp.exp(m_prev - m_new)
        p = jnp.exp(s - m_new)
        l_scr[...] = alpha * l_scr[...] + jnp.sum(p, axis=-1, keepdims=True)
        acc_scr[...] = alpha * acc_scr[...] + jnp.einsum(
            'hqk,hkd->hqd', p.astype(cdtype), v_blk,
            preferred_element_type=jnp.float32)
        m_scr[...] = m_new

    o = acc_scr[...] * pl.reciprocal(l_scr[...], approx=True)  # (H, tq, Dh)
    attn_t = o.transpose(1, 0, 2).reshape(tq, C)                # merge_heads

    a_t = jnp.dot(attn_t.astype(cdtype), wao_ref[...],
                  preferred_element_type=jnp.float32) + bao_ref[...]

    # ---- first residual ----
    x1_t = x_t + a_t

    # ---- ln_2 + MLP ----
    h2_t = _layernorm(x1_t, ln2w_ref[...], ln2b_ref[...], eps)
    hf = jnp.dot(h2_t.astype(cdtype), wfc_ref[...],
                 preferred_element_type=jnp.float32) + bfc_ref[...]      # (tq, 4C)
    hf = _gelu(hf)
    m_t = jnp.dot(hf.astype(cdtype), wmp_ref[...],
                  preferred_element_type=jnp.float32) + bmp_ref[...]

    y_ref[0, :, :] = (x1_t + m_t).astype(y_ref.dtype)


def _pick_tq(T, prefer=128):
    """Largest multiple-of-8 divisor of T that is <= `prefer` (v7x-safe)."""
    if T % prefer == 0:
        return prefer
    for d in range(min(T, prefer), 7, -1):
        if T % d == 0 and d % 8 == 0:
            return d
    return T        # tiny / odd sequence lengths: single tile


def gpt2_block(x, params, *, n_head, eps=1e-5, scale=False,
               q_tile=None, vmem_limit_bytes=64 * 1024 * 1024):
    """x: (B, T, C) float32. Returns (y, present) with present (2,B,H,T,Dh).

    vmem_limit_bytes: ~48 MiB is a safe ceiling on v7x (64 MiB physical/TC);
    raise towards 96 MiB on v5e/v6e (128 MiB physical) for larger q tiles.
    """
    (ln1_w, ln1_b, w_attn, b_attn, w_aproj, b_aproj,
     ln2_w, ln2_b, w_fc, b_fc, w_mproj, b_mproj) = params
    B, T, C = x.shape
    Dh = C // n_head
    cdtype = jnp.bfloat16

    tq = q_tile if q_tile is not None else _pick_tq(T)
    assert T % tq == 0, "query tile must divide the sequence length"
    nq = T // tq

    # Split fused qkv weight into q / kv halves (one-time XLA slice) and cast
    # matmul weights to bf16; biases stay f32 (added post-accumulation).
    w_q = w_attn[:, :C].astype(cdtype)
    w_kv = w_attn[:, C:].astype(cdtype)
    b_q = b_attn[:, :C]
    b_kv = b_attn[:, C:]
    w_ao = w_aproj.astype(cdtype)
    w_fc_c = w_fc.astype(cdtype)
    w_mp = w_mproj.astype(cdtype)

    kernel = functools.partial(block_kernel, n_head=n_head, eps=eps,
                               scale=scale, tq=tq)

    operands = (x, ln1_w, ln1_b, w_q, b_q, w_kv, b_kv, w_ao, b_aproj,
                ln2_w, ln2_b, w_fc_c, b_fc, w_mp, b_mproj)

    out_shape = (
        jax.ShapeDtypeStruct((B, T, C), x.dtype),
        jax.ShapeDtypeStruct((2, B, T, C), x.dtype),
    )
    out_specs = (
        pl.BlockSpec((1, tq, C), lambda b, q: (b, q, 0)),        # y tile
        pl.BlockSpec((2, 1, tq, C), lambda b, q: (0, b, q, 0)),  # present tile
    )
    scratch_shapes = [
        pltpu.VMEM((n_head, T, Dh), cdtype),      # K, head-major, bf16
        pltpu.VMEM((n_head, T, Dh), cdtype),      # V, head-major, bf16
        pltpu.VMEM((n_head, tq, 1), jnp.float32),  # online-softmax m
        pltpu.VMEM((n_head, tq, 1), jnp.float32),  # online-softmax l
        pltpu.VMEM((n_head, tq, Dh), jnp.float32),  # attention accumulator
    ]

    def build(single_buffer_weights):
        if single_buffer_weights:
            def rep_spec(shape):
                # grid-invariant operand: same block every step -> single buffer
                return pl.BlockSpec(shape,
                                    lambda b, q, _n=len(shape): (0,) * _n,
                                    pipeline_mode=pl.Buffered(buffer_count=1))
        else:
            def rep_spec(shape):
                return pl.BlockSpec(shape,
                                    lambda b, q, _n=len(shape): (0,) * _n)

        in_specs = [pl.BlockSpec((1, tq, C), lambda b, q: (b, q, 0))] + [
            rep_spec(p.shape) for p in operands[1:]
        ]
        return pl.pallas_call(
            kernel,
            out_shape=out_shape,
            grid=(B, nq),
            in_specs=in_specs,
            out_specs=out_specs,
            scratch_shapes=scratch_shapes,
            compiler_params=pltpu.CompilerParams(
                dimension_semantics=("parallel", "arbitrary"),
                vmem_limit_bytes=vmem_limit_bytes,
            ),
        )

    try:
        y, present_lc = build(True)(*operands)
    except Exception:
        # TODO(synk): installed JAX rejected pipeline_mode=pl.Buffered(1);
        # fall back to default double-buffered weight specs.
        y, present_lc = build(False)(*operands)

    # lane-dense (2, B, T, H*Dh) slab -> PyTorch 'present' layout (2, B, H, T, Dh)
    present = present_lc.reshape(2, B, T, n_head, Dh).transpose(0, 1, 3, 2, 4)
    return y, present


# ---------------- pure-JAX reference (for a sanity check) ----------------
def _ref_block(x, params, *, n_head, eps=1e-5, scale=False):
    (ln1_w, ln1_b, w_attn, b_attn, w_aproj, b_aproj,
     ln2_w, ln2_b, w_fc, b_fc, w_mproj, b_mproj) = params
    B, T, C = x.shape
    Dh = C // n_head

    def ln(z, w, b):
        u = z.mean(-1, keepdims=True)
        s = ((z - u) ** 2).mean(-1, keepdims=True)
        return (z - u) / jnp.sqrt(s + eps) * w + b

    h1 = ln(x, ln1_w, ln1_b)
    qkv = h1 @ w_attn + b_attn
    q, k, v = jnp.split(qkv, 3, axis=-1)
    split = lambda t: t.reshape(B, T, n_head, Dh).transpose(0, 2, 1, 3)
    q, k, v = split(q), split(k), split(v)
    s = jnp.einsum('bhtd,bhsd->bhts', q, k)
    if scale:
        s = s / math.sqrt(Dh)
    mask = jnp.tril(jnp.ones((T, T), jnp.float32))
    s = s * mask - 1e10 * (1.0 - mask)
    p = jax.nn.softmax(s, axis=-1)
    a = jnp.einsum('bhts,bhsd->bhtd', p, v)
    a = a.transpose(0, 2, 1, 3).reshape(B, T, C) @ w_aproj + b_aproj
    x1 = x + a
    h2 = ln(x1, ln2_w, ln2_b)
    hf = h2 @ w_fc + b_fc
    hf = 0.5 * hf * (1 + jnp.tanh(math.sqrt(2 / math.pi) * (hf + 0.044715 * hf ** 3)))
    y = x1 + hf @ w_mproj + b_mproj
    present = jnp.stack([k, v], axis=0)
    return y, present


if __name__ == "__main__":
    B, T, C, H = 2, 8, 32, 4          # batch, n_ctx, n_embd, n_head
    std = 0.02
    key = jax.random.PRNGKey(0)
    k0, k1, k2, k3, kx = jax.random.split(key, 5)

    params = (
        jnp.ones((1, C), jnp.float32),                         # ln1 weight
        jnp.zeros((1, C), jnp.float32),                        # ln1 bias
        std * jax.random.normal(k0, (C, 3 * C), jnp.float32),  # c_attn W
        jnp.zeros((1, 3 * C), jnp.float32),                    # c_attn b
        std * jax.random.normal(k1, (C, C), jnp.float32),      # attn c_proj W
        jnp.zeros((1, C), jnp.float32),                        # attn c_proj b
        jnp.ones((1, C), jnp.float32),                         # ln2 weight
        jnp.zeros((1, C), jnp.float32),                        # ln2 bias
        std * jax.random.normal(k2, (C, 4 * C), jnp.float32),  # mlp c_fc W
        jnp.zeros((1, 4 * C), jnp.float32),                    # mlp c_fc b
        std * jax.random.normal(k3, (4 * C, C), jnp.float32),  # mlp c_proj W
        jnp.zeros((1, C), jnp.float32),                        # mlp c_proj b
    )
    x = jax.random.normal(kx, (B, T, C), jnp.float32)

    y, present = gpt2_block(x, params, n_head=H, eps=1e-5, scale=False)
    jax.block_until_ready((y, present))

    y_ref, present_ref = _ref_block(x, params, n_head=H, eps=1e-5, scale=False)
    # bf16 weights / approx reciprocal inside the kernel -> modest tolerance
    assert jnp.allclose(y, y_ref, atol=1e-2, rtol=1e-2)
    assert jnp.allclose(present, present_ref, atol=1e-2, rtol=1e-2)

    print("KERNEL_OK")
</pallas_src>

<mosaic_0001>
module attributes {stable_mosaic.version = 11 : i64} {
  func.func @block_kernel(%arg0: i32, %arg1: i32, %arg2: memref<1x8x32xf32, #tpu.memory_space<vmem>>, %arg3: memref<1x32xf32, #tpu.memory_space<vmem>>, %arg4: memref<1x32xf32, #tpu.memory_space<vmem>>, %arg5: memref<32x32xbf16, #tpu.memory_space<vmem>>, %arg6: memref<1x32xf32, #tpu.memory_space<vmem>>, %arg7: memref<32x64xbf16, #tpu.memory_space<vmem>>, %arg8: memref<1x64xf32, #tpu.memory_space<vmem>>, %arg9: memref<32x32xbf16, #tpu.memory_space<vmem>>, %arg10: memref<1x32xf32, #tpu.memory_space<vmem>>, %arg11: memref<1x32xf32, #tpu.memory_space<vmem>>, %arg12: memref<1x32xf32, #tpu.memory_space<vmem>>, %arg13: memref<32x128xbf16, #tpu.memory_space<vmem>>, %arg14: memref<1x128xf32, #tpu.memory_space<vmem>>, %arg15: memref<128x32xbf16, #tpu.memory_space<vmem>>, %arg16: memref<1x32xf32, #tpu.memory_space<vmem>>, %arg17: memref<1x8x32xf32, #tpu.memory_space<vmem>>, %arg18: memref<2x1x8x32xf32, #tpu.memory_space<vmem>>, %arg19: memref<4x8x8xbf16, #tpu.memory_space<vmem>>, %arg20: memref<4x8x8xbf16, #tpu.memory_space<vmem>>, %arg21: memref<4x8x1xf32, #tpu.memory_space<vmem>>, %arg22: memref<4x8x1xf32, #tpu.memory_space<vmem>>, %arg23: memref<4x8x8xf32, #tpu.memory_space<vmem>>) attributes {dimension_semantics = [#tpu.dimension_semantics<parallel>, #tpu.dimension_semantics<arbitrary>], iteration_bounds = array<i64: 2, 1>, scalar_prefetch = 0 : i64, scratch_operands = 5 : i64, tpu.core_type = #tpu.core_type<tc>, window_params = [{transform_indices = @transform_0, window_bounds = array<i64: 1, 8, 32>}, {pipeline_mode = #tpu.pipeline_mode<synchronous>, transform_indices = @transform_1, window_bounds = array<i64: 1, 32>}, {pipeline_mode = #tpu.pipeline_mode<synchronous>, transform_indices = @transform_2, window_bounds = array<i64: 1, 32>}, {pipeline_mode = #tpu.pipeline_mode<synchronous>, transform_indices = @transform_3, window_bounds = array<i64: 32, 32>}, {pipeline_mode = #tpu.pipeline_mode<synchronous>, transform_indices = @transform_4, window_bounds = array<i64: 1, 32>}, {pipeline_mode = #tpu.pipeline_mode<synchronous>, transform_indices = @transform_5, window_bounds = array<i64: 32, 64>}, {pipeline_mode = #tpu.pipeline_mode<synchronous>, transform_indices = @transform_6, window_bounds = array<i64: 1, 64>}, {pipeline_mode = #tpu.pipeline_mode<synchronous>, transform_indices = @transform_7, window_bounds = array<i64: 32, 32>}, {pipeline_mode = #tpu.pipeline_mode<synchronous>, transform_indices = @transform_8, window_bounds = array<i64: 1, 32>}, {pipeline_mode = #tpu.pipeline_mode<synchronous>, transform_indices = @transform_9, window_bounds = array<i64: 1, 32>}, {pipeline_mode = #tpu.pipeline_mode<synchronous>, transform_indices = @transform_10, window_bounds = array<i64: 1, 32>}, {pipeline_mode = #tpu.pipeline_mode<synchronous>, transform_indices = @transform_11, window_bounds = array<i64: 32, 128>}, {pipeline_mode = #tpu.pipeline_mode<synchronous>, transform_indices = @transform_12, window_bounds = array<i64: 1, 128>}, {pipeline_mode = #tpu.pipeline_mode<synchronous>, transform_indices = @transform_13, window_bounds = array<i64: 128, 32>}, {pipeline_mode = #tpu.pipeline_mode<synchronous>, transform_indices = @transform_14, window_bounds = array<i64: 1, 32>}, {transform_indices = @transform_15, window_bounds = array<i64: 1, 8, 32>}, {transform_indices = @transform_16, window_bounds = array<i64: 2, 1, 8, 32>}]} {
    %c8_i32 = arith.constant 8 : i32
    %0 = arith.muli %arg1, %c8_i32 : i32
    %1 = tpu.assume_multiple %0, 8 : i32
    %c0 = arith.constant 0 : index
    %c0_0 = arith.constant 0 : index
    %c0_1 = arith.constant 0 : index
    %2 = vector.load %arg2[%c0, %c0_0, %c0_1] : memref<1x8x32xf32, #tpu.memory_space<vmem>>, vector<1x8x32xf32>
    %3 = vector.shape_cast %2 : vector<1x8x32xf32> to vector<8x32xf32>
    %c0_2 = arith.constant 0 : index
    %c0_3 = arith.constant 0 : index
    %4 = vector.load %arg3[%c0_2, %c0_3] : memref<1x32xf32, #tpu.memory_space<vmem>>, vector<1x32xf32>
    %c0_4 = arith.constant 0 : index
    %c0_5 = arith.constant 0 : index
    %5 = vector.load %arg4[%c0_4, %c0_5] : memref<1x32xf32, #tpu.memory_space<vmem>>, vector<1x32xf32>
    %cst = arith.constant dense<0.000000e+00> : vector<8xf32>
    %6 = vector.multi_reduction <add>, %3, %cst [1] : vector<8x32xf32> to vector<8xf32>
    %7 = vector.shape_cast %6 : vector<8xf32> to vector<8x1xf32>
    %cst_6 = arith.constant 3.200000e+01 : f32
    %8 = vector.broadcast %cst_6 : f32 to vector<8x1xf32>
    %9 = arith.divf %7, %8 : vector<8x1xf32>
    %10 = vector.broadcast %9 : vector<8x1xf32> to vector<8x32xf32>
    %11 = arith.subf %3, %10 : vector<8x32xf32>
    %12 = arith.mulf %11, %11 : vector<8x32xf32>
    %cst_7 = arith.constant dense<0.000000e+00> : vector<8xf32>
    %13 = vector.multi_reduction <add>, %12, %cst_7 [1] : vector<8x32xf32> to vector<8xf32>
    %14 = vector.shape_cast %13 : vector<8xf32> to vector<8x1xf32>
    %cst_8 = arith.constant 3.200000e+01 : f32
    %15 = vector.broadcast %cst_8 : f32 to vector<8x1xf32>
    %16 = arith.divf %14, %15 : vector<8x1xf32>
    %17 = vector.broadcast %9 : vector<8x1xf32> to vector<8x32xf32>
    %18 = arith.subf %3, %17 : vector<8x32xf32>
    %cst_9 = arith.constant 9.99999974E-6 : f32
    %19 = vector.broadcast %cst_9 : f32 to vector<8x1xf32>
    %20 = arith.addf %16, %19 : vector<8x1xf32>
    %21 = math.rsqrt %20 : vector<8x1xf32>
    %22 = vector.broadcast %21 : vector<8x1xf32> to vector<8x32xf32>
    %23 = arith.mulf %18, %22 : vector<8x32xf32>
    %24 = vector.broadcast %4 : vector<1x32xf32> to vector<8x32xf32>
    %25 = arith.mulf %23, %24 : vector<8x32xf32>
    %26 = vector.broadcast %5 : vector<1x32xf32> to vector<8x32xf32>
    %27 = arith.addf %25, %26 : vector<8x32xf32>
    %28 = arith.truncf %27 : vector<8x32xf32> to vector<8x32xbf16>
    %c0_10 = arith.constant 0 : index
    %c0_11 = arith.constant 0 : index
    %29 = vector.load %arg7[%c0_10, %c0_11] : memref<32x64xbf16, #tpu.memory_space<vmem>>, vector<32x64xbf16>
    %cst_12 = arith.constant dense<0.000000e+00> : vector<8x64xf32>
    %30 = tpu.matmul %28, %29, %cst_12 {dimension_numbers = #tpu.dot_dimension_numbers<[1], [0], [0], [1], [0, 0, 1, 1], [], []>} : vector<8x32xbf16>, vector<32x64xbf16>, vector<8x64xf32> -> vector<8x64xf32>
    %c0_13 = arith.constant 0 : index
    %c0_14 = arith.constant 0 : index
    %31 = vector.load %arg8[%c0_13, %c0_14] : memref<1x64xf32, #tpu.memory_space<vmem>>, vector<1x64xf32>
    %32 = vector.broadcast %31 : vector<1x64xf32> to vector<8x64xf32>
    %33 = arith.addf %30, %32 : vector<8x64xf32>
    %34 = vector.extract_strided_slice %33 {offsets = [0, 0], sizes = [8, 32], strides = [1, 1]} : vector<8x64xf32> to vector<8x32xf32>
    %35 = vector.extract_strided_slice %33 {offsets = [0, 32], sizes = [8, 32], strides = [1, 1]} : vector<8x64xf32> to vector<8x32xf32>
    %c0_15 = arith.constant 0 : index
    %c0_16 = arith.constant 0 : index
    %c0_17 = arith.constant 0 : index
    %c0_18 = arith.constant 0 : index
    %36 = vector.load %arg18[%c0_15, %c0_16, %c0_17, %c0_18] : memref<2x1x8x32xf32, #tpu.memory_space<vmem>>, vector<1x1x8x32xf32>
    %37 = vector.shape_cast %36 : vector<1x1x8x32xf32> to vector<8x32xf32>
    %38 = vector.shape_cast %34 : vector<8x32xf32> to vector<1x1x8x32xf32>
    tpu.vector_store %arg18[%c0_15, %c0_16, %c0_17, %c0_18], %38 {strides = array<i32>} : memref<2x1x8x32xf32, #tpu.memory_space<vmem>>, vector<1x1x8x32xf32>,
    %c1 = arith.constant 1 : index
    %c0_19 = arith.constant 0 : index
    %c0_20 = arith.constant 0 : index
    %c0_21 = arith.constant 0 : index
    %39 = vector.load %arg18[%c1, %c0_19, %c0_20, %c0_21] : memref<2x1x8x32xf32, #tpu.memory_space<vmem>>, vector<1x1x8x32xf32>
    %40 = vector.shape_cast %39 : vector<1x1x8x32xf32> to vector<8x32xf32>
    %41 = vector.shape_cast %35 : vector<8x32xf32> to vector<1x1x8x32xf32>
    tpu.vector_store %arg18[%c1, %c0_19, %c0_20, %c0_21], %41 {strides = array<i32>} : memref<2x1x8x32xf32, #tpu.memory_space<vmem>>, vector<1x1x8x32xf32>,
    %42 = vector.shape_cast %34 : vector<8x32xf32> to vector<8x4x8xf32>
    %43 = tpu.transpose %42, [1, 0, 2] : vector<8x4x8xf32> -> vector<4x8x8xf32>
    %44 = arith.truncf %43 : vector<4x8x8xf32> to vector<4x8x8xbf16>
    %c0_22 = arith.constant 0 : index
    %45 = arith.index_cast %1 : i32 to index
    %c0_23 = arith.constant 0 : index
    %46 = vector.load %arg19[%c0_22, %45, %c0_23] : memref<4x8x8xbf16, #tpu.memory_space<vmem>>, vector<4x8x8xbf16>
    tpu.vector_store %arg19[%c0_22, %45, %c0_23], %44 {strides = array<i32>} : memref<4x8x8xbf16, #tpu.memory_space<vmem>>, vector<4x8x8xbf16>,
    %47 = vector.shape_cast %35 : vector<8x32xf32> to vector<8x4x8xf32>
    %48 = tpu.transpose %47, [1, 0, 2] : vector<8x4x8xf32> -> vector<4x8x8xf32>
    %49 = arith.truncf %48 : vector<4x8x8xf32> to vector<4x8x8xbf16>
    %c0_24 = arith.constant 0 : index
    %50 = arith.index_cast %1 : i32 to index
    %c0_25 = arith.constant 0 : index
    %51 = vector.load %arg20[%c0_24, %50, %c0_25] : memref<4x8x8xbf16, #tpu.memory_space<vmem>>, vector<4x8x8xbf16>
    tpu.vector_store %arg20[%c0_24, %50, %c0_25], %49 {strides = array<i32>} : memref<4x8x8xbf16, #tpu.memory_space<vmem>>, vector<4x8x8xbf16>,
    %c0_26 = arith.constant 0 : index
    %c0_27 = arith.constant 0 : index
    %52 = vector.load %arg5[%c0_26, %c0_27] : memref<32x32xbf16, #tpu.memory_space<vmem>>, vector<32x32xbf16>
    %cst_28 = arith.constant dense<0.000000e+00> : vector<8x32xf32>
    %53 = tpu.matmul %28, %52, %cst_28 {dimension_numbers = #tpu.dot_dimension_numbers<[1], [0], [0], [1], [0, 0, 1, 1], [], []>} : vector<8x32xbf16>, vector<32x32xbf16>, vector<8x32xf32> -> vector<8x32xf32>
    %c0_29 = arith.constant 0 : index
    %c0_30 = arith.constant 0 : index
    %54 = vector.load %arg6[%c0_29, %c0_30] : memref<1x32xf32, #tpu.memory_space<vmem>>, vector<1x32xf32>
    %55 = vector.broadcast %54 : vector<1x32xf32> to vector<8x32xf32>
    %56 = arith.addf %53, %55 : vector<8x32xf32>
    %57 = vector.shape_cast %56 : vector<8x32xf32> to vector<8x4x8xf32>
    %58 = tpu.transpose %57, [1, 0, 2] : vector<8x4x8xf32> -> vector<4x8x8xf32>
    %59 = arith.truncf %58 : vector<4x8x8xf32> to vector<4x8x8xbf16>
    %60 = tpu.iota {dimensions = array<i32: 0>} : vector<8x8xi32>
    %61 = vector.broadcast %1 : i32 to vector<8x8xi32>
    %62 = arith.addi %61, %60 : vector<8x8xi32>
    %cst_31 = arith.constant -1.000000e+30 : f32
    %63 = vector.broadcast %cst_31 : f32 to vector<4x8x1xf32>
    %c0_32 = arith.constant 0 : index
    %c0_33 = arith.constant 0 : index
    %c0_34 = arith.constant 0 : index
    %64 = vector.load %arg21[%c0_32, %c0_33, %c0_34] : memref<4x8x1xf32, #tpu.memory_space<vmem>>, vector<4x8x1xf32>
    tpu.vector_store %arg21[%c0_32, %c0_33, %c0_34], %63 {strides = array<i32>} : memref<4x8x1xf32, #tpu.memory_space<vmem>>, vector<4x8x1xf32>,
    %cst_35 = arith.constant 0.000000e+00 : f32
    %65 = vector.broadcast %cst_35 : f32 to vector<4x8x1xf32>
    %c0_36 = arith.constant 0 : index
    %c0_37 = arith.constant 0 : index
    %c0_38 = arith.constant 0 : index
    %66 = vector.load %arg22[%c0_36, %c0_37, %c0_38] : memref<4x8x1xf32, #tpu.memory_space<vmem>>, vector<4x8x1xf32>
    tpu.vector_store %arg22[%c0_36, %c0_37, %c0_38], %65 {strides = array<i32>} : memref<4x8x1xf32, #tpu.memory_space<vmem>>, vector<4x8x1xf32>,
    %cst_39 = arith.constant 0.000000e+00 : f32
    %67 = vector.broadcast %cst_39 : f32 to vector<4x8x8xf32>
    %c0_40 = arith.constant 0 : index
    %c0_41 = arith.constant 0 : index
    %c0_42 = arith.constant 0 : index
    %68 = vector.load %arg23[%c0_40, %c0_41, %c0_42] : memref<4x8x8xf32, #tpu.memory_space<vmem>>, vector<4x8x8xf32>
    tpu.vector_store %arg23[%c0_40, %c0_41, %c0_42], %67 {strides = array<i32>} : memref<4x8x8xf32, #tpu.memory_space<vmem>>, vector<4x8x8xf32>,
    %c1_i32 = arith.constant 1 : i32
    %69 = arith.addi %arg1, %c1_i32 : i32
    %c0_i32 = arith.constant 0 : i32
    %70 = arith.subi %69, %c0_i32 : i32
    %c1_i32_43 = arith.constant 1 : i32
    %c1_i32_44 = arith.constant 1 : i32
    %71 = arith.subi %c1_i32_43, %c1_i32_44 : i32
    %72 = arith.addi %70, %71 : i32
    %c1_i32_45 = arith.constant 1 : i32
    %73 = arith.divsi %72, %c1_i32_45 : i32
    %c1_i32_46 = arith.constant 1 : i32
    %c0_i32_47 = arith.constant 0 : i32
    %c0_i32_48 = arith.constant 0 : i32
    %74 = arith.subi %73, %c0_i32_48 : i32
    %75 = arith.addi %c0_i32_48, %74 : i32
    %c1_i32_49 = arith.constant 1 : i32
    scf.for %arg24 = %c0_i32_48 to %75 step %c1_i32_49  : i32 {
      %143 = arith.muli %arg24, %c1_i32_46 : i32
      %144 = arith.addi %c0_i32_47, %143 : i32
      %c8_i32_87 = arith.constant 8 : i32
      %145 = arith.muli %144, %c8_i32_87 : i32
      %146 = tpu.assume_multiple %145, 8 : i32
      %c0_88 = arith.constant 0 : index
      %147 = arith.index_cast %146 : i32 to index
      %c0_89 = arith.constant 0 : index
      %148 = vector.load %arg19[%c0_88, %147, %c0_89] : memref<4x8x8xbf16, #tpu.memory_space<vmem>>, vector<4x8x8xbf16>
      %c0_90 = arith.constant 0 : index
      %149 = arith.index_cast %146 : i32 to index
      %c0_91 = arith.constant 0 : index
      %150 = vector.load %arg20[%c0_90, %149, %c0_91] : memref<4x8x8xbf16, #tpu.memory_space<vmem>>, vector<4x8x8xbf16>
      "tpu.trace_start"() <{level = 10 : i32, message = "hqd,hkd->hqk"}> : () -> ()
      %cst_92 = arith.constant dense<0.000000e+00> : vector<4x8x8xf32>
      %151 = tpu.matmul %59, %148, %cst_92 {dimension_numbers = #tpu.dot_dimension_numbers<[2], [2], [1], [1], [0, 0, 0, 1, 1, 1], [0], [0]>} : vector<4x8x8xbf16>, vector<4x8x8xbf16>, vector<4x8x8xf32> -> vector<4x8x8xf32>
      "tpu.trace_stop"() : () -> ()
      %152 = tpu.iota {dimensions = array<i32: 1>} : vector<8x8xi32>
      %153 = vector.broadcast %146 : i32 to vector<8x8xi32>
      %154 = arith.addi %153, %152 : vector<8x8xi32>
      %155 = arith.cmpi sle, %154, %62 : vector<8x8xi32>
      %156 = vector.shape_cast %155 : vector<8x8xi1> to vector<1x8x8xi1>
      %cst_93 = arith.constant -1.000000e+10 : f32
      %157 = vector.shape_cast %156 : vector<1x8x8xi1> to vector<1x8x8xi1>
      %158 = vector.broadcast %157 : vector<1x8x8xi1> to vector<4x8x8xi1>
      %159 = vector.broadcast %cst_93 : f32 to vector<4x8x8xf32>
      %160 = arith.select %158, %151, %159 : vector<4x8x8xi1>, vector<4x8x8xf32>
      %c0_94 = arith.constant 0 : index
      %c0_95 = arith.constant 0 : index
      %c0_96 = arith.constant 0 : index
      %161 = vector.load %arg21[%c0_94, %c0_95, %c0_96] : memref<4x8x1xf32, #tpu.memory_space<vmem>>, vector<4x8x1xf32>
      %cst_97 = arith.constant dense<0xFF800000> : vector<4x8xf32>
      %162 = vector.multi_reduction <maximumf>, %160, %cst_97 [2] : vector<4x8x8xf32> to vector<4x8xf32>
      %163 = vector.shape_cast %162 : vector<4x8xf32> to vector<4x8x1xf32>
      %164 = arith.maximumf %161, %163 : vector<4x8x1xf32>
      %165 = arith.subf %161, %164 : vector<4x8x1xf32>
      %166 = math.exp %165 : vector<4x8x1xf32>
      %167 = vector.broadcast %164 : vector<4x8x1xf32> to vector<4x8x8xf32>
      %168 = arith.subf %160, %167 : vector<4x8x8xf32>
      %169 = math.exp %168 : vector<4x8x8xf32>
      %c0_98 = arith.constant 0 : index
      %c0_99 = arith.constant 0 : index
      %c0_100 = arith.constant 0 : index
      %170 = vector.load %arg22[%c0_98, %c0_99, %c0_100] : memref<4x8x1xf32, #tpu.memory_space<vmem>>, vector<4x8x1xf32>
      %171 = arith.mulf %166, %170 : vector<4x8x1xf32>
      %cst_101 = arith.constant dense<0.000000e+00> : vector<4x8xf32>
      %172 = vector.multi_reduction <add>, %169, %cst_101 [2] : vector<4x8x8xf32> to vector<4x8xf32>
      %173 = vector.shape_cast %172 : vector<4x8xf32> to vector<4x8x1xf32>
      %174 = arith.addf %171, %173 : vector<4x8x1xf32>
      %c0_102 = arith.constant 0 : index
      %c0_103 = arith.constant 0 : index
      %c0_104 = arith.constant 0 : index
      %175 = vector.load %arg22[%c0_102, %c0_103, %c0_104] : memref<4x8x1xf32, #tpu.memory_space<vmem>>, vector<4x8x1xf32>
      tpu.vector_store %arg22[%c0_102, %c0_103, %c0_104], %174 {strides = array<i32>} : memref<4x8x1xf32, #tpu.memory_space<vmem>>, vector<4x8x1xf32>,
      %c0_105 = arith.constant 0 : index
      %c0_106 = arith.constant 0 : index
      %c0_107 = arith.constant 0 : index
      %176 = vector.load %arg23[%c0_105, %c0_106, %c0_107] : memref<4x8x8xf32, #tpu.memory_space<vmem>>, vector<4x8x8xf32>
      %177 = vector.broadcast %166 : vector<4x8x1xf32> to vector<4x8x8xf32>
      %178 = arith.mulf %177, %176 : vector<4x8x8xf32>
      %179 = arith.truncf %169 : vector<4x8x8xf32> to vector<4x8x8xbf16>
      "tpu.trace_start"() <{level = 10 : i32, message = "hqk,hkd->hqd"}> : () -> ()
      %cst_108 = arith.constant dense<0.000000e+00> : vector<4x8x8xf32>
      %180 = tpu.matmul %179, %150, %cst_108 {dimension_numbers = #tpu.dot_dimension_numbers<[2], [1], [1], [2], [0, 0, 0, 1, 1, 2], [0], [0]>} : vector<4x8x8xbf16>, vector<4x8x8xbf16>, vector<4x8x8xf32> -> vector<4x8x8xf32>
      "tpu.trace_stop"() : () -> ()
      %181 = arith.addf %178, %180 : vector<4x8x8xf32>
      %c0_109 = arith.constant 0 : index
      %c0_110 = arith.constant 0 : index
      %c0_111 = arith.constant 0 : index
      %182 = vector.load %arg23[%c0_109, %c0_110, %c0_111] : memref<4x8x8xf32, #tpu.memory_space<vmem>>, vector<4x8x8xf32>
      tpu.vector_store %arg23[%c0_109, %c0_110, %c0_111], %181 {strides = array<i32>} : memref<4x8x8xf32, #tpu.memory_space<vmem>>, vector<4x8x8xf32>,
      %c0_112 = arith.constant 0 : index
      %c0_113 = arith.constant 0 : index
      %c0_114 = arith.constant 0 : index
      %183 = vector.load %arg21[%c0_112, %c0_113, %c0_114] : memref<4x8x1xf32, #tpu.memory_space<vmem>>, vector<4x8x1xf32>
      tpu.vector_store %arg21[%c0_112, %c0_113, %c0_114], %164 {strides = array<i32>} : memref<4x8x1xf32, #tpu.memory_space<vmem>>, vector<4x8x1xf32>,
    }
    %c0_50 = arith.constant 0 : index
    %c0_51 = arith.constant 0 : index
    %c0_52 = arith.constant 0 : index
    %76 = vector.load %arg23[%c0_50, %c0_51, %c0_52] : memref<4x8x8xf32, #tpu.memory_space<vmem>>, vector<4x8x8xf32>
    %c0_53 = arith.constant 0 : index
    %c0_54 = arith.constant 0 : index
    %c0_55 = arith.constant 0 : index
    %77 = vector.load %arg22[%c0_53, %c0_54, %c0_55] : memref<4x8x1xf32, #tpu.memory_space<vmem>>, vector<4x8x1xf32>
    %78 = tpu.reciprocal %77 {approx = true} : vector<4x8x1xf32> -> vector<4x8x1xf32>
    %79 = vector.broadcast %78 : vector<4x8x1xf32> to vector<4x8x8xf32>
    %80 = arith.mulf %76, %79 : vector<4x8x8xf32>
    %81 = tpu.transpose %80, [1, 0, 2] : vector<4x8x8xf32> -> vector<8x4x8xf32>
    %82 = vector.shape_cast %81 : vector<8x4x8xf32> to vector<8x32xf32>
    %83 = arith.truncf %82 : vector<8x32xf32> to vector<8x32xbf16>
    %c0_56 = arith.constant 0 : index
    %c0_57 = arith.constant 0 : index
    %84 = vector.load %arg9[%c0_56, %c0_57] : memref<32x32xbf16, #tpu.memory_space<vmem>>, vector<32x32xbf16>
    %cst_58 = arith.constant dense<0.000000e+00> : vector<8x32xf32>
    %85 = tpu.matmul %83, %84, %cst_58 {dimension_numbers = #tpu.dot_dimension_numbers<[1], [0], [0], [1], [0, 0, 1, 1], [], []>} : vector<8x32xbf16>, vector<32x32xbf16>, vector<8x32xf32> -> vector<8x32xf32>
    %c0_59 = arith.constant 0 : index
    %c0_60 = arith.constant 0 : index
    %86 = vector.load %arg10[%c0_59, %c0_60] : memref<1x32xf32, #tpu.memory_space<vmem>>, vector<1x32xf32>
    %87 = vector.broadcast %86 : vector<1x32xf32> to vector<8x32xf32>
    %88 = arith.addf %85, %87 : vector<8x32xf32>
    %89 = arith.addf %3, %88 : vector<8x32xf32>
    %c0_61 = arith.constant 0 : index
    %c0_62 = arith.constant 0 : index
    %90 = vector.load %arg11[%c0_61, %c0_62] : memref<1x32xf32, #tpu.memory_space<vmem>>, vector<1x32xf32>
    %c0_63 = arith.constant 0 : index
    %c0_64 = arith.constant 0 : index
    %91 = vector.load %arg12[%c0_63, %c0_64] : memref<1x32xf32, #tpu.memory_space<vmem>>, vector<1x32xf32>
    %cst_65 = arith.constant dense<0.000000e+00> : vector<8xf32>
    %92 = vector.multi_reduction <add>, %89, %cst_65 [1] : vector<8x32xf32> to vector<8xf32>
    %93 = vector.shape_cast %92 : vector<8xf32> to vector<8x1xf32>
    %cst_66 = arith.constant 3.200000e+01 : f32
    %94 = vector.broadcast %cst_66 : f32 to vector<8x1xf32>
    %95 = arith.divf %93, %94 : vector<8x1xf32>
    %96 = vector.broadcast %95 : vector<8x1xf32> to vector<8x32xf32>
    %97 = arith.subf %89, %96 : vector<8x32xf32>
    %98 = arith.mulf %97, %97 : vector<8x32xf32>
    %cst_67 = arith.constant dense<0.000000e+00> : vector<8xf32>
    %99 = vector.multi_reduction <add>, %98, %cst_67 [1] : vector<8x32xf32> to vector<8xf32>
    %100 = vector.shape_cast %99 : vector<8xf32> to vector<8x1xf32>
    %cst_68 = arith.constant 3.200000e+01 : f32
    %101 = vector.broadcast %cst_68 : f32 to vector<8x1xf32>
    %102 = arith.divf %100, %101 : vector<8x1xf32>
    %103 = vector.broadcast %95 : vector<8x1xf32> to vector<8x32xf32>
    %104 = arith.subf %89, %103 : vector<8x32xf32>
    %cst_69 = arith.constant 9.99999974E-6 : f32
    %105 = vector.broadcast %cst_69 : f32 to vector<8x1xf32>
    %106 = arith.addf %102, %105 : vector<8x1xf32>
    %107 = math.rsqrt %106 : vector<8x1xf32>
    %108 = vector.broadcast %107 : vector<8x1xf32> to vector<8x32xf32>
    %109 = arith.mulf %104, %108 : vector<8x32xf32>
    %110 = vector.broadcast %90 : vector<1x32xf32> to vector<8x32xf32>
    %111 = arith.mulf %109, %110 : vector<8x32xf32>
    %112 = vector.broadcast %91 : vector<1x32xf32> to vector<8x32xf32>
    %113 = arith.addf %111, %112 : vector<8x32xf32>
    %114 = arith.truncf %113 : vector<8x32xf32> to vector<8x32xbf16>
    %c0_70 = arith.constant 0 : index
    %c0_71 = arith.constant 0 : index
    %115 = vector.load %arg13[%c0_70, %c0_71] : memref<32x128xbf16, #tpu.memory_space<vmem>>, vector<32x128xbf16>
    %cst_72 = arith.constant dense<0.000000e+00> : vector<8x128xf32>
    %116 = tpu.matmul %114, %115, %cst_72 {dimension_numbers = #tpu.dot_dimension_numbers<[1], [0], [0], [1], [0, 0, 1, 1], [], []>} : vector<8x32xbf16>, vector<32x128xbf16>, vector<8x128xf32> -> vector<8x128xf32>
    %c0_73 = arith.constant 0 : index
    %c0_74 = arith.constant 0 : index
    %117 = vector.load %arg14[%c0_73, %c0_74] : memref<1x128xf32, #tpu.memory_space<vmem>>, vector<1x128xf32>
    %118 = vector.broadcast %117 : vector<1x128xf32> to vector<8x128xf32>
    %119 = arith.addf %116, %118 : vector<8x128xf32>
    %cst_75 = arith.constant 5.000000e-01 : f32
    %120 = vector.broadcast %cst_75 : f32 to vector<8x128xf32>
    %121 = arith.mulf %120, %119 : vector<8x128xf32>
    %cst_76 = arith.constant 4.471500e-02 : f32
    %122 = vector.broadcast %cst_76 : f32 to vector<8x128xf32>
    %123 = arith.mulf %122, %119 : vector<8x128xf32>
    %124 = arith.mulf %123, %119 : vector<8x128xf32>
    %125 = arith.mulf %124, %119 : vector<8x128xf32>
    %126 = arith.addf %119, %125 : vector<8x128xf32>
    %cst_77 = arith.constant 0.797884583 : f32
    %127 = vector.broadcast %cst_77 : f32 to vector<8x128xf32>
    %128 = arith.mulf %127, %126 : vector<8x128xf32>
    %129 = math.tanh %128 : vector<8x128xf32>
    %cst_78 = arith.constant 1.000000e+00 : f32
    %130 = vector.broadcast %cst_78 : f32 to vector<8x128xf32>
    %131 = arith.addf %130, %129 : vector<8x128xf32>
    %132 = arith.mulf %121, %131 : vector<8x128xf32>
    %133 = arith.truncf %132 : vector<8x128xf32> to vector<8x128xbf16>
    %c0_79 = arith.constant 0 : index
    %c0_80 = arith.constant 0 : index
    %134 = vector.load %arg15[%c0_79, %c0_80] : memref<128x32xbf16, #tpu.memory_space<vmem>>, vector<128x32xbf16>
    %cst_81 = arith.constant dense<0.000000e+00> : vector<8x32xf32>
    %135 = tpu.matmul %133, %134, %cst_81 {dimension_numbers = #tpu.dot_dimension_numbers<[1], [0], [0], [1], [0, 0, 1, 1], [], []>} : vector<8x128xbf16>, vector<128x32xbf16>, vector<8x32xf32> -> vector<8x32xf32>
    %c0_82 = arith.constant 0 : index
    %c0_83 = arith.constant 0 : index
    %136 = vector.load %arg16[%c0_82, %c0_83] : memref<1x32xf32, #tpu.memory_space<vmem>>, vector<1x32xf32>
    %137 = vector.broadcast %136 : vector<1x32xf32> to vector<8x32xf32>
    %138 = arith.addf %135, %137 : vector<8x32xf32>
    %139 = arith.addf %89, %138 : vector<8x32xf32>
    %c0_84 = arith.constant 0 : index
    %c0_85 = arith.constant 0 : index
    %c0_86 = arith.constant 0 : index
    %140 = vector.load %arg17[%c0_84, %c0_85, %c0_86] : memref<1x8x32xf32, #tpu.memory_space<vmem>>, vector<1x8x32xf32>
    %141 = vector.shape_cast %140 : vector<1x8x32xf32> to vector<8x32xf32>
    %142 = vector.shape_cast %139 : vector<8x32xf32> to vector<1x8x32xf32>
    tpu.vector_store %arg17[%c0_84, %c0_85, %c0_86], %142 {strides = array<i32>} : memref<1x8x32xf32, #tpu.memory_space<vmem>>, vector<1x8x32xf32>,
    return
  }
  func.func @transform_0(%arg0: i32, %arg1: i32) -> (i32, i32, i32) {
    %c0_i32 = arith.constant 0 : i32
    %c0_i32_0 = arith.constant 0 : i32
    return %arg0, %arg1, %c0_i32 : i32, i32, i32
  }
  func.func @transform_1(%arg0: i32, %arg1: i32) -> (i32, i32) {
    %c0_i32 = arith.constant 0 : i32
    %c0_i32_0 = arith.constant 0 : i32
    %c0_i32_1 = arith.constant 0 : i32
    return %c0_i32, %c0_i32_0 : i32, i32
  }
  func.func @transform_2(%arg0: i32, %arg1: i32) -> (i32, i32) {
    %c0_i32 = arith.constant 0 : i32
    %c0_i32_0 = arith.constant 0 : i32
    %c0_i32_1 = arith.constant 0 : i32
    return %c0_i32, %c0_i32_0 : i32, i32
  }
  func.func @transform_3(%arg0: i32, %arg1: i32) -> (i32, i32) {
    %c0_i32 = arith.constant 0 : i32
    %c0_i32_0 = arith.constant 0 : i32
    %c0_i32_1 = arith.constant 0 : i32
    return %c0_i32, %c0_i32_0 : i32, i32
  }
  func.func @transform_4(%arg0: i32, %arg1: i32) -> (i32, i32) {
    %c0_i32 = arith.constant 0 : i32
    %c0_i32_0 = arith.constant 0 : i32
    %c0_i32_1 = arith.constant 0 : i32
    return %c0_i32, %c0_i32_0 : i32, i32
  }
  func.func @transform_5(%arg0: i32, %arg1: i32) -> (i32, i32) {
    %c0_i32 = arith.constant 0 : i32
    %c0_i32_0 = arith.constant 0 : i32
    %c0_i32_1 = arith.constant 0 : i32
    return %c0_i32, %c0_i32_0 : i32, i32
  }
  func.func @transform_6(%arg0: i32, %arg1: i32) -> (i32, i32) {
    %c0_i32 = arith.constant 0 : i32
    %c0_i32_0 = arith.constant 0 : i32
    %c0_i32_1 = arith.constant 0 : i32
    return %c0_i32, %c0_i32_0 : i32, i32
  }
  func.func @transform_7(%arg0: i32, %arg1: i32) -> (i32, i32) {
    %c0_i32 = arith.constant 0 : i32
    %c0_i32_0 = arith.constant 0 : i32
    %c0_i32_1 = arith.constant 0 : i32
    return %c0_i32, %c0_i32_0 : i32, i32
  }
  func.func @transform_8(%arg0: i32, %arg1: i32) -> (i32, i32) {
    %c0_i32 = arith.constant 0 : i32
    %c0_i32_0 = arith.constant 0 : i32
    %c0_i32_1 = arith.constant 0 : i32
    return %c0_i32, %c0_i32_0 : i32, i32
  }
  func.func @transform_9(%arg0: i32, %arg1: i32) -> (i32, i32) {
    %c0_i32 = arith.constant 0 : i32
    %c0_i32_0 = arith.constant 0 : i32
    %c0_i32_1 = arith.constant 0 : i32
    return %c0_i32, %c0_i32_0 : i32, i32
  }
  func.func @transform_10(%arg0: i32, %arg1: i32) -> (i32, i32) {
    %c0_i32 = arith.constant 0 : i32
    %c0_i32_0 = arith.constant 0 : i32
    %c0_i32_1 = arith.constant 0 : i32
    return %c0_i32, %c0_i32_0 : i32, i32
  }
  func.func @transform_11(%arg0: i32, %arg1: i32) -> (i32, i32) {
    %c0_i32 = arith.constant 0 : i32
    %c0_i32_0 = arith.constant 0 : i32
    %c0_i32_1 = arith.constant 0 : i32
    return %c0_i32, %c0_i32_0 : i32, i32
  }
  func.func @transform_12(%arg0: i32, %arg1: i32) -> (i32, i32) {
    %c0_i32 = arith.constant 0 : i32
    %c0_i32_0 = arith.constant 0 : i32
    %c0_i32_1 = arith.constant 0 : i32
    return %c0_i32, %c0_i32_0 : i32, i32
  }
  func.func @transform_13(%arg0: i32, %arg1: i32) -> (i32, i32) {
    %c0_i32 = arith.constant 0 : i32
    %c0_i32_0 = arith.constant 0 : i32
    %c0_i32_1 = arith.constant 0 : i32
    return %c0_i32, %c0_i32_0 : i32, i32
  }
  func.func @transform_14(%arg0: i32, %arg1: i32) -> (i32, i32) {
    %c0_i32 = arith.constant 0 : i32
    %c0_i32_0 = arith.constant 0 : i32
    %c0_i32_1 = arith.constant 0 : i32
    return %c0_i32, %c0_i32_0 : i32, i32
  }
  func.func @transform_15(%arg0: i32, %arg1: i32) -> (i32, i32, i32) {
    %c0_i32 = arith.constant 0 : i32
    %c0_i32_0 = arith.constant 0 : i32
    return %arg0, %arg1, %c0_i32 : i32, i32, i32
  }
  func.func @transform_16(%arg0: i32, %arg1: i32) -> (i32, i32, i32, i32) {
    %c0_i32 = arith.constant 0 : i32
    %c0_i32_0 = arith.constant 0 : i32
    %c0_i32_1 = arith.constant 0 : i32
    return %c0_i32, %arg0, %arg1, %c0_i32_0 : i32, i32, i32, i32
  }
}

module attributes {stable_mosaic.version = 11 : i64} {
  func.func @block_kernel(%arg0: i32, %arg1: i32, %arg2: memref<1x8x32xf32, #tpu.memory_space<vmem>>, %arg3: memref<1x32xf32, #tpu.memory_space<vmem>>, %arg4: memref<1x32xf32, #tpu.memory_space<vmem>>, %arg5: memref<32x32xbf16, #tpu.memory_space<vmem>>, %arg6: memref<1x32xf32, #tpu.memory_space<vmem>>, %arg7: memref<32x64xbf16, #tpu.memory_space<vmem>>, %arg8: memref<1x64xf32, #tpu.memory_space<vmem>>, %arg9: memref<32x32xbf16, #tpu.memory_space<vmem>>, %arg10: memref<1x32xf32, #tpu.memory_space<vmem>>, %arg11: memref<1x32xf32, #tpu.memory_space<vmem>>, %arg12: memref<1x32xf32, #tpu.memory_space<vmem>>, %arg13: memref<32x128xbf16, #tpu.memory_space<vmem>>, %arg14: memref<1x128xf32, #tpu.memory_space<vmem>>, %arg15: memref<128x32xbf16, #tpu.memory_space<vmem>>, %arg16: memref<1x32xf32, #tpu.memory_space<vmem>>, %arg17: memref<1x8x32xf32, #tpu.memory_space<vmem>>, %arg18: memref<2x1x8x32xf32, #tpu.memory_space<vmem>>, %arg19: memref<4x8x8xbf16, #tpu.memory_space<vmem>>, %arg20: memref<4x8x8xbf16, #tpu.memory_space<vmem>>, %arg21: memref<4x8x1xf32, #tpu.memory_space<vmem>>, %arg22: memref<4x8x1xf32, #tpu.memory_space<vmem>>, %arg23: memref<4x8x8xf32, #tpu.memory_space<vmem>>) attributes {dimension_semantics = [#tpu.dimension_semantics<parallel>, #tpu.dimension_semantics<arbitrary>], iteration_bounds = array<i64: 2, 1>, scalar_prefetch = 0 : i64, scratch_operands = 5 : i64, tpu.core_type = #tpu.core_type<tc>, window_params = [{transform_indices = @transform_0, window_bounds = array<i64: 1, 8, 32>}, {pipeline_mode = #tpu.pipeline_mode<synchronous>, transform_indices = @transform_1, window_bounds = array<i64: 1, 32>}, {pipeline_mode = #tpu.pipeline_mode<synchronous>, transform_indices = @transform_2, window_bounds = array<i64: 1, 32>}, {pipeline_mode = #tpu.pipeline_mode<synchronous>, transform_indices = @transform_3, window_bounds = array<i64: 32, 32>}, {pipeline_mode = #tpu.pipeline_mode<synchronous>, transform_indices = @transform_4, window_bounds = array<i64: 1, 32>}, {pipeline_mode = #tpu.pipeline_mode<synchronous>, transform_indices = @transform_5, window_bounds = array<i64: 32, 64>}, {pipeline_mode = #tpu.pipeline_mode<synchronous>, transform_indices = @transform_6, window_bounds = array<i64: 1, 64>}, {pipeline_mode = #tpu.pipeline_mode<synchronous>, transform_indices = @transform_7, window_bounds = array<i64: 32, 32>}, {pipeline_mode = #tpu.pipeline_mode<synchronous>, transform_indices = @transform_8, window_bounds = array<i64: 1, 32>}, {pipeline_mode = #tpu.pipeline_mode<synchronous>, transform_indices = @transform_9, window_bounds = array<i64: 1, 32>}, {pipeline_mode = #tpu.pipeline_mode<synchronous>, transform_indices = @transform_10, window_bounds = array<i64: 1, 32>}, {pipeline_mode = #tpu.pipeline_mode<synchronous>, transform_indices = @transform_11, window_bounds = array<i64: 32, 128>}, {pipeline_mode = #tpu.pipeline_mode<synchronous>, transform_indices = @transform_12, window_bounds = array<i64: 1, 128>}, {pipeline_mode = #tpu.pipeline_mode<synchronous>, transform_indices = @transform_13, window_bounds = array<i64: 128, 32>}, {pipeline_mode = #tpu.pipeline_mode<synchronous>, transform_indices = @transform_14, window_bounds = array<i64: 1, 32>}, {transform_indices = @transform_15, window_bounds = array<i64: 1, 8, 32>}, {transform_indices = @transform_16, window_bounds = array<i64: 2, 1, 8, 32>}]} {
    %c8_i32 = arith.constant 8 : i32
    %0 = arith.muli %arg1, %c8_i32 : i32
    %1 = tpu.assume_multiple %0, 8 : i32
    %c0 = arith.constant 0 : index
    %c0_0 = arith.constant 0 : index
    %c0_1 = arith.constant 0 : index
    %2 = vector.load %arg2[%c0, %c0_0, %c0_1] : memref<1x8x32xf32, #tpu.memory_space<vmem>>, vector<1x8x32xf32>
    %3 = vector.shape_cast %2 : vector<1x8x32xf32> to vector<8x32xf32>
    %c0_2 = arith.constant 0 : index
    %c0_3 = arith.constant 0 : index
    %4 = vector.load %arg3[%c0_2, %c0_3] : memref<1x32xf32, #tpu.memory_space<vmem>>, vector<1x32xf32>
    %c0_4 = arith.constant 0 : index
    %c0_5 = arith.constant 0 : index
    %5 = vector.load %arg4[%c0_4, %c0_5] : memref<1x32xf32, #tpu.memory_space<vmem>>, vector<1x32xf32>
    %cst = arith.constant dense<0.000000e+00> : vector<8xf32>
    %6 = vector.multi_reduction <add>, %3, %cst [1] : vector<8x32xf32> to vector<8xf32>
    %7 = vector.shape_cast %6 : vector<8xf32> to vector<8x1xf32>
    %cst_6 = arith.constant 3.200000e+01 : f32
    %8 = vector.broadcast %cst_6 : f32 to vector<8x1xf32>
    %9 = arith.divf %7, %8 : vector<8x1xf32>
    %10 = vector.broadcast %9 : vector<8x1xf32> to vector<8x32xf32>
    %11 = arith.subf %3, %10 : vector<8x32xf32>
    %12 = arith.mulf %11, %11 : vector<8x32xf32>
    %cst_7 = arith.constant dense<0.000000e+00> : vector<8xf32>
    %13 = vector.multi_reduction <add>, %12, %cst_7 [1] : vector<8x32xf32> to vector<8xf32>
    %14 = vector.shape_cast %13 : vector<8xf32> to vector<8x1xf32>
    %cst_8 = arith.constant 3.200000e+01 : f32
    %15 = vector.broadcast %cst_8 : f32 to vector<8x1xf32>
    %16 = arith.divf %14, %15 : vector<8x1xf32>
    %17 = vector.broadcast %9 : vector<8x1xf32> to vector<8x32xf32>
    %18 = arith.subf %3, %17 : vector<8x32xf32>
    %cst_9 = arith.constant 9.99999974E-6 : f32
    %19 = vector.broadcast %cst_9 : f32 to vector<8x1xf32>
    %20 = arith.addf %16, %19 : vector<8x1xf32>
    %21 = math.rsqrt %20 : vector<8x1xf32>
    %22 = vector.broadcast %21 : vector<8x1xf32> to vector<8x32xf32>
    %23 = arith.mulf %18, %22 : vector<8x32xf32>
    %24 = vector.broadcast %4 : vector<1x32xf32> to vector<8x32xf32>
    %25 = arith.mulf %23, %24 : vector<8x32xf32>
    %26 = vector.broadcast %5 : vector<1x32xf32> to vector<8x32xf32>
    %27 = arith.addf %25, %26 : vector<8x32xf32>
    %28 = arith.truncf %27 : vector<8x32xf32> to vector<8x32xbf16>
    %c0_10 = arith.constant 0 : index
    %c0_11 = arith.constant 0 : index
    %29 = vector.load %arg7[%c0_10, %c0_11] : memref<32x64xbf16, #tpu.memory_space<vmem>>, vector<32x64xbf16>
    %cst_12 = arith.constant dense<0.000000e+00> : vector<8x64xf32>
    %30 = tpu.matmul %28, %29, %cst_12 {dimension_numbers = #tpu.dot_dimension_numbers<[1], [0], [0], [1], [0, 0, 1, 1], [], []>} : vector<8x32xbf16>, vector<32x64xbf16>, vector<8x64xf32> -> vector<8x64xf32>
    %c0_13 = arith.constant 0 : index
    %c0_14 = arith.constant 0 : index
    %31 = vector.load %arg8[%c0_13, %c0_14] : memref<1x64xf32, #tpu.memory_space<vmem>>, vector<1x64xf32>
    %32 = vector.broadcast %31 : vector<1x64xf32> to vector<8x64xf32>
    %33 = arith.addf %30, %32 : vector<8x64xf32>
    %34 = vector.extract_strided_slice %33 {offsets = [0, 0], sizes = [8, 32], strides = [1, 1]} : vector<8x64xf32> to vector<8x32xf32>
    %35 = vector.extract_strided_slice %33 {offsets = [0, 32], sizes = [8, 32], strides = [1, 1]} : vector<8x64xf32> to vector<8x32xf32>
    %c0_15 = arith.constant 0 : index
    %c0_16 = arith.constant 0 : index
    %c0_17 = arith.constant 0 : index
    %c0_18 = arith.constant 0 : index
    %36 = vector.load %arg18[%c0_15, %c0_16, %c0_17, %c0_18] : memref<2x1x8x32xf32, #tpu.memory_space<vmem>>, vector<1x1x8x32xf32>
    %37 = vector.shape_cast %36 : vector<1x1x8x32xf32> to vector<8x32xf32>
    %38 = vector.shape_cast %34 : vector<8x32xf32> to vector<1x1x8x32xf32>
    tpu.vector_store %arg18[%c0_15, %c0_16, %c0_17, %c0_18], %38 {strides = array<i32>} : memref<2x1x8x32xf32, #tpu.memory_space<vmem>>, vector<1x1x8x32xf32>,
    %c1 = arith.constant 1 : index
    %c0_19 = arith.constant 0 : index
    %c0_20 = arith.constant 0 : index
    %c0_21 = arith.constant 0 : index
    %39 = vector.load %arg18[%c1, %c0_19, %c0_20, %c0_21] : memref<2x1x8x32xf32, #tpu.memory_space<vmem>>, vector<1x1x8x32xf32>
    %40 = vector.shape_cast %39 : vector<1x1x8x32xf32> to vector<8x32xf32>
    %41 = vector.shape_cast %35 : vector<8x32xf32> to vector<1x1x8x32xf32>
    tpu.vector_store %arg18[%c1, %c0_19, %c0_20, %c0_21], %41 {strides = array<i32>} : memref<2x1x8x32xf32, #tpu.memory_space<vmem>>, vector<1x1x8x32xf32>,
    %42 = vector.shape_cast %34 : vector<8x32xf32> to vector<8x4x8xf32>
    %43 = tpu.transpose %42, [1, 0, 2] : vector<8x4x8xf32> -> vector<4x8x8xf32>
    %44 = arith.truncf %43 : vector<4x8x8xf32> to vector<4x8x8xbf16>
    %c0_22 = arith.constant 0 : index
    %45 = arith.index_cast %1 : i32 to index
    %c0_23 = arith.constant 0 : index
    %46 = vector.load %arg19[%c0_22, %45, %c0_23] : memref<4x8x8xbf16, #tpu.memory_space<vmem>>, vector<4x8x8xbf16>
    tpu.vector_store %arg19[%c0_22, %45, %c0_23], %44 {strides = array<i32>} : memref<4x8x8xbf16, #tpu.memory_space<vmem>>, vector<4x8x8xbf16>,
    %47 = vector.shape_cast %35 : vector<8x32xf32> to vector<8x4x8xf32>
    %48 = tpu.transpose %47, [1, 0, 2] : vector<8x4x8xf32> -> vector<4x8x8xf32>
    %49 = arith.truncf %48 : vector<4x8x8xf32> to vector<4x8x8xbf16>
    %c0_24 = arith.constant 0 : index
    %50 = arith.index_cast %1 : i32 to index
    %c0_25 = arith.constant 0 : index
    %51 = vector.load %arg20[%c0_24, %50, %c0_25] : memref<4x8x8xbf16, #tpu.memory_space<vmem>>, vector<4x8x8xbf16>
    tpu.vector_store %arg20[%c0_24, %50, %c0_25], %49 {strides = array<i32>} : memref<4x8x8xbf16, #tpu.memory_space<vmem>>, vector<4x8x8xbf16>,
    %c0_26 = arith.constant 0 : index
    %c0_27 = arith.constant 0 : index
    %52 = vector.load %arg5[%c0_26, %c0_27] : memref<32x32xbf16, #tpu.memory_space<vmem>>, vector<32x32xbf16>
    %cst_28 = arith.constant dense<0.000000e+00> : vector<8x32xf32>
    %53 = tpu.matmul %28, %52, %cst_28 {dimension_numbers = #tpu.dot_dimension_numbers<[1], [0], [0], [1], [0, 0, 1, 1], [], []>} : vector<8x32xbf16>, vector<32x32xbf16>, vector<8x32xf32> -> vector<8x32xf32>
    %c0_29 = arith.constant 0 : index
    %c0_30 = arith.constant 0 : index
    %54 = vector.load %arg6[%c0_29, %c0_30] : memref<1x32xf32, #tpu.memory_space<vmem>>, vector<1x32xf32>
    %55 = vector.broadcast %54 : vector<1x32xf32> to vector<8x32xf32>
    %56 = arith.addf %53, %55 : vector<8x32xf32>
    %57 = vector.shape_cast %56 : vector<8x32xf32> to vector<8x4x8xf32>
    %58 = tpu.transpose %57, [1, 0, 2] : vector<8x4x8xf32> -> vector<4x8x8xf32>
    %59 = arith.truncf %58 : vector<4x8x8xf32> to vector<4x8x8xbf16>
    %60 = tpu.iota {dimensions = array<i32: 0>} : vector<8x8xi32>
    %61 = vector.broadcast %1 : i32 to vector<8x8xi32>
    %62 = arith.addi %61, %60 : vector<8x8xi32>
    %cst_31 = arith.constant -1.000000e+30 : f32
    %63 = vector.broadcast %cst_31 : f32 to vector<4x8x1xf32>
    %c0_32 = arith.constant 0 : index
    %c0_33 = arith.constant 0 : index
    %c0_34 = arith.constant 0 : index
    %64 = vector.load %arg21[%c0_32, %c0_33, %c0_34] : memref<4x8x1xf32, #tpu.memory_space<vmem>>, vector<4x8x1xf32>
    tpu.vector_store %arg21[%c0_32, %c0_33, %c0_34], %63 {strides = array<i32>} : memref<4x8x1xf32, #tpu.memory_space<vmem>>, vector<4x8x1xf32>,
    %cst_35 = arith.constant 0.000000e+00 : f32
    %65 = vector.broadcast %cst_35 : f32 to vector<4x8x1xf32>
    %c0_36 = arith.constant 0 : index
    %c0_37 = arith.constant 0 : index
    %c0_38 = arith.constant 0 : index
    %66 = vector.load %arg22[%c0_36, %c0_37, %c0_38] : memref<4x8x1xf32, #tpu.memory_space<vmem>>, vector<4x8x1xf32>
    tpu.vector_store %arg22[%c0_36, %c0_37, %c0_38], %65 {strides = array<i32>} : memref<4x8x1xf32, #tpu.memory_space<vmem>>, vector<4x8x1xf32>,
    %cst_39 = arith.constant 0.000000e+00 : f32
    %67 = vector.broadcast %cst_39 : f32 to vector<4x8x8xf32>
    %c0_40 = arith.constant 0 : index
    %c0_41 = arith.constant 0 : index
    %c0_42 = arith.constant 0 : index
    %68 = vector.load %arg23[%c0_40, %c0_41, %c0_42] : memref<4x8x8xf32, #tpu.memory_space<vmem>>, vector<4x8x8xf32>
    tpu.vector_store %arg23[%c0_40, %c0_41, %c0_42], %67 {strides = array<i32>} : memref<4x8x8xf32, #tpu.memory_space<vmem>>, vector<4x8x8xf32>,
    %c1_i32 = arith.constant 1 : i32
    %69 = arith.addi %arg1, %c1_i32 : i32
    %c0_i32 = arith.constant 0 : i32
    %70 = arith.subi %69, %c0_i32 : i32
    %c1_i32_43 = arith.constant 1 : i32
    %c1_i32_44 = arith.constant 1 : i32
    %71 = arith.subi %c1_i32_43, %c1_i32_44 : i32
    %72 = arith.addi %70, %71 : i32
    %c1_i32_45 = arith.constant 1 : i32
    %73 = arith.divsi %72, %c1_i32_45 : i32
    %c1_i32_46 = arith.constant 1 : i32
    %c0_i32_47 = arith.constant 0 : i32
    %c0_i32_48 = arith.constant 0 : i32
    %74 = arith.subi %73, %c0_i32_48 : i32
    %75 = arith.addi %c0_i32_48, %74 : i32
    %c1_i32_49 = arith.constant 1 : i32
    scf.for %arg24 = %c0_i32_48 to %75 step %c1_i32_49  : i32 {
      %143 = arith.muli %arg24, %c1_i32_46 : i32
      %144 = arith.addi %c0_i32_47, %143 : i32
      %c8_i32_87 = arith.constant 8 : i32
      %145 = arith.muli %144, %c8_i32_87 : i32
      %146 = tpu.assume_multiple %145, 8 : i32
      %c0_88 = arith.constant 0 : index
      %147 = arith.index_cast %146 : i32 to index
      %c0_89 = arith.constant 0 : index
      %148 = vector.load %arg19[%c0_88, %147, %c0_89] : memref<4x8x8xbf16, #tpu.memory_space<vmem>>, vector<4x8x8xbf16>
      %c0_90 = arith.constant 0 : index
      %149 = arith.index_cast %146 : i32 to index
      %c0_91 = arith.constant 0 : index
      %150 = vector.load %arg20[%c0_90, %149, %c0_91] : memref<4x8x8xbf16, #tpu.memory_space<vmem>>, vector<4x8x8xbf16>
      "tpu.trace_start"() <{level = 10 : i32, message = "hqd,hkd->hqk"}> : () -> ()
      %cst_92 = arith.constant dense<0.000000e+00> : vector<4x8x8xf32>
      %151 = tpu.matmul %59, %148, %cst_92 {dimension_numbers = #tpu.dot_dimension_numbers<[2], [2], [1], [1], [0, 0, 0, 1, 1, 1], [0], [0]>} : vector<4x8x8xbf16>, vector<4x8x8xbf16>, vector<4x8x8xf32> -> vector<4x8x8xf32>
      "tpu.trace_stop"() : () -> ()
      %152 = tpu.iota {dimensions = array<i32: 1>} : vector<8x8xi32>
      %153 = vector.broadcast %146 : i32 to vector<8x8xi32>
      %154 = arith.addi %153, %152 : vector<8x8xi32>
      %155 = arith.cmpi sle, %154, %62 : vector<8x8xi32>
      %156 = vector.shape_cast %155 : vector<8x8xi1> to vector<1x8x8xi1>
      %cst_93 = arith.constant -1.000000e+10 : f32
      %157 = vector.shape_cast %156 : vector<1x8x8xi1> to vector<1x8x8xi1>
      %158 = vector.broadcast %157 : vector<1x8x8xi1> to vector<4x8x8xi1>
      %159 = vector.broadcast %cst_93 : f32 to vector<4x8x8xf32>
      %160 = arith.select %158, %151, %159 : vector<4x8x8xi1>, vector<4x8x8xf32>
      %c0_94 = arith.constant 0 : index
      %c0_95 = arith.constant 0 : index
      %c0_96 = arith.constant 0 : index
      %161 = vector.load %arg21[%c0_94, %c0_95, %c0_96] : memref<4x8x1xf32, #tpu.memory_space<vmem>>, vector<4x8x1xf32>
      %cst_97 = arith.constant dense<0xFF800000> : vector<4x8xf32>
      %162 = vector.multi_reduction <maximumf>, %160, %cst_97 [2] : vector<4x8x8xf32> to vector<4x8xf32>
      %163 = vector.shape_cast %162 : vector<4x8xf32> to vector<4x8x1xf32>
      %164 = arith.maximumf %161, %163 : vector<4x8x1xf32>
      %165 = arith.subf %161, %164 : vector<4x8x1xf32>
      %166 = math.exp %165 : vector<4x8x1xf32>
      %167 = vector.broadcast %164 : vector<4x8x1xf32> to vector<4x8x8xf32>
      %168 = arith.subf %160, %167 : vector<4x8x8xf32>
      %169 = math.exp %168 : vector<4x8x8xf32>
      %c0_98 = arith.constant 0 : index
      %c0_99 = arith.constant 0 : index
      %c0_100 = arith.constant 0 : index
      %170 = vector.load %arg22[%c0_98, %c0_99, %c0_100] : memref<4x8x1xf32, #tpu.memory_space<vmem>>, vector<4x8x1xf32>
      %171 = arith.mulf %166, %170 : vector<4x8x1xf32>
      %cst_101 = arith.constant dense<0.000000e+00> : vector<4x8xf32>
      %172 = vector.multi_reduction <add>, %169, %cst_101 [2] : vector<4x8x8xf32> to vector<4x8xf32>
      %173 = vector.shape_cast %172 : vector<4x8xf32> to vector<4x8x1xf32>
      %174 = arith.addf %171, %173 : vector<4x8x1xf32>
      %c0_102 = arith.constant 0 : index
      %c0_103 = arith.constant 0 : index
      %c0_104 = arith.constant 0 : index
      %175 = vector.load %arg22[%c0_102, %c0_103, %c0_104] : memref<4x8x1xf32, #tpu.memory_space<vmem>>, vector<4x8x1xf32>
      tpu.vector_store %arg22[%c0_102, %c0_103, %c0_104], %174 {strides = array<i32>} : memref<4x8x1xf32, #tpu.memory_space<vmem>>, vector<4x8x1xf32>,
      %c0_105 = arith.constant 0 : index
      %c0_106 = arith.constant 0 : index
      %c0_107 = arith.constant 0 : index
      %176 = vector.load %arg23[%c0_105, %c0_106, %c0_107] : memref<4x8x8xf32, #tpu.memory_space<vmem>>, vector<4x8x8xf32>
      %177 = vector.broadcast %166 : vector<4x8x1xf32> to vector<4x8x8xf32>
      %178 = arith.mulf %177, %176 : vector<4x8x8xf32>
      %179 = arith.truncf %169 : vector<4x8x8xf32> to vector<4x8x8xbf16>
      "tpu.trace_start"() <{level = 10 : i32, message = "hqk,hkd->hqd"}> : () -> ()
      %cst_108 = arith.constant dense<0.000000e+00> : vector<4x8x8xf32>
      %180 = tpu.matmul %179, %150, %cst_108 {dimension_numbers = #tpu.dot_dimension_numbers<[2], [1], [1], [2], [0, 0, 0, 1, 1, 2], [0], [0]>} : vector<4x8x8xbf16>, vector<4x8x8xbf16>, vector<4x8x8xf32> -> vector<4x8x8xf32>
      "tpu.trace_stop"() : () -> ()
      %181 = arith.addf %178, %180 : vector<4x8x8xf32>
      %c0_109 = arith.constant 0 : index
      %c0_110 = arith.constant 0 : index
      %c0_111 = arith.constant 0 : index
      %182 = vector.load %arg23[%c0_109, %c0_110, %c0_111] : memref<4x8x8xf32, #tpu.memory_space<vmem>>, vector<4x8x8xf32>
      tpu.vector_store %arg23[%c0_109, %c0_110, %c0_111], %181 {strides = array<i32>} : memref<4x8x8xf32, #tpu.memory_space<vmem>>, vector<4x8x8xf32>,
      %c0_112 = arith.constant 0 : index
      %c0_113 = arith.constant 0 : index
      %c0_114 = arith.constant 0 : index
      %183 = vector.load %arg21[%c0_112, %c0_113, %c0_114] : memref<4x8x1xf32, #tpu.memory_space<vmem>>, vector<4x8x1xf32>
      tpu.vector_store %arg21[%c0_112, %c0_113, %c0_114], %164 {strides = array<i32>} : memref<4x8x1xf32, #tpu.memory_space<vmem>>, vector<4x8x1xf32>,
    }
    %c0_50 = arith.constant 0 : index
    %c0_51 = arith.constant 0 : index
    %c0_52 = arith.constant 0 : index
    %76 = vector.load %arg23[%c0_50, %c0_51, %c0_52] : memref<4x8x8xf32, #tpu.memory_space<vmem>>, vector<4x8x8xf32>
    %c0_53 = arith.constant 0 : index
    %c0_54 = arith.constant 0 : index
    %c0_55 = arith.constant 0 : index
    %77 = vector.load %arg22[%c0_53, %c0_54, %c0_55] : memref<4x8x1xf32, #tpu.memory_space<vmem>>, vector<4x8x1xf32>
    %78 = tpu.reciprocal %77 {approx = true} : vector<4x8x1xf32> -> vector<4x8x1xf32>
    %79 = vector.broadcast %78 : vector<4x8x1xf32> to vector<4x8x8xf32>
    %80 = arith.mulf %76, %79 : vector<4x8x8xf32>
    %81 = tpu.transpose %80, [1, 0, 2] : vector<4x8x8xf32> -> vector<8x4x8xf32>
    %82 = vector.shape_cast %81 : vector<8x4x8xf32> to vector<8x32xf32>
    %83 = arith.truncf %82 : vector<8x32xf32> to vector<8x32xbf16>
    %c0_56 = arith.constant 0 : index
    %c0_57 = arith.constant 0 : index
    %84 = vector.load %arg9[%c0_56, %c0_57] : memref<32x32xbf16, #tpu.memory_space<vmem>>, vector<32x32xbf16>
    %cst_58 = arith.constant dense<0.000000e+00> : vector<8x32xf32>
    %85 = tpu.matmul %83, %84, %cst_58 {dimension_numbers = #tpu.dot_dimension_numbers<[1], [0], [0], [1], [0, 0, 1, 1], [], []>} : vector<8x32xbf16>, vector<32x32xbf16>, vector<8x32xf32> -> vector<8x32xf32>
    %c0_59 = arith.constant 0 : index
    %c0_60 = arith.constant 0 : index
    %86 = vector.load %arg10[%c0_59, %c0_60] : memref<1x32xf32, #tpu.memory_space<vmem>>, vector<1x32xf32>
    %87 = vector.broadcast %86 : vector<1x32xf32> to vector<8x32xf32>
    %88 = arith.addf %85, %87 : vector<8x32xf32>
    %89 = arith.addf %3, %88 : vector<8x32xf32>
    %c0_61 = arith.constant 0 : index
    %c0_62 = arith.constant 0 : index
    %90 = vector.load %arg11[%c0_61, %c0_62] : memref<1x32xf32, #tpu.memory_space<vmem>>, vector<1x32xf32>
    %c0_63 = arith.constant 0 : index
    %c0_64 = arith.constant 0 : index
    %91 = vector.load %arg12[%c0_63, %c0_64] : memref<1x32xf32, #tpu.memory_space<vmem>>, vector<1x32xf32>
    %cst_65 = arith.constant dense<0.000000e+00> : vector<8xf32>
    %92 = vector.multi_reduction <add>, %89, %cst_65 [1] : vector<8x32xf32> to vector<8xf32>
    %93 = vector.shape_cast %92 : vector<8xf32> to vector<8x1xf32>
    %cst_66 = arith.constant 3.200000e+01 : f32
    %94 = vector.broadcast %cst_66 : f32 to vector<8x1xf32>
    %95 = arith.divf %93, %94 : vector<8x1xf32>
    %96 = vector.broadcast %95 : vector<8x1xf32> to vector<8x32xf32>
    %97 = arith.subf %89, %96 : vector<8x32xf32>
    %98 = arith.mulf %97, %97 : vector<8x32xf32>
    %cst_67 = arith.constant dense<0.000000e+00> : vector<8xf32>
    %99 = vector.multi_reduction <add>, %98, %cst_67 [1] : vector<8x32xf32> to vector<8xf32>
    %100 = vector.shape_cast %99 : vector<8xf32> to vector<8x1xf32>
    %cst_68 = arith.constant 3.200000e+01 : f32
    %101 = vector.broadcast %cst_68 : f32 to vector<8x1xf32>
    %102 = arith.divf %100, %101 : vector<8x1xf32>
    %103 = vector.broadcast %95 : vector<8x1xf32> to vector<8x32xf32>
    %104 = arith.subf %89, %103 : vector<8x32xf32>
    %cst_69 = arith.constant 9.99999974E-6 : f32
    %105 = vector.broadcast %cst_69 : f32 to vector<8x1xf32>
    %106 = arith.addf %102, %105 : vector<8x1xf32>
    %107 = math.rsqrt %106 : vector<8x1xf32>
    %108 = vector.broadcast %107 : vector<8x1xf32> to vector<8x32xf32>
    %109 = arith.mulf %104, %108 : vector<8x32xf32>
    %110 = vector.broadcast %90 : vector<1x32xf32> to vector<8x32xf32>
    %111 = arith.mulf %109, %110 : vector<8x32xf32>
    %112 = vector.broadcast %91 : vector<1x32xf32> to vector<8x32xf32>
    %113 = arith.addf %111, %112 : vector<8x32xf32>
    %114 = arith.truncf %113 : vector<8x32xf32> to vector<8x32xbf16>
    %c0_70 = arith.constant 0 : index
    %c0_71 = arith.constant 0 : index
    %115 = vector.load %arg13[%c0_70, %c0_71] : memref<32x128xbf16, #tpu.memory_space<vmem>>, vector<32x128xbf16>
    %cst_72 = arith.constant dense<0.000000e+00> : vector<8x128xf32>
    %116 = tpu.matmul %114, %115, %cst_72 {dimension_numbers = #tpu.dot_dimension_numbers<[1], [0], [0], [1], [0, 0, 1, 1], [], []>} : vector<8x32xbf16>, vector<32x128xbf16>, vector<8x128xf32> -> vector<8x128xf32>
    %c0_73 = arith.constant 0 : index
    %c0_74 = arith.constant 0 : index
    %117 = vector.load %arg14[%c0_73, %c0_74] : memref<1x128xf32, #tpu.memory_space<vmem>>, vector<1x128xf32>
    %118 = vector.broadcast %117 : vector<1x128xf32> to vector<8x128xf32>
    %119 = arith.addf %116, %118 : vector<8x128xf32>
    %cst_75 = arith.constant 5.000000e-01 : f32
    %120 = vector.broadcast %cst_75 : f32 to vector<8x128xf32>
    %121 = arith.mulf %120, %119 : vector<8x128xf32>
    %cst_76 = arith.constant 4.471500e-02 : f32
    %122 = vector.broadcast %cst_76 : f32 to vector<8x128xf32>
    %123 = arith.mulf %122, %119 : vector<8x128xf32>
    %124 = arith.mulf %123, %119 : vector<8x128xf32>
    %125 = arith.mulf %124, %119 : vector<8x128xf32>
    %126 = arith.addf %119, %125 : vector<8x128xf32>
    %cst_77 = arith.constant 0.797884583 : f32
    %127 = vector.broadcast %cst_77 : f32 to vector<8x128xf32>
    %128 = arith.mulf %127, %126 : vector<8x128xf32>
    %129 = math.tanh %128 : vector<8x128xf32>
    %cst_78 = arith.constant 1.000000e+00 : f32
    %130 = vector.broadcast %cst_78 : f32 to vector<8x128xf32>
    %131 = arith.addf %130, %129 : vector<8x128xf32>
    %132 = arith.mulf %121, %131 : vector<8x128xf32>
    %133 = arith.truncf %132 : vector<8x128xf32> to vector<8x128xbf16>
    %c0_79 = arith.constant 0 : index
    %c0_80 = arith.constant 0 : index
    %134 = vector.load %arg15[%c0_79, %c0_80] : memref<128x32xbf16, #tpu.memory_space<vmem>>, vector<128x32xbf16>
    %cst_81 = arith.constant dense<0.000000e+00> : vector<8x32xf32>
    %135 = tpu.matmul %133, %134, %cst_81 {dimension_numbers = #tpu.dot_dimension_numbers<[1], [0], [0], [1], [0, 0, 1, 1], [], []>} : vector<8x128xbf16>, vector<128x32xbf16>, vector<8x32xf32> -> vector<8x32xf32>
    %c0_82 = arith.constant 0 : index
    %c0_83 = arith.constant 0 : index
    %136 = vector.load %arg16[%c0_82, %c0_83] : memref<1x32xf32, #tpu.memory_space<vmem>>, vector<1x32xf32>
    %137 = vector.broadcast %136 : vector<1x32xf32> to vector<8x32xf32>
    %138 = arith.addf %135, %137 : vector<8x32xf32>
    %139 = arith.addf %89, %138 : vector<8x32xf32>
    %c0_84 = arith.constant 0 : index
    %c0_85 = arith.constant 0 : index
    %c0_86 = arith.constant 0 : index
    %140 = vector.load %arg17[%c0_84, %c0_85, %c0_86] : memref<1x8x32xf32, #tpu.memory_space<vmem>>, vector<1x8x32xf32>
    %141 = vector.shape_cast %140 : vector<1x8x32xf32> to vector<8x32xf32>
    %142 = vector.shape_cast %139 : vector<8x32xf32> to vector<1x8x32xf32>
    tpu.vector_store %arg17[%c0_84, %c0_85, %c0_86], %142 {strides = array<i32>} : memref<1x8x32xf32, #tpu.memory_space<vmem>>, vector<1x8x32xf32>,
    return
  }
  func.func @transform_0(%arg0: i32, %arg1: i32) -> (i32, i32, i32) {
    %c0_i32 = arith.constant 0 : i32
    %c0_i32_0 = arith.constant 0 : i32
    return %arg0, %arg1, %c0_i32 : i32, i32, i32
  }
  func.func @transform_1(%arg0: i32, %arg1: i32) -> (i32, i32) {
    %c0_i32 = arith.constant 0 : i32
    %c0_i32_0 = arith.constant 0 : i32
    %c0_i32_1 = arith.constant 0 : i32
    return %c0_i32, %c0_i32_0 : i32, i32
  }
  func.func @transform_2(%arg0: i32, %arg1: i32) -> (i32, i32) {
    %c0_i32 = arith.constant 0 : i32
    %c0_i32_0 = arith.constant 0 : i32
    %c0_i32_1 = arith.constant 0 : i32
    return %c0_i32, %c0_i32_0 : i32, i32
  }
  func.func @transform_3(%arg0: i32, %arg1: i32) -> (i32, i32) {
    %c0_i32 = arith.constant 0 : i32
    %c0_i32_0 = arith.constant 0 : i32
    %c0_i32_1 = arith.constant 0 : i32
    return %c0_i32, %c0_i32_0 : i32, i32
  }
  func.func @transform_4(%arg0: i32, %arg1: i32) -> (i32, i32) {
    %c0_i32 = arith.constant 0 : i32
    %c0_i32_0 = arith.constant 0 : i32
    %c0_i32_1 = arith.constant 0 : i32
    return %c0_i32, %c0_i32_0 : i32, i32
  }
  func.func @transform_5(%arg0: i32, %arg1: i32) -> (i32, i32) {
    %c0_i32 = arith.constant 0 : i32
    %c0_i32_0 = arith.constant 0 : i32
    %c0_i32_1 = arith.constant 0 : i32
    return %c0_i32, %c0_i32_0 : i32, i32
  }
  func.func @transform_6(%arg0: i32, %arg1: i32) -> (i32, i32) {
    %c0_i32 = arith.constant 0 : i32
    %c0_i32_0 = arith.constant 0 : i32
    %c0_i32_1 = arith.constant 0 : i32
    return %c0_i32, %c0_i32_0 : i32, i32
  }
  func.func @transform_7(%arg0: i32, %arg1: i32) -> (i32, i32) {
    %c0_i32 = arith.constant 0 : i32
    %c0_i32_0 = arith.constant 0 : i32
    %c0_i32_1 = arith.constant 0 : i32
    return %c0_i32, %c0_i32_0 : i32, i32
  }
  func.func @transform_8(%arg0: i32, %arg1: i32) -> (i32, i32) {
    %c0_i32 = arith.constant 0 : i32
    %c0_i32_0 = arith.constant 0 : i32
    %c0_i32_1 = arith.constant 0 : i32
    return %c0_i32, %c0_i32_0 : i32, i32
  }
  func.func @transform_9(%arg0: i32, %arg1: i32) -> (i32, i32) {
    %c0_i32 = arith.constant 0 : i32
    %c0_i32_0 = arith.constant 0 : i32
    %c0_i32_1 = arith.constant 0 : i32
    return %c0_i32, %c0_i32_0 : i32, i32
  }
  func.func @transform_10(%arg0: i32, %arg1: i32) -> (i32, i32) {
    %c0_i32 = arith.constant 0 : i32
    %c0_i32_0 = arith.constant 0 : i32
    %c0_i32_1 = arith.constant 0 : i32
    return %c0_i32, %c0_i32_0 : i32, i32
  }
  func.func @transform_11(%arg0: i32, %arg1: i32) -> (i32, i32) {
    %c0_i32 = arith.constant 0 : i32
    %c0_i32_0 = arith.constant 0 : i32
    %c0_i32_1 = arith.constant 0 : i32
    return %c0_i32, %c0_i32_0 : i32, i32
  }
  func.func @transform_12(%arg0: i32, %arg1: i32) -> (i32, i32) {
    %c0_i32 = arith.constant 0 : i32
    %c0_i32_0 = arith.constant 0 : i32
    %c0_i32_1 = arith.constant 0 : i32
    return %c0_i32, %c0_i32_0 : i32, i32
  }
  func.func @transform_13(%arg0: i32, %arg1: i32) -> (i32, i32) {
    %c0_i32 = arith.constant 0 : i32
    %c0_i32_0 = arith.constant 0 : i32
    %c0_i32_1 = arith.constant 0 : i32
    return %c0_i32, %c0_i32_0 : i32, i32
  }
  func.func @transform_14(%arg0: i32, %arg1: i32) -> (i32, i32) {
    %c0_i32 = arith.constant 0 : i32
    %c0_i32_0 = arith.constant 0 : i32
    %c0_i32_1 = arith.constant 0 : i32
    return %c0_i32, %c0_i32_0 : i32, i32
  }
  func.func @transform_15(%arg0: i32, %arg1: i32) -> (i32, i32, i32) {
    %c0_i32 = arith.constant 0 : i32
    %c0_i32_0 = arith.constant 0 : i32
    return %arg0, %arg1, %c0_i32 : i32, i32, i32
  }
  func.func @transform_16(%arg0: i32, %arg1: i32) -> (i32, i32, i32, i32) {
    %c0_i32 = arith.constant 0 : i32
    %c0_i32_0 = arith.constant 0 : i32
    %c0_i32_1 = arith.constant 0 : i32
    return %c0_i32, %arg0, %arg1, %c0_i32_0 : i32, i32, i32, i32
  }
}

</mosaic_0001>

<bundles_post_ra>
// kernel: tpu_custom_call.1
= control target key start
LH: loop header
LB: loop body
LE: loop exit
PB: predicated region body
PF: predicated region fallthrough
CT: control target
= control target key end

     0   :  { %s3573_s0 = inlined_call_operand.vmem [shape: f32[2,8,32], index: 0, kind: input, shape index: {}]   ;;  %s3574_s1 = inlined_call_operand.vmem [shape: f32[1,32], index: 1, kind: input, shape index: {}]   ;;  %s3575_s2 = inlined_call_operand.vmem [shape: f32[1,32], index: 2, kind: input, shape index: {}]   ;;  %s3576_s3 = inlined_call_operand.vmem [shape: bf16[32,32], index: 3, kind: input, shape index: {}]   ;;  %s3577_s4 = inlined_call_operand.vmem [shape: f32[1,32], index: 4, kind: input, shape index: {}]   ;;  %s3578_s5 = inlined_call_operand.vmem [shape: bf16[32,64], index: 5, kind: input, shape index: {}]   ;;  %s3579_s6 = inlined_call_operand.vmem [shape: f32[1,64], index: 6, kind: input, shape index: {}]   ;;  %s3580_s7 = inlined_call_operand.vmem [shape: bf16[32,32], index: 7, kind: input, shape index: {}]   ;;  %s3581_s8 = inlined_call_operand.vmem [shape: f32[1,32], index: 8, kind: input, shape index: {}]   ;;  %s3582_s9 = inlined_call_operand.vmem [shape: f32[1,32], index: 9, kind: input, shape index: {}]   ;;  %s3583_s10 = inlined_call_operand.vmem [shape: f32[1,32], index: 10, kind: input, shape index: {}]   ;;  %s3584_s11 = inlined_call_operand.vmem [shape: bf16[32,128], index: 11, kind: input, shape index: {}]   ;;  %s3585_s12 = inlined_call_operand.hbm [shape: f32[1,128], index: 12, kind: input, shape index: {}]   ;;  %s3586_s13 = inlined_call_operand.vmem [shape: bf16[128,32], index: 13, kind: input, shape index: {}]   ;;  %s3587_s14 = inlined_call_operand.vmem [shape: f32[1,32], index: 14, kind: input, shape index: {}]   ;;  %s3588_s15 = inlined_call_operand.hbm [shape: f32[2,8,32], index: 15, kind: output, shape index: {0}]   ;;  %s3589_s16 = inlined_call_operand.hbm [shape: f32[2,2,8,32], index: 16, kind: output, shape index: {1}]  }
   0x1   :  { %3597 = sst [smem:[#allocation22_spill]] %s3573_s0 }
   0x2   :  { %3598 = sst [smem:[#allocation23_spill]] %s3574_s1 }
   0x3   :  { %3599 = sst [smem:[#allocation24_spill]] %s3575_s2 }
   0x4   :  { %3600 = sst [smem:[#allocation25_spill]] %s3576_s3 }
   0x5   :  { %3601 = sst [smem:[#allocation26_spill]] %s3577_s4 }
   0x6   :  { %22 = vsyncpa [#allocation8], 0 }
   0x7   :  { %23 = vsyncpa [#allocation9], 0 }
   0x8   :  { %25 = vsyncpa [#allocation9 + $0x1], 0 }
   0x9   :  { %26 = vsyncpa [#allocation12], 0 }
   0xa   :  { %28 = vsyncpa [#allocation12 + $0x1], 0  ;;  %s3000_s21 = smov 0   ;;  %s3002_s22 = smov 0  }
   0xb   :  { %s3004_s23 = smov 0   ;;  %s3006_s24 = smov 0  }
   0xc   :  { %s3008_s25 = smov 0   ;;  %s3010_s26 = smov 0  }
   0xd LB: > { %3602 = sst [smem:[#allocation16_spill]] %s2868_s21  ;;  %s2399_s27 = sadd.s32 4294967295, %s2888_s26   ;;  %s2888_s26 = sphi %s3010_s26, %s34_s26   ;;  %s2884_s25 = sphi %s3008_s25, %s3625_s25   ;;  %s2880_s24 = sphi %s3006_s24, %s3624_s24   ;;  %s2876_s23 = sphi %s3004_s23, %s3623_s23   ;;  %s2872_s22 = sphi %s3002_s22, %s3627_s22   ;;  %s2868_s21 = sphi %s3000_s21, %s3626_s21  }
   0xe   : > { %3603 = sst [smem:[#allocation17_spill]] %s2876_s23  ;;  %s2400_s28 = sadd.s32 4294967294, %s2888_s26  }
   0xf   : > { %3604 = sst [smem:[#allocation18_spill]] %s2884_s25  ;;  %s46_s29 = sadd.s32 1, %s2884_s25 }
  0x10   : > { %s377_s30 = sadd.s32 1, %s2876_s23  ;;  %p48_p0 = scmp.ge.s32.totalorder %s46_s29, 2 }
  0x11   : > { %p387_p1 = scmp.ne.s32.totalorder %s2876_s23, %s2872_s22  ;;  %p388_p2 = scmp.eq.s32.totalorder %s2399_s27, 1 }
  0x12   : > { %p393_p3 = scmp.ne.s32.totalorder %s2872_s22, %s2868_s21  ;;  %s3629_s29 = smov (%p48_p0, %s46_s29), 0 }
  0x13   : > { %3605 = sst [smem:[#allocation19_spill]] %s3629_s29  ;;  %p3040_p4 = por %p388_p2, %p387_p1 }
  0x14   : > { %p394_p5 = scmp.eq.s32.totalorder %s2400_s28, 1  ;;  %s372_s17 = ssub.s32 %s2884_s25, %s3629_s29 }
  0x15   : > { %p2401_p6 = scmp.ge.s32.totalorder %s2888_s26, 1  ;;  %p375_p7 = scmp.eq.s32.totalorder %s372_s17, 0 }
  0x16   : > { %p3047_p8 = por %p394_p5, %p393_p3  ;;  %p429_p9 = scmp.lt.s32.totalorder %s2888_s26, 3 }
  0x17   : > { %s3053_s19 = scalar_select %p375_p7, %s2876_s23, %s377_s30  }
  0x18   : > { %s3607_s18 = scalar_select %p3047_p8, 1, 0 }
  0x19   : > { %3609 = sst [smem:[#allocation21_spill]] %s3053_s19  ;;  %p3055_p10 = pnand %p2401_p6, %p429_p9 }
  0x1a   : > { %3608 = sst [smem:[#allocation20_spill]] %s3607_s18  ;;  %p3059_p11 = scmp.eq.s32.totalorder %s2399_s27, 0 }
  0x1b   : > { %p2609_p12 = pneg %p3055_p10  ;;  %s2894_s28 = smov [#allocation7]  }
  0x1c   : > { %s475_s17 = sshll.u32 %s2894_s28, 4  ;;  %s476_s17 = int_to_ptr.vmem [resolvable:$true] %s475_s17 }
  0x1d   : > { %p2610_p13 = pnand %p3059_p11, %p2609_p12  ;;  %s2759_s30 = scalar_lea.vmem %s476_s17, 16 }
  0x1e   : > { %p2760_p1 = scmp.ne.s32.totalorder %s476_s17, %s2759_s30  ;;  %s2766_s29 = scalar_lea.vmem %s476_s17, 32 }
  0x1f   : > { %p2750_p0 = pneg %p2610_p13  ;;  %p2767_p5 = scmp.lt.s32.totalorder %s476_s17, %s476_s17 }
  0x20   : > { %p2768_p6 = scmp.lt.s32.totalorder %s2766_s29, %s2759_s30 }
  0x21   : > { %p2762_p2 = pnand %p2760_p1, %p2750_p0 }
  0x22   : > { %p2769_p7 = por %p2768_p6, %p2767_p5 }
  0x23   : > { %p2763_p3 = pneg %p2762_p2 }
  0x25   : > { %p2770_p9 = pnand %p2769_p7, %p2763_p3 }
  0x27   : > { %2773 = shalt.err (!%p2770_p9)
}
  0x28   : > { %2612 = dma.hbm_to_vmem [thread:$0]  (!%p2610_p13), %s3585_s12, 16, %s476_s17, [#allocation8]  }
  0x29   : > { %504 = sbr.rel (%p3055_p10) target bundleno = 2744 (0xab8), region = 80 }
  0x2e   : > { %2855 = dma.done.wait (%p3059_p11), [#allocation8], 16  }
  0x2f   : > { %2857 = vsyncadd (%p3059_p11), [#allocation8], 4294967280  ;;  %p561_p12 = scmp.lt.s32.totalorder %s2880_s24, 1  ;;  %s3612_s23 = sld [smem:[#allocation22_spill]]  ;;  %vm573_vm0 = vcmask 261120   ;;  %vm1206_vm1 = vcmask 7168   ;;  %v690_v37 = vlaneseq }
  0x30   : > { %vm1215_vm2 = vcmask 64512   ;;  %v2698_v7 = vld [vmem:[%s3578_s5 + $0x8] sm:$0xff]   ;;  %v2895_v8 = vmov 0.0   ;;  %v2896_v9 = vmov -1e+30   ;;  %s3613_s3 = sld [smem:[#allocation25_spill]] }
  0x31   : > { %s562_s29 = scalar_select %p561_p12, %s2880_s24, 1  ;;  %2501 = vmatprep.subr.bf16.mxu0 %v2895_v8  ;;  %1207 = vst.msk [vmem:[#allocation4] sm:$0xff] %vm1206_vm1, %v2896_v9  ;;  %1208 = vst.msk [vmem:[#allocation4 + $0x8] sm:$0xff] %vm1206_vm1, %v2896_v9  ;;  %2509 = vmatprep.subr.bf16.mxu1 %v2895_v8  ;;  %v2700_v11 = vld [vmem:[%s3578_s5] sm:$0xff]   ;;  %vm2897_vm3 = vmmov 0   ;;  %v3157_v41 = vshrl.u32 %v690_v37, 7 }
  0x32   : > { %1209 = vst.msk [vmem:[#allocation4 + $0x10] sm:$0xff] %vm1206_vm1, %v2896_v9  ;;  %1210 = vst.msk [vmem:[#allocation4 + $0x18] sm:$0xff] %vm1206_vm1, %v2896_v9  ;;  %2502 = vmatpush3.bf16.msra.mxu0 %v2698_v7  ;;  %2505 = vmatprep.mubr.msk.bf16.mxu0 %vm2897_vm3, %v2895_v8  ;;  %s3614_s1 = sld [smem:[#allocation23_spill]]  ;;  %s3136_s25 = sand.u32 1, %s2872_s22   ;;  %v2411_v23 = vld [vmem:[%s3579_s6] ss:$0 sm:$0xff] }
  0x33   : > { %s2408_s28 = sshll.u32 %s562_s29, 3  ;;  %1211 = vst.msk [vmem:[#allocation5] sm:$0xff] %vm1206_vm1, %v2895_v8  ;;  %1212 = vst.msk [vmem:[#allocation5 + $0x8] sm:$0xff] %vm1206_vm1, %v2895_v8  ;;  %2503 = vmatprep.subr.bf16.mxu0 %v2895_v8  ;;  %2513 = vmatprep.mubr.msk.bf16.mxu1 %vm2897_vm3, %v2895_v8  ;;  %s3615_s2 = sld [smem:[#allocation24_spill]]  ;;  %v2902_v35 = vmov 1983009808  }
  0x34   : > { %1213 = vst.msk [vmem:[#allocation5 + $0x10] sm:$0xff] %vm1206_vm1, %v2895_v8  ;;  %1214 = vst.msk [vmem:[#allocation5 + $0x18] sm:$0xff] %vm1206_vm1, %v2895_v8  ;;  %s3616_s4 = sld [smem:[#allocation26_spill]]  ;;  %s2898_s27 = smov 104   ;;  %v688_v36 = vunpack.c.l.s4 %v2902_v35  ;;  %v2903_v38 = vmov 1934713408  }
  0x35   : > { %s567_s18 = scalar_lea.vmem %s3612_s23, %s2408_s28  ;;  %1216 = vst.msk [vmem:[#allocation6] sm:$0xff] %vm1215_vm2, %v2895_v8  ;;  %1217 = vst.msk [vmem:[#allocation6 + $0x8] sm:$0xff] %vm1215_vm2, %v2895_v8  ;;  %s2407_s23 = sshll.u32 %s3136_s25, 4  ;;  %v720_v39 = vunpack.c.l.s4 %v2903_v38  ;;  %vm829_vm4 = vcmask 60416  }
  0x36   : > { %v3081_v0 = vld [vmem:[%s567_s18] sm:$0xff]  ;;  %1218 = vst.msk [vmem:[#allocation6 + $0x10] sm:$0xff] %vm1215_vm2, %v2895_v8  ;;  %1219 = vst.msk [vmem:[#allocation6 + $0x18] sm:$0xff] %vm1215_vm2, %v2895_v8  ;;  %v2699_v10 = vld [vmem:[%s3613_s3 + $0x8] sm:$0xff]   ;;  %2504 = vmatpush3.bf16.msra.mxu0 %v2700_v11  ;;  %s2899_s29 = smov 120   ;;  %s3145_s28 = scalar_lea.vmem [#allocation11], %s2407_s23  ;;  %v689_v40 = vunpack.c.0.s8 %v688_v36 }
  0x37   : > { %v574_v1 = vsel %vm573_vm0, %v3081_v0, 0.0  ;;  %2510 = vmatpush3.bf16.msra.mxu1 %v2699_v10  ;;  %v2701_v12 = vld [vmem:[%s3613_s3] sm:$0xff]   ;;  %s2900_s30 = smov 112   ;;  %s2901_s21 = smov 96   ;;  %v721_v44 = vunpack.c.0.s8 %v720_v39 }
  0x38   : > { %575 = vadd.xlane.f32.xlu0 %v574_v1  ;;  %2511 = vmatprep.subr.bf16.mxu1 %v2895_v8  ;;  %v2409_v17 = vld [vmem:[%s3614_s1] ss:$0 sm:$0xff]  ;;  %s2406_s18 = sshll.u32 %s3136_s25, 3  ;;  %v3161_v45 = vsub.s32 %v689_v40, %v3157_v41  ;;  %s3250_s19 = smov 0  }
  0x39   : > { %v2410_v19 = vld [vmem:[%s3615_s2] ss:$0 sm:$0xff]  ;;  %v3165_v51 = vsub.s32 %v721_v44, %v3157_v41  ;;  %s3248_s23 = scalar_lea.vmem [#allocation10], %s2406_s18 }
  0x3a   : > { %v2420_v27 = vld [vmem:[%s3616_s4] ss:$0 sm:$0xff] }
  0x3b   : > { %2512 = vmatpush3.bf16.msra.mxu1 %v2701_v12 }
  0xc1   : > { %v576_v2 = vpop.xlane.xlu0 %575 }
  0xc2   : > { %v578_v3 = vmul.f32 0.03125, %v576_v2 }
  0xc4   : > { %v579_v4 = vsub.f32 %v3081_v0, %v578_v3 }
  0xc6   : > { %v580_v5 = vmul.f32 %v579_v4, %v579_v4 }
  0xc8   : > { %v581_v6 = vsel %vm573_vm0, %v580_v5, 0.0 }
  0xc9   : > { %582 = vadd.xlane.f32.xlu0 %v581_v6 }
 0x152   : > { %v583_v13 = vpop.xlane.xlu0 %582 }
 0x153   : > { %v584_v14 = vmul.f32 0.03125, %v583_v13 }
 0x155   : > { %v585_v15 = vadd.f32 1e-05, %v584_v14 }
 0x157   : > { %2702 = vrsqrt.f32 %v585_v15 }
 0x164   : > { %v2703_v16 = vpop.eup %2702 }
 0x165   : > { %v587_v18 = vmul.f32 %v2703_v16, %v579_v4 }
 0x167   : > { %v594_v20 = vmul.f32 %v2409_v17, %v587_v18 }
 0x169   : > { %v601_v21 = vadd.f32 %v2410_v19, %v594_v20 }
 0x16b   : > { %v602_v22 = vpack.c.bf16 %v601_v21, %v601_v21 }
 0x16d   : > { %2506 = vmatmul.mubr.msk.bf16.vlgmr.msra.gmra.mxu0 %vm573_vm0, %v602_v22  ;;  %2514 = vmatmul.mubr.msk.bf16.vlgmr.msra.gmra.mxu1 %vm573_vm0, %v602_v22 }
 0x22d   : > { %v663_v24 = vpop.f32.mrf.mxu0  ;;  %v1046_v25 = vpop.f32.mrf.mxu1 }
 0x22e   : > { %v664_v26 = vadd.f32 %v2411_v23, %v663_v24  ;;  %v3149_v32 = vadd.f32 %v2420_v27, %v1046_v25 }
 0x22f   : > { %v2507_v28 = vpop.f32.mrf.mxu0  ;;  %v2515_v29 = vpop.f32.mrf.mxu1 }
 0x230   : > { %682 = vrot.lane.b32.xlu0 %v664_v26, %s2898_s27  ;;  %676 = vrot.lane.b32.xlu1 %v664_v26, %s2899_s29  ;;  %669 = vst.msk [vmem:[%s3145_s28] sm:$0xff] %vm573_vm0, %v664_v26 }
 0x231   : > { %v666_v30 = vpop.f32.mrf.mxu0  ;;  %v1049_v31 = vpop.f32.mrf.mxu1 }
 0x233   : > { %v2508_v33 = vpop.f32.mrf.mxu0  ;;  %v2516_v34 = vpop.f32.mrf.mxu1 }
 0x234   : > { %1059 = vrot.lane.b32.xlu0 %v3149_v32, %s2898_s27  ;;  %679 = vrot.lane.b32.xlu1 %v664_v26, %s2900_s30 }
 0x238   : > { %671 = vrot.lane.b32.xlu1 %v664_v26, %s2901_s21 }
 0x23c   : > { %1053 = vrot.lane.b32.xlu1 %v3149_v32, %s2899_s29 }
 0x2a2   : > { %v683_v42 = vpop.permute.xlu0 %682  ;;  %v677_v43 = vpop.permute.xlu1 %676 }
 0x2a3   : > { %834 = vrot.lane.b32.xlu1 %v677_v43, %s2901_s21  ;;  %v701_v46 = vcombine.low %v677_v43, %v683_v42  ;;  %v702_v47 = vcombine.high %v677_v43, %v683_v42 }
 0x2a5   : > { %v709_v52 = vrot.slane %v701_v46, %v3161_v45  ;;  %v716_v53 = vrot.slane %v702_v47, %v3161_v45 }
 0x2a6   : > { %v680_v48 = vpop.permute.xlu1 %679  ;;  %v1060_v36 = vpop.permute.xlu0 %1059 }
 0x2a7   : > { %v685_v49 = vcombine.low %v664_v26, %v680_v48  ;;  %v686_v50 = vcombine.high %v664_v26, %v680_v48  ;;  %836 = vrot.lane.b32.xlu1 %v680_v48, %s2901_s21 }
 0x2a9   : > { %v693_v54 = vrot.slane %v685_v49, %v3161_v45  ;;  %v700_v55 = vrot.slane %v686_v50, %v3161_v45 }
 0x2aa   : > { %v672_v56 = vpop.permute.xlu1 %671 }
 0x2ab   : > { %v717_v57 = vcombine.low %v693_v54, %v709_v52  ;;  %v718_v58 = vcombine.high %v693_v54, %v709_v52  ;;  %v733_v59 = vcombine.low %v700_v55, %v716_v53  ;;  %v734_v60 = vcombine.high %v700_v55, %v716_v53  ;;  %2415 = vst.msk [vmem:[%s3145_s28 + $0x8] sm:$0xff] %vm573_vm0, %v672_v56 }
 0x2ac   : > { %838 = vrot.lane.b32.xlu1 %v683_v42, %s2901_s21 }
 0x2ad   : > { %v725_v61 = vrot.slane %v717_v57, %v3165_v51  ;;  %v732_v62 = vrot.slane %v718_v58, %v3165_v51  ;;  %v741_v63 = vrot.slane %v733_v59, %v3165_v51  ;;  %v748_v1 = vrot.slane %v734_v60, %v3165_v51 }
 0x2ae   : > { %v1054_v27 = vpop.permute.xlu1 %1053 }
 0x2af   : > { %v753_v2 = vcombine.low %v725_v61, %v732_v62  ;;  %v2416_v3 = vcombine.high %v725_v61, %v732_v62  ;;  %v769_v4 = vcombine.low %v741_v63, %v748_v1  ;;  %v2417_v5 = vcombine.high %v741_v63, %v748_v1 }
 0x2b0   : > { %1056 = vrot.lane.b32.xlu1 %v3149_v32, %s2900_s30  ;;  %v1078_v43 = vcombine.low %v1054_v27, %v1060_v36  ;;  %v1079_v44 = vcombine.high %v1054_v27, %v1060_v36 }
 0x2b1   : > { %v760_v6 = vrot.slane %v753_v2, %v3161_v45  ;;  %v768_v7 = vrot.slane %v2416_v3, %v3161_v45  ;;  %v776_v9 = vrot.slane %v769_v4, %v3161_v45  ;;  %v784_v10 = vrot.slane %v2417_v5, %v3161_v45 }
 0x2b2   : > { %v1086_v58 = vrot.slane %v1078_v43, %v3161_v45  ;;  %v1093_v59 = vrot.slane %v1079_v44, %v3161_v45 }
 0x2b3   : > { %v785_v11 = vcombine.low %v760_v6, %v768_v7  ;;  %v786_v12 = vcombine.high %v760_v6, %v768_v7  ;;  %v801_v13 = vcombine.low %v776_v9, %v784_v10  ;;  %v802_v14 = vcombine.high %v776_v9, %v784_v10 }
 0x2b5   : > { %v793_v15 = vrot.slane %v785_v11, %v3165_v51  ;;  %v800_v16 = vrot.slane %v786_v12, %v3165_v51  ;;  %v809_v17 = vrot.slane %v801_v13, %v3165_v51  ;;  %v816_v18 = vrot.slane %v802_v14, %v3165_v51 }
 0x2b7   : > { %v817_v19 = vcombine.low %v793_v15, %v809_v17  ;;  %v818_v20 = vcombine.high %v793_v15, %v809_v17  ;;  %v819_v21 = vcombine.low %v800_v16, %v816_v18  ;;  %v820_v22 = vcombine.high %v800_v16, %v816_v18 }
 0x2b9   : > { %v821_v23 = vpack.c.bf16 %v817_v19, %v817_v19  ;;  %v822_v24 = vpack.c.bf16 %v818_v20, %v818_v20  ;;  %v823_v25 = vpack.c.bf16 %v819_v21, %v819_v21  ;;  %v824_v26 = vpack.c.bf16 %v820_v22, %v820_v22 }
 0x2bb   : > { %830 = vst.msk [vmem:[#allocation2] sm:$0xf] %vm829_vm4, %v821_v23  ;;  %831 = vst.msk [vmem:[#allocation2 + $0x4] sm:$0xf] %vm829_vm4, %v822_v24 }
 0x2bc   : > { %832 = vst.msk [vmem:[#allocation2 + $0x8] sm:$0xf] %vm829_vm4, %v823_v25  ;;  %833 = vst.msk [vmem:[#allocation2 + $0xc] sm:$0xf] %vm829_vm4, %v824_v26 }
 0x315   : > { %v835_v28 = vpop.permute.xlu1 %834 }
 0x319   : > { %v837_v29 = vpop.permute.xlu1 %836 }
 0x31a   : > { %v843_v30 = vcombine.low %v672_v56, %v837_v29  ;;  %v844_v31 = vcombine.high %v672_v56, %v837_v29 }
 0x31c   : > { %v851_v38 = vrot.slane %v843_v30, %v3161_v45  ;;  %v858_v39 = vrot.slane %v844_v31, %v3161_v45 }
 0x31e   : > { %v839_v33 = vpop.permute.xlu1 %838 }
 0x31f   : > { %v859_v34 = vcombine.low %v835_v28, %v839_v33  ;;  %v860_v35 = vcombine.high %v835_v28, %v839_v33 }
 0x321   : > { %v867_v40 = vrot.slane %v859_v34, %v3161_v45  ;;  %v874_v42 = vrot.slane %v860_v35, %v3161_v45 }
 0x322   : > { %v1057_v46 = vpop.permute.xlu1 %1056 }
 0x323   : > { %v875_v47 = vcombine.low %v851_v38, %v867_v40  ;;  %v876_v48 = vcombine.high %v851_v38, %v867_v40  ;;  %v891_v49 = vcombine.low %v858_v39, %v874_v42  ;;  %v892_v50 = vcombine.high %v858_v39, %v874_v42 }
 0x324   : > { %v1062_v52 = vcombine.low %v3149_v32, %v1057_v46  ;;  %v1063_v53 = vcombine.high %v3149_v32, %v1057_v46 }
 0x325   : > { %v883_v54 = vrot.slane %v875_v47, %v3165_v51  ;;  %v890_v55 = vrot.slane %v876_v48, %v3165_v51  ;;  %v899_v56 = vrot.slane %v891_v49, %v3165_v51  ;;  %v906_v57 = vrot.slane %v892_v50, %v3165_v51 }
 0x326   : > { %v1070_v60 = vrot.slane %v1062_v52, %v3161_v45  ;;  %v1077_v61 = vrot.slane %v1063_v53, %v3161_v45 }
 0x327   : > { %v911_v62 = vcombine.low %v883_v54, %v890_v55  ;;  %v2418_v63 = vcombine.high %v883_v54, %v890_v55  ;;  %v927_v1 = vcombine.low %v899_v56, %v906_v57  ;;  %v2419_v32 = vcombine.high %v899_v56, %v906_v57 }
 0x328   : > { %v1094_v2 = vcombine.low %v1070_v60, %v1086_v58  ;;  %v1095_v3 = vcombine.high %v1070_v60, %v1086_v58  ;;  %v1110_v4 = vcombine.low %v1077_v61, %v1093_v59  ;;  %v1111_v5 = vcombine.high %v1077_v61, %v1093_v59 }
 0x329   : > { %v918_v6 = vrot.slane %v911_v62, %v3161_v45  ;;  %v926_v7 = vrot.slane %v2418_v63, %v3161_v45  ;;  %v934_v9 = vrot.slane %v927_v1, %v3161_v45  ;;  %v942_v10 = vrot.slane %v2419_v32, %v3161_v45 }
 0x32a   : > { %v1102_v11 = vrot.slane %v1094_v2, %v3165_v51  ;;  %v1109_v12 = vrot.slane %v1095_v3, %v3165_v51  ;;  %v1118_v13 = vrot.slane %v1110_v4, %v3165_v51  ;;  %v1125_v14 = vrot.slane %v1111_v5, %v3165_v51 }
 0x32b   : > { %v943_v15 = vcombine.low %v918_v6, %v926_v7  ;;  %v944_v16 = vcombine.high %v918_v6, %v926_v7  ;;  %v959_v17 = vcombine.low %v934_v9, %v942_v10  ;;  %v960_v18 = vcombine.high %v934_v9, %v942_v10 }
 0x32c   : > { %v1130_v19 = vcombine.low %v1102_v11, %v1109_v12  ;;  %v2424_v20 = vcombine.high %v1102_v11, %v1109_v12  ;;  %v1146_v21 = vcombine.low %v1118_v13, %v1125_v14  ;;  %v2425_v22 = vcombine.high %v1118_v13, %v1125_v14 }
 0x32d   : > { %v951_v23 = vrot.slane %v943_v15, %v3165_v51  ;;  %v958_v24 = vrot.slane %v944_v16, %v3165_v51  ;;  %v967_v25 = vrot.slane %v959_v17, %v3165_v51  ;;  %v974_v26 = vrot.slane %v960_v18, %v3165_v51 }
 0x32e   : > { %v1137_v27 = vrot.slane %v1130_v19, %v3161_v45  ;;  %v1145_v28 = vrot.slane %v2424_v20, %v3161_v45  ;;  %v1153_v29 = vrot.slane %v1146_v21, %v3161_v45  ;;  %v1161_v30 = vrot.slane %v2425_v22, %v3161_v45 }
 0x32f   : > { %v975_v31 = vcombine.low %v951_v23, %v967_v25  ;;  %v976_v33 = vcombine.high %v951_v23, %v967_v25  ;;  %v977_v34 = vcombine.low %v958_v24, %v974_v26  ;;  %v978_v35 = vcombine.high %v958_v24, %v974_v26 }
 0x330   : > { %v1162_v36 = vcombine.low %v1137_v27, %v1145_v28  ;;  %v1163_v38 = vcombine.high %v1137_v27, %v1145_v28  ;;  %v1178_v39 = vcombine.low %v1153_v29, %v1161_v30  ;;  %v1179_v40 = vcombine.high %v1153_v29, %v1161_v30 }
 0x331   : > { %v979_v42 = vpack.c.bf16 %v975_v31, %v975_v31  ;;  %v980_v43 = vpack.c.bf16 %v976_v33, %v976_v33  ;;  %v981_v44 = vpack.c.bf16 %v977_v34, %v977_v34  ;;  %v982_v46 = vpack.c.bf16 %v978_v35, %v978_v35 }
 0x332   : > { %v1170_v47 = vrot.slane %v1162_v36, %v3165_v51  ;;  %v1177_v48 = vrot.slane %v1163_v38, %v3165_v51  ;;  %v1186_v49 = vrot.slane %v1178_v39, %v3165_v51  ;;  %v1193_v50 = vrot.slane %v1179_v40, %v3165_v51 }
 0x333   : > { %985 = vst.msk [vmem:[#allocation3] sm:$0xf] %vm829_vm4, %v979_v42  ;;  %986 = vst.msk [vmem:[#allocation3 + $0x4] sm:$0xf] %vm829_vm4, %v980_v43 }
 0x334   : > { %987 = vst.msk [vmem:[#allocation3 + $0x8] sm:$0xf] %vm829_vm4, %v981_v44  ;;  %988 = vst.msk [vmem:[#allocation3 + $0xc] sm:$0xf] %vm829_vm4, %v982_v46  ;;  %v3230_v52 = vcombine.low %v1170_v47, %v1186_v49  ;;  %v3232_v53 = vcombine.high %v1170_v47, %v1186_v49  ;;  %v3234_v54 = vcombine.low %v1177_v48, %v1193_v50 }
 0x335   : > { %v3236_v55 = vcombine.high %v1177_v48, %v1193_v50 }
 0x336   : > { %v1198_v56 = vpack.c.bf16 %v3230_v52, %v3230_v52  ;;  %v1199_v57 = vpack.c.bf16 %v3232_v53, %v3232_v53  ;;  %v1200_v58 = vpack.c.bf16 %v3234_v54, %v3234_v54 }
 0x337   : > { %v1201_v59 = vpack.c.bf16 %v3236_v55, %v3236_v55 }
 0x338 LB: >> { %v2904_v60 = vmov 0.0   ;;  %s2426_s20 = sshll.u32 %s2892_s19, 3  ;;  %vm2905_vm5 = vmmov 0   ;;  %v1427_v5 = vand.u32 127, %v690_v37  ;;  %v2906_v34 = vmov 0   ;;  %v1437_v35 = vld [vmem:[#allocation4] sm:$0xff]  ;;  %s2892_s19 = sphi %s3250_s19, %s1224_s19  }
 0x339   : >> { %2517 = vmatprep.subr.bf16.mxu0 %v2904_v60  ;;  %2523 = vmatprep.subr.bf16.mxu1 %v2904_v60  ;;  %s3264_s17 = sshra.s32 %s2426_s20, 3  ;;  %v1428_v6 = vstv %s2426_s20  ;;  %v3329_v39 = vld [vmem:[#allocation4 + $0x8] sm:$0xff]  ;;  %v1439_v46 = vld [vmem:[#allocation4 + $0x10] sm:$0xff]  ;;  %v3340_v50 = vld [vmem:[#allocation4 + $0x18] sm:$0xff]  ;;  %vm1564_vm7 = vcmask 1043456   ;;  %s1224_s19 = sadd.s32 1, %s2892_s19  }
 0x33a   : >> { %2519 = vmatprep.mubr.msk.bf16.mxu0 %vm2905_vm5, %v2904_v60  ;;  %2525 = vmatprep.mubr.msk.bf16.mxu1 %vm2905_vm5, %v2904_v60  ;;  %s2427_s27 = sshll.u32 %s3264_s17, 2  ;;  %v1429_v7 = vadd.s32 %v1428_v6, %v1427_v5  ;;  %p1223_p10 = scmp.ge.s32.totalorder %s1224_s19, 1 }
 0x33b   : >> { %s1231_s29 = scalar_lea.vmem [#allocation2], %s2427_s27  ;;  %2704 = vset.pattern.permute.xlu0 %v2906_v34  ;;  %2705 = vset.pattern.permute.xlu1 %v2906_v34  ;;  %s1237_s30 = scalar_lea.vmem [#allocation3], %s2427_s27  ;;  %vm1943_vm8 = vcmask (%p1223_p10), 130048   ;;  %vm1945_vm9 = vcmask (%p1223_p10), 195584  }
 0x33c   : >> { %v1232_v61 = vld [vmem:[%s1231_s29] sm:$0xf]  ;;  %v1233_v62 = vld [vmem:[%s1231_s29 + $0x4] sm:$0xf]  ;;  %v1234_v32 = vld [vmem:[%s1231_s29 + $0x8] sm:$0xf]  ;;  %vm1430_vm6 = vcmp.le.s32.totalorder %v1429_v7, %v3157_v41 }
 0x33d   : >> { %v1246_v63 = vsel %vm1215_vm2, %v1232_v61, 0  ;;  %v1292_v1 = vsel %vm1215_vm2, %v1233_v62, 0  ;;  %v1235_v2 = vld [vmem:[%s1231_s29 + $0xc] sm:$0xf]  ;;  %v1338_v3 = vsel %vm1215_vm2, %v1234_v32, 0  ;;  %s2908_s17 = smov (%p1223_p10), 16  }
 0x33e   : >> { %2518 = vmatpush3.bf16.xpose.msra.mxu0 %v1246_v63  ;;  %2524 = vmatpush3.bf16.xpose.msra.mxu1 %v1292_v1  ;;  %v1384_v4 = vsel %vm1215_vm2, %v1235_v2, 0  ;;  %v1238_v1 = vld [vmem:[%s1237_s30] sm:$0xf]  ;;  %v1240_v6 = vld [vmem:[%s1237_s30 + $0x8] sm:$0xf]  ;;  %s3595_s27 = smov (%p1223_p10), 8  }
 0x33f   : >> { %2529 = vmatprep.subr.bf16.mxu0 %v2904_v60  ;;  %2535 = vmatprep.subr.bf16.mxu1 %v2904_v60  ;;  %v1566_v2 = vsel %vm1564_vm7, %v1238_v1, 0  ;;  %v1658_v7 = vsel %vm1564_vm7, %v1240_v6, 0  ;;  %v1503_v1 = vld [vmem:[#allocation5 + $0x10] sm:$0xff]  ;;  %s2910_s29 = smov (%p1223_p10), 24   ;;  %s3596_s19 = sshll.u32 (%p1223_p10), %s2880_s24, 7 }
 0x340   : > { %s2911_s18 = smov (%p1223_p10), [#allocation11]  }
 0x341   : > { %s2778_s1 = sshll.u32 (%p1223_p10), %s2911_s18, 4  ;;  %s2779_s1 = int_to_ptr.vmem [resolvable:$false] %s2778_s1 }
 0x342   : > { %s2780_s2 = scalar_lea.vmem (%p1223_p10), %s2779_s1, 512 }
 0x345   : >> { %2520 = vmatmul.mubr.msk.bf16.vlgmr.msra.gmra.mxu0 %vm1215_vm2, %v1198_v56  ;;  %2526 = vmatmul.mubr.msk.bf16.vlgmr.msra.gmra.mxu1 %vm1215_vm2, %v1199_v57 }
 0x346   : >> { %2530 = vmatpush3.bf16.xpose.msra.mxu0 %v1338_v3  ;;  %2536 = vmatpush3.bf16.xpose.msra.mxu1 %v1384_v4  ;;  %v1239_v3 = vld [vmem:[%s1237_s30 + $0x4] sm:$0xf] }
 0x347   : >> { %2531 = vmatprep.mubr.msk.bf16.mxu0 %vm2905_vm5, %v2904_v60  ;;  %2537 = vmatprep.mubr.msk.bf16.mxu1 %vm2905_vm5, %v2904_v60  ;;  %v1612_v4 = vsel %vm1564_vm7, %v1239_v3, 0 }
 0x348   : >> { %2541 = vmatprep.subr.bf16.mxu0 %v2904_v60  ;;  %2547 = vmatprep.subr.bf16.mxu1 %v2904_v60 }
 0x34d   : >> { %2532 = vmatmul.mubr.msk.bf16.vlgmr.msra.gmra.mxu0 %vm1215_vm2, %v1200_v58  ;;  %2538 = vmatmul.mubr.msk.bf16.vlgmr.msra.gmra.mxu1 %vm1215_vm2, %v1201_v59 }
 0x34e   : >> { %2543 = vmatprep.mubr.msk.bf16.mxu0 %vm2905_vm5, %v2904_v60  ;;  %2549 = vmatprep.mubr.msk.bf16.mxu1 %vm2905_vm5, %v2904_v60 }
 0x34f   : >> { %2542 = vmatpush3.bf16.msra.mxu0 %v1566_v2  ;;  %2548 = vmatpush3.bf16.msra.mxu1 %v1612_v4  ;;  %v1504_v4 = vld [vmem:[#allocation5 + $0x18] sm:$0xff] }
 0x350   : >> { %2553 = vmatprep.subr.bf16.mxu0 %v2904_v60  ;;  %2559 = vmatprep.subr.bf16.mxu1 %v2904_v60 }
 0x405   : >> { %v1282_v9 = vpop.f32.mrf.mxu0  ;;  %v1328_v10 = vpop.f32.mrf.mxu1 }
 0x406   : >> { %v3307_v11 = vsel %vm1430_vm6, %v1282_v9, -1e+10  ;;  %v3311_v12 = vsel %vm1430_vm6, %v1328_v10, -1e+10  ;;  %v1241_v9 = vld [vmem:[%s1237_s30 + $0xc] sm:$0xf] }
 0x407   : >> { %v2521_v13 = vpop.f32.mrf.mxu0  ;;  %v2527_v14 = vpop.f32.mrf.mxu1  ;;  %v1441_v15 = vsel %vm1215_vm2, %v3307_v11, -inf  ;;  %v1444_v18 = vsel %vm1215_vm2, %v3311_v12, -inf  ;;  %v1704_v10 = vsel %vm1564_vm7, %v1241_v9, 0  ;;  %v1530_v9 = vld [vmem:[#allocation6 + $0x8] sm:$0xff]  ;;  %s2267_s30 = sshll.u32 (%p1223_p10), %s3145_s28, 4  ;;  %s3488_s30 = int_to_ptr.vmem [resolvable:$true] %s2267_s30 }
 0x408   : >> { %1442 = vmax.xlane.f32.xlu0 %v1441_v15  ;;  %s2774_s21 = scalar_lea.vmem (%p1223_p10), %s3488_s30, 256  ;;  %p2781_p1 = scmp.lt.s32.totalorder (%p1223_p10), %s3488_s30, %s2779_s1 }
 0x409   : >> { %v1285_v16 = vpop.f32.mrf.mxu0  ;;  %v1331_v17 = vpop.f32.mrf.mxu1  ;;  %p2775_p11 = scmp.ne.s32.totalorder (%p1223_p10), %s3488_s30, %s2774_s21  ;;  %p2782_p2 = scmp.lt.s32.totalorder (%p1223_p10), %s2780_s2, %s2774_s21 }
 0x40b   : >> { %v2522_v19 = vpop.f32.mrf.mxu0  ;;  %v2528_v20 = vpop.f32.mrf.mxu1  ;;  %p2776_p13 = pnand (%p1223_p10), %p2775_p11, %p3040_p4  ;;  %p2783_p3 = por (%p1223_p10), %p2782_p2, %p2781_p1 }
 0x40c   : >> { %1445 = vmax.xlane.f32.xlu0 %v1444_v18 }
 0x40d   : >> { %v1374_v21 = vpop.f32.mrf.mxu0  ;;  %v1420_v22 = vpop.f32.mrf.mxu1  ;;  %p2777_p0 = pneg (%p1223_p10), %p2776_p13 }
 0x40e   : >> { %v3319_v23 = vsel %vm1430_vm6, %v1374_v21, -1e+10  ;;  %v3323_v24 = vsel %vm1430_vm6, %v1420_v22, -1e+10 }
 0x40f   : >> { %v2533_v25 = vpop.f32.mrf.mxu0  ;;  %v2539_v26 = vpop.f32.mrf.mxu1  ;;  %v1447_v27 = vsel %vm1215_vm2, %v3319_v23, -inf  ;;  %v1450_v30 = vsel %vm1215_vm2, %v3323_v24, -inf  ;;  %p2784_p5 = pnand (%p1223_p10), %p2783_p3, %p2777_p0 }
 0x410   : >> { %1448 = vmax.xlane.f32.xlu1 %v1447_v27 }
 0x411   : >> { %v1377_v28 = vpop.f32.mrf.mxu0  ;;  %v1423_v29 = vpop.f32.mrf.mxu1 }
 0x413   : >> { %v2534_v31 = vpop.f32.mrf.mxu0  ;;  %v2540_v33 = vpop.f32.mrf.mxu1 }
 0x414   : >> { %1451 = vmax.xlane.f32.xlu1 %v1450_v30 }
 0x491   : >> { %v1443_v36 = vpop.xlane.xlu0 %1442 }
 0x492   : >> { %v1453_v38 = vmax.f32 %v1437_v35, %v1443_v36 }
 0x494   : >> { %v1457_v40 = vsub.f32 %v1437_v35, %v1453_v38  ;;  %1754 = vst.msk [vmem:[#allocation4] sm:$0xff] %vm1206_vm1, %v1453_v38  ;;  %1471 = vperm.xlu0 %2704, %v1453_v38  }
 0x495   : >> { %v1446_v42 = vpop.xlane.xlu0 %1445 }
 0x496   : >> { %v1461_v43 = vmul.f32 1.442695, %v1457_v40  ;;  %v3333_v44 = vmax.f32 %v3329_v39, %v1446_v42 }
 0x498   : >> { %2706 = vpow2.f32 %v1461_v43  ;;  %v1458_v47 = vsub.f32 %v3329_v39, %v3333_v44  ;;  %1755 = vst.msk [vmem:[#allocation4 + $0x8] sm:$0xff] %vm1206_vm1, %v3333_v44  ;;  %1476 = vperm.xlu1 %2705, %v3333_v44   ;;  %v1501_v44 = vld [vmem:[#allocation5] sm:$0xff] }
 0x499   : >> { %v1449_v48 = vpop.xlane.xlu1 %1448 }
 0x49a   : >> { %v1455_v49 = vmax.f32 %v1439_v46, %v1449_v48  ;;  %v1463_v33 = vmul.f32 1.442695, %v1458_v47  ;;  %v1502_v48 = vld [vmem:[#allocation5 + $0x8] sm:$0xff] }
 0x49c   : >> { %v1459_v61 = vsub.f32 %v1439_v46, %v1455_v49  ;;  %1756 = vst.msk [vmem:[#allocation4 + $0x10] sm:$0xff] %vm1206_vm1, %v1455_v49  ;;  %1481 = vperm.xlu1 %2705, %v1455_v49  }
 0x49d   : >> { %v1452_v62 = vpop.xlane.xlu1 %1451 }
 0x49e   : >> { %v3344_v63 = vmax.f32 %v3340_v50, %v1452_v62  ;;  %v1465_v28 = vmul.f32 1.442695, %v1459_v61 }
 0x4a0   : >> { %v1460_v32 = vsub.f32 %v3340_v50, %v3344_v63  ;;  %1757 = vst.msk [vmem:[#allocation4 + $0x18] sm:$0xff] %vm1206_vm1, %v3344_v63  ;;  %1486 = vperm.xlu1 %2705, %v3344_v63  }
 0x4a5   : >> { %v2707_v5 = vpop.eup %2706 }
 0x4a6   : >> { %1535 = vperm.xlu1 %2705, %v2707_v5   ;;  %v1505_v46 = vmul.f32 %v2707_v5, %v1501_v44  ;;  %v2907_v44 = vmov (%p1223_p10), 0  }
 0x50f   : >> { %v1472_v13 = vpop.permute.xlu0 %1471 }
 0x510   : >> { %v1489_v14 = vsub.f32 %v3307_v11, %v1472_v13 }
 0x512   : >> { %v1493_v15 = vmul.f32 1.442695, %v1489_v14 }
 0x513   : >> { %v1477_v16 = vpop.permute.xlu1 %1476 }
 0x514   : >> { %2708 = vpow2.f32 %v1493_v15  ;;  %v1490_v17 = vsub.f32 %v3311_v12, %v1477_v16 }
 0x516   : >> { %v1495_v18 = vmul.f32 1.442695, %v1490_v17 }
 0x517   : >> { %v1482_v19 = vpop.permute.xlu1 %1481 }
 0x518   : >> { %2710 = vpow2.f32 %v1495_v18  ;;  %v1491_v20 = vsub.f32 %v3319_v23, %v1482_v19  ;;  %v1531_v19 = vld [vmem:[#allocation6 + $0x10] sm:$0xff] }
 0x51a   : >> { %v1497_v21 = vmul.f32 1.442695, %v1491_v20 }
 0x51b   : >> { %v1487_v22 = vpop.permute.xlu1 %1486 }
 0x51c   : >> { %2712 = vpow2.f32 %v1497_v21  ;;  %v1492_v25 = vsub.f32 %v3323_v24, %v1487_v22 }
 0x51e   : >> { %v1499_v26 = vmul.f32 1.442695, %v1492_v25 }
 0x520   : >> { %2714 = vpow2.f32 %v1499_v26 }
 0x521   : >> { %v2709_v27 = vpop.eup %2708  ;;  %2716 = vpow2.f32 %v1465_v28  ;;  %v1536_v43 = vpop.permute.xlu1 %1535 }
 0x522   : >> { %v1509_v11 = vsel %vm1215_vm2, %v2709_v27, 0.0  ;;  %v1557_v29 = vpack.c.bf16 %v2709_v27, %v2709_v27  ;;  %2718 = vpow2.f32 %v1463_v33 }
 0x523   : >> { %1510 = vadd.xlane.f32.xlu1 %v1509_v11  ;;  %v1532_v11 = vld [vmem:[#allocation6 + $0x18] sm:$0xff] }
 0x524   : >> { %2544 = vmatmul.mubr.msk.bf16.vlgmr.msra.gmra.mxu0 %vm1215_vm2, %v1557_v29 }
 0x525   : >> { %v2711_v12 = vpop.eup %2710  ;;  %2554 = vmatpush3.bf16.msra.mxu0 %v1658_v7  ;;  %2555 = vmatprep.mubr.msk.bf16.mxu0 %vm2905_vm5, %v2904_v60 }
 0x526   : >> { %v1512_v23 = vsel %vm1215_vm2, %v2711_v12, 0.0  ;;  %v1558_v30 = vpack.c.bf16 %v2711_v12, %v2711_v12  ;;  %2581 = vmatprep.subr.bf16.mxu0 (%p1223_p10), %v2895_v8 }
 0x527   : >> { %1513 = vadd.xlane.f32.xlu0 %v1512_v23 }
 0x528   : >> { %2550 = vmatmul.mubr.msk.bf16.vlgmr.msra.gmra.mxu1 %vm1215_vm2, %v1558_v30 }
 0x529   : >> { %v2713_v24 = vpop.eup %2712  ;;  %2560 = vmatpush3.bf16.msra.mxu1 %v1704_v10  ;;  %2561 = vmatprep.mubr.msk.bf16.mxu1 %vm2905_vm5, %v2904_v60  ;;  %v1467_v60 = vmul.f32 1.442695, %v1460_v32  ;;  %v1529_v32 = vld [vmem:[#allocation6] sm:$0xff] }
 0x52a   : >> { %v1559_v31 = vpack.c.bf16 %v2713_v24, %v2713_v24  ;;  %v1515_v40 = vsel %vm1215_vm2, %v2713_v24, 0.0  ;;  %v1553_v7 = vmul.f32 %v1536_v43, %v1529_v32  ;;  %2565 = vmatprep.subr.bf16.mxu1 (%p1223_p10), %v2895_v8 }
 0x52b   : >> { %2720 = vpow2.f32 %v1467_v60 }
 0x52c   : >> { %2556 = vmatmul.mubr.msk.bf16.vlgmr.msra.gmra.mxu0 %vm1215_vm2, %v1559_v31 }
 0x52d   : >> { %v2715_v34 = vpop.eup %2714  ;;  %2597 = vmatprep.mubr.msk.bf16.mxu0 (%p1223_p10), %vm2897_vm3, %v2895_v8 }
 0x52e   : >> { %v1560_v35 = vpack.c.bf16 %v2715_v34, %v2715_v34  ;;  %v2717_v36 = vpop.eup %2716  ;;  %v1518_v42 = vsel %vm1215_vm2, %v2715_v34, 0.0 }
 0x52f   : >> { %v2719_v38 = vpop.eup %2718  ;;  %v1507_v2 = vmul.f32 %v2717_v36, %v1503_v1 }
 0x530   : >> { %2562 = vmatmul.mubr.msk.bf16.vlgmr.msra.gmra.mxu1 %vm1215_vm2, %v1560_v35  ;;  %v1506_v50 = vmul.f32 %v2719_v38, %v1502_v48 }
 0x531   : > { %2569 = vmatprep.mubr.msk.bf16.mxu1 (%p1223_p10), %vm2897_vm3, %v2895_v8 }
 0x534   : >> { %1545 = vperm.xlu1 %2705, %v2717_v36  }
 0x538   : >> { %v2721_v39 = vpop.eup %2720 }
 0x539   : >> { %v1508_v13 = vmul.f32 %v2721_v39, %v1504_v4 }
 0x53d   : >> { %1540 = vperm.xlu0 %2704, %v2719_v38  }
 0x541   : > { %2722 = vset.pattern.permute.xlu0 (%p1223_p10), %v2907_v44 }
 0x558   : >> { %1516 = vadd.xlane.f32.xlu1 %v1515_v40 }
 0x55c   : >> { %1519 = vadd.xlane.f32.xlu1 %v1518_v42 }
 0x56d   : >> { %1550 = vperm.xlu1 %2705, %v2721_v39  }
 0x571   : > { %2723 = vset.pattern.permute.xlu1 (%p1223_p10), %v2907_v44 }
 0x5ac   : >> { %v1511_v47 = vpop.xlane.xlu1 %1510 }
 0x5ad   : >> { %v1521_v49 = vadd.f32 %v1511_v47, %v1505_v46 }
 0x5af   : >> { %1525 = vst.msk [vmem:[#allocation5] sm:$0xff] %vm1206_vm1, %v1521_v49 }
 0x5b0   : >> { %v1514_v61 = vpop.xlane.xlu0 %1513  ;;  %v1546_v63 = vpop.permute.xlu1 %1545 }
 0x5b1   : >> { %v1522_v62 = vadd.f32 %v1514_v61, %v1506_v50  ;;  %v1555_v27 = vmul.f32 %v1546_v63, %v1531_v19  ;;  %v2725_v19 = vld [vmem:[%s3580_s7] sm:$0xff] (%p1223_p10)  }
 0x5b3   : >> { %1526 = vst.msk [vmem:[#allocation5 + $0x8] sm:$0xff] %vm1206_vm1, %v1522_v62 }
 0x5b6   : > { %v1762_v39 = vld [vmem:[#allocation5] sm:$0xff] (%p1223_p10) }
 0x5b8   : >> { %v1541_v5 = vpop.permute.xlu0 %1540 }
 0x5b9   : >> { %v1554_v18 = vmul.f32 %v1541_v5, %v1530_v9  ;;  %v2724_v9 = vld [vmem:[%s3580_s7 + $0x8] sm:$0xff] (%p1223_p10)  }
 0x5ba   : > { %v1763_v46 = vld [vmem:[#allocation5 + $0x8] sm:$0xff] (%p1223_p10)  ;;  %2566 = vmatpush3.bf16.msra.mxu1 (%p1223_p10), %v2724_v9  ;;  %v2729_v9 = vld [vmem:[%s3586_s13 + $0x30] sm:$0xff] (%p1223_p10)  }
 0x5bb   : > { %2567 = vmatprep.subr.bf16.mxu1 (%p1223_p10), %v2895_v8 }
 0x5be   : > { %2568 = vmatpush3.bf16.msra.mxu1 (%p1223_p10), %v2725_v19 }
 0x5bf   : > { %2573 = vmatprep.subr.bf16.mxu1 (%p1223_p10), %v2895_v8 }
 0x5e1   : >> { %v1517_v3 = vpop.xlane.xlu1 %1516 }
 0x5e2   : >> { %v1523_v6 = vadd.f32 %v1517_v3, %v1507_v2 }
 0x5e4   : >> { %1527 = vst.msk [vmem:[#allocation5 + $0x10] sm:$0xff] %vm1206_vm1, %v1523_v6  ;;  %v1602_v10 = vpop.f32.mrf.mxu0 }
 0x5e5   : >> { %v1746_v14 = vadd.f32 %v1602_v10, %v1553_v7  ;;  %v1520_v15 = vpop.xlane.xlu1 %1519 }
 0x5e6   : >> { %v1524_v16 = vadd.f32 %v1520_v15, %v1508_v13  ;;  %v2545_v17 = vpop.f32.mrf.mxu0 }
 0x5e7   : >> { %1750 = vst.msk [vmem:[#allocation6] sm:$0xff] %vm1215_vm2, %v1746_v14 }
 0x5e8   : >> { %1528 = vst.msk [vmem:[#allocation5 + $0x18] sm:$0xff] %vm1206_vm1, %v1524_v16  ;;  %v1605_v20 = vpop.f32.mrf.mxu0  ;;  %v1648_v21 = vpop.f32.mrf.mxu1 }
 0x5e9   : >> { %v1747_v22 = vadd.f32 %v1648_v21, %v1554_v18  ;;  %v1551_v28 = vpop.permute.xlu1 %1550 }
 0x5ea   : >> { %v2546_v25 = vpop.f32.mrf.mxu0  ;;  %v2551_v26 = vpop.f32.mrf.mxu1  ;;  %v1556_v31 = vmul.f32 %v1551_v28, %v1532_v11 }
 0x5eb   : >> { %1751 = vst.msk [vmem:[#allocation6 + $0x8] sm:$0xff] %vm1215_vm2, %v1747_v22  ;;  %v1764_v42 = vld [vmem:[#allocation5 + $0x10] sm:$0xff] (%p1223_p10) }
 0x5ec   : >> { %v1651_v29 = vpop.f32.mrf.mxu1  ;;  %v1694_v12 = vpop.f32.mrf.mxu0  ;;  %2736 = vrcp.f32 (%p1223_p10), %v1764_v42 }
 0x5ed   : >> { %v1748_v23 = vadd.f32 %v1694_v12, %v1555_v27  ;;  %2738 = vrcp.f32 (%p1223_p10), %v1762_v39 }
 0x5ee   : >> { %v2552_v30 = vpop.f32.mrf.mxu1  ;;  %v2557_v24 = vpop.f32.mrf.mxu0  ;;  %v1758_v55 = vld [vmem:[#allocation6] sm:$0xff] (%p1223_p10) }
 0x5ef   : >> { %1752 = vst.msk [vmem:[#allocation6 + $0x10] sm:$0xff] %vm1215_vm2, %v1748_v23  ;;  %v1765_v43 = vld [vmem:[#allocation5 + $0x18] sm:$0xff] (%p1223_p10) }
 0x5f0   : >> { %v1697_v33 = vpop.f32.mrf.mxu0  ;;  %v1740_v34 = vpop.f32.mrf.mxu1  ;;  %2740 = vrcp.f32 (%p1223_p10), %v1765_v43 }
 0x5f1   : >> { %v1749_v35 = vadd.f32 %v1740_v34, %v1556_v31  ;;  %2742 = vrcp.f32 (%p1223_p10), %v1763_v46  ;;  %v2439_v46 = vld [vmem:[%s3581_s8] ss:$0 sm:$0xff] (%p1223_p10) }
 0x5f2   : >> { %v2558_v36 = vpop.f32.mrf.mxu0  ;;  %v2563_v38 = vpop.f32.mrf.mxu1  ;;  %1226 = sbr.rel (!%p1223_p10) target bundleno = 824 (0x338), region = 149  ;;  %v1759_v48 = vld [vmem:[#allocation6 + $0x8] sm:$0xff] (%p1223_p10) }
 0x5f3   : >> { %1753 = vst.msk [vmem:[#allocation6 + $0x18] sm:$0xff] %vm1215_vm2, %v1749_v35 }
 0x5f4   : >> { %v1743_v40 = vpop.f32.mrf.mxu1 }
 0x5f6   : >> { %v2564_v60 = vpop.f32.mrf.mxu1  ;;  %v1760_v54 = vld [vmem:[#allocation6 + $0x10] sm:$0xff] (%p1223_p10) }
 0x5f9   : > { %v2737_v37 = vpop.eup %2736 }
 0x5fa   : > { %v2739_v41 = vpop.eup %2738  ;;  %1782 = vperm.xlu1 %2723, %v2737_v37   ;;  %v1761_v47 = vld [vmem:[#allocation6 + $0x18] sm:$0xff] }
 0x5fb   : > { %1772 = vperm.xlu0 %2722, %v2739_v41  }
 0x5fd   : > { %v2741_v52 = vpop.eup %2740 }
 0x5fe   : > { %v2743_v53 = vpop.eup %2742  ;;  %1787 = vperm.xlu1 %2723, %v2741_v52  }
 0x5ff   : > { %1777 = vperm.xlu0 %2722, %v2743_v53  }
 0x675   : > { %v1783_v56 = vpop.permute.xlu1 %1782 }
 0x676   : > { %v1773_v57 = vpop.permute.xlu0 %1772  ;;  %v1792_v58 = vmul.f32 %v1783_v56, %v1760_v54 }
 0x677   : > { %v1790_v59 = vmul.f32 %v1773_v57, %v1758_v55 }
 0x679   : > { %v1788_v49 = vpop.permute.xlu1 %1787  ;;  %v1794_v62 = vcombine.low %v1790_v59, %v1792_v58  ;;  %v1795_v63 = vcombine.high %v1790_v59, %v1792_v58 }
 0x67a   : > { %v1793_v50 = vmul.f32 %v1788_v49, %v1761_v47  ;;  %v1778_v61 = vpop.permute.xlu0 %1777  ;;  %v2726_v49 = vld [vmem:[%s3584_s11 + $0x8] sm:$0xff]  }
 0x67b   : > { %v1791_v1 = vmul.f32 %v1778_v61, %v1759_v48  ;;  %v1802_v3 = vrot.slane %v1794_v62, %v3161_v45  ;;  %v1809_v4 = vrot.slane %v1795_v63, %v3161_v45 }
 0x67d   : > { %v1810_v32 = vcombine.low %v1791_v1, %v1793_v50  ;;  %v1811_v2 = vcombine.high %v1791_v1, %v1793_v50  ;;  %v2443_v1 = vld [vmem:[%s3582_s9] ss:$0 sm:$0xff] }
 0x67f   : > { %v1818_v6 = vrot.slane %v1810_v32, %v3161_v45  ;;  %v1825_v7 = vrot.slane %v1811_v2, %v3161_v45  ;;  %v2444_v2 = vld [vmem:[%s3583_s10] ss:$0 sm:$0xff] }
 0x681   : > { %v1826_v5 = vcombine.low %v1802_v3, %v1818_v6  ;;  %v1827_v10 = vcombine.high %v1802_v3, %v1818_v6  ;;  %v1842_v13 = vcombine.low %v1809_v4, %v1825_v7  ;;  %v1843_v14 = vcombine.high %v1809_v4, %v1825_v7  ;;  %v2728_v7 = vld [vmem:[%s3586_s13 + $0x38] sm:$0xff]  }
 0x682   : > { %2582 = vmatpush3.bf16.msra.mxu0 %v2728_v7 }
 0x683   : > { %v1834_v15 = vrot.slane %v1826_v5, %v3165_v51  ;;  %v1841_v16 = vrot.slane %v1827_v10, %v3165_v51  ;;  %v1850_v17 = vrot.slane %v1842_v13, %v3165_v51  ;;  %v1857_v18 = vrot.slane %v1843_v14, %v3165_v51  ;;  %2583 = vmatprep.subr.bf16.mxu0 %v2895_v8  ;;  %v2730_v5 = vld [vmem:[%s3586_s13 + $0x28] sm:$0xff]   ;;  %v2731_v10 = vld [vmem:[%s3586_s13 + $0x20] sm:$0xff]   ;;  %v2732_v13 = vld [vmem:[%s3586_s13 + $0x18] sm:$0xff]  }
 0x684   : > { %v2733_v14 = vld [vmem:[%s3586_s13 + $0x10] sm:$0xff]  }
 0x685   : > { %v1862_v20 = vcombine.low %v1834_v15, %v1841_v16  ;;  %v2437_v21 = vcombine.high %v1834_v15, %v1841_v16  ;;  %v1878_v22 = vcombine.low %v1850_v17, %v1857_v18  ;;  %v2438_v25 = vcombine.high %v1850_v17, %v1857_v18  ;;  %v2734_v15 = vld [vmem:[%s3586_s13 + $0x8] sm:$0xff]   ;;  %v2735_v16 = vld [vmem:[%s3586_s13] sm:$0xff]  }
 0x686   : > { %2584 = vmatpush3.bf16.msra.mxu0 %v2729_v9  ;;  %v2445_v17 = vld [vmem:[#allocation7] ss:$0 sm:$0xff] }
 0x687   : > { %v1869_v26 = vrot.slane %v1862_v20, %v3161_v45  ;;  %v1877_v27 = vrot.slane %v2437_v21, %v3161_v45  ;;  %v1885_v28 = vrot.slane %v1878_v22, %v3161_v45  ;;  %v1893_v11 = vrot.slane %v2438_v25, %v3161_v45  ;;  %2585 = vmatprep.subr.bf16.mxu0 %v2895_v8 }
 0x689   : > { %v1895_v29 = vcombine.high %v1869_v26, %v1877_v27  ;;  %v1911_v12 = vcombine.high %v1885_v28, %v1893_v11  ;;  %v1894_v23 = vcombine.low %v1869_v26, %v1877_v27  ;;  %v1910_v30 = vcombine.low %v1885_v28, %v1893_v11 }
 0x68a   : > { %2586 = vmatpush3.bf16.msra.mxu0 %v2730_v5 }
 0x68b   : > { %v1909_v24 = vrot.slane %v1895_v29, %v3165_v51  ;;  %v1925_v31 = vrot.slane %v1911_v12, %v3165_v51  ;;  %v1902_v33 = vrot.slane %v1894_v23, %v3165_v51  ;;  %v1918_v34 = vrot.slane %v1910_v30, %v3165_v51  ;;  %2587 = vmatprep.subr.bf16.mxu0 %v2895_v8 }
 0x68d   : > { %v1928_v35 = vcombine.low %v1909_v24, %v1925_v31  ;;  %v1927_v36 = vcombine.high %v1902_v33, %v1918_v34  ;;  %v1926_v38 = vcombine.low %v1902_v33, %v1918_v34  ;;  %v1929_v45 = vcombine.high %v1909_v24, %v1925_v31 }
 0x68e   : > { %2588 = vmatpush3.bf16.msra.mxu0 %v2731_v10 }
 0x68f   : > { %1935 = vrot.lane.b32.xlu1 %v1928_v35, %s2908_s17  ;;  %1931 = vrot.lane.b32.xlu0 %v1927_v36, %s3595_s27 }
 0x690   : > { %2589 = vmatprep.subr.bf16.mxu0 %v2895_v8 }
 0x692   : > { %2590 = vmatpush3.bf16.msra.mxu0 %v2732_v13 }
 0x693   : > { %1939 = vrot.lane.b32.xlu0 %v1929_v45, %s2910_s29  ;;  %2591 = vmatprep.subr.bf16.mxu0 %v2895_v8  ;;  %s3485_s29 = scalar_lea.hbm %s3589_s16, %s3596_s19 }
 0x696   : > { %2592 = vmatpush3.bf16.msra.mxu0 %v2733_v14 }
 0x697   : > { %2593 = vmatprep.subr.bf16.mxu0 %v2895_v8 }
 0x69a   : > { %2594 = vmatpush3.bf16.msra.mxu0 %v2734_v15 }
 0x69b   : > { %2595 = vmatprep.subr.bf16.mxu0 %v2895_v8 }
 0x69e   : > { %2596 = vmatpush3.bf16.msra.mxu0 %v2735_v16 }
 0x701   : > { %v1932_v40 = vpop.permute.xlu0 %1931  ;;  %v1936_v60 = vpop.permute.xlu1 %1935 }
 0x702   : > { %v1942_v42 = vsel %vm1215_vm2, %v1926_v38, %v1932_v40 }
 0x703   : > { %v1944_v39 = vsel %vm1943_vm8, %v1942_v42, %v1936_v60 }
 0x705   : > { %v1940_v43 = vpop.permute.xlu0 %1939 }
 0x706   : > { %v1946_v51 = vsel %vm1945_vm9, %v1944_v39, %v1940_v43 }
 0x707   : > { %v1947_v44 = vpack.c.bf16 %v1946_v51, %v1946_v51 }
 0x709   : > { %2570 = vmatmul.mubr.msk.bf16.vlgmr.msra.gmra.mxu1 %vm573_vm0, %v1947_v44 }
 0x70a   : > { %2577 = vmatprep.mubr.msk.bf16.mxu1 %vm2897_vm3, %v2895_v8  ;;  %2574 = vmatpush3.bf16.msra.mxu1 %v2726_v49 }
 0x70b   : > { %2575 = vmatprep.subr.bf16.mxu1 %v2895_v8 }
 0x7c9   : > { %v2008_v37 = vpop.f32.mrf.mxu1 }
 0x7ca   : > { %v2009_v41 = vadd.f32 %v2439_v46, %v2008_v37 }
 0x7cb   : > { %v2571_v52 = vpop.f32.mrf.mxu1 }
 0x7cc   : > { %v3428_v53 = vadd.f32 %v2009_v41, %v3081_v0  ;;  %v2727_v0 = vld [vmem:[%s3584_s11] sm:$0xff]  }
 0x7cd   : > { %v2011_v54 = vpop.f32.mrf.mxu1  ;;  %2576 = vmatpush3.bf16.msra.mxu1 %v2727_v0 }
 0x7ce   : > { %v2017_v55 = vsel %vm573_vm0, %v3428_v53, 0.0 }
 0x7cf   : > { %2018 = vadd.xlane.f32.xlu1 %v2017_v55  ;;  %v2572_v56 = vpop.f32.mrf.mxu1 }
 0x858   : > { %v2019_v57 = vpop.xlane.xlu1 %2018 }
 0x859   : > { %v2020_v58 = vmul.f32 0.03125, %v2019_v57 }
 0x85b   : > { %v2021_v59 = vsub.f32 %v3428_v53, %v2020_v58 }
 0x85d   : > { %v2022_v47 = vmul.f32 %v2021_v59, %v2021_v59 }
 0x85f   : > { %v2023_v48 = vsel %vm573_vm0, %v2022_v47, 0.0 }
 0x860   : > { %2024 = vadd.xlane.f32.xlu0 %v2023_v48 }
 0x8e9   : > { %v2025_v50 = vpop.xlane.xlu0 %2024 }
 0x8ea   : > { %v2026_v61 = vmul.f32 0.03125, %v2025_v50 }
 0x8ec   : > { %v2027_v62 = vadd.f32 1e-05, %v2026_v61 }
 0x8ee   : > { %2744 = vrsqrt.f32 %v2027_v62 }
 0x8fb   : > { %v2745_v63 = vpop.eup %2744 }
 0x8fc   : > { %v2029_v32 = vmul.f32 %v2745_v63, %v2021_v59 }
 0x8fe   : > { %v2036_v3 = vmul.f32 %v2443_v1, %v2029_v32 }
 0x900   : > { %v2043_v4 = vadd.f32 %v2444_v2, %v2036_v3 }
 0x902   : > { %v2044_v6 = vpack.c.bf16 %v2043_v4, %v2043_v4 }
 0x904   : > { %2578 = vmatmul.mubr.msk.bf16.vlgmr.msra.gmra.mxu1 %vm573_vm0, %v2044_v6 }
 0x9c4   : > { %v2105_v18 = vpop.f32.mrf.mxu1 }
 0x9c5   : > { %v2106_v19 = vadd.f32 %v2445_v17, %v2105_v18 }
 0x9c6   : > { %v2579_v20 = vpop.f32.mrf.mxu1 }
 0x9c7   : > { %v2112_v21 = vmul.f32 0.044715, %v2106_v19  ;;  %v2111_v8 = vmul.f32 0.5, %v2106_v19 }
 0x9c8   : > { %v2108_v22 = vpop.f32.mrf.mxu1 }
 0x9c9   : > { %v2113_v25 = vmul.f32 %v2112_v21, %v2106_v19 }
 0x9ca   : > { %v2580_v26 = vpop.f32.mrf.mxu1 }
 0x9cb   : > { %v2114_v27 = vmul.f32 %v2113_v25, %v2106_v19 }
 0x9cd   : > { %v2115_v28 = vadd.f32 %v2114_v27, %v2106_v19 }
 0x9cf   : > { %v2116_v11 = vmul.f32 0.7978846, %v2115_v28 }
 0x9d1   : > { %2746 = vtanh.f32 %v2116_v11 }
 0x9de   : > { %v2747_v29 = vpop.eup %2746 }
 0x9df   : > { %v2118_v12 = vadd.f32 1.0, %v2747_v29 }
 0x9e1   : > { %v2119_v23 = vmul.f32 %v2118_v12, %v2111_v8 }
 0x9e3   : > { %v2120_v30 = vpack.c.bf16 %v2119_v23, %v2119_v23 }
 0x9e5   : > { %2598 = vmatmul.mubr.bf16.vlgmr.msra.gmra.mxu0 %v2120_v30 }
 0x9e6   : > { %2787 = shalt.err (!%p2784_p5)
}
 0x9e7   : > { %s2788_s28 = scalar_lea.hbm %s3485_s29, 256  ;;  %s2792_s18 = scalar_lea.hbm %s3589_s16, 512 }
 0x9e8   : > { %p2789_p6 = scmp.ne.s32.totalorder %s3485_s29, %s2788_s28  ;;  %p2793_p12 = scmp.lt.s32.totalorder %s3485_s29, %s3589_s16 }
 0x9e9   : > { %p2794_p10 = scmp.lt.s32.totalorder %s2792_s18, %s2788_s28 }
 0x9ea   : > { %p2790_p7 = pnand %p2789_p6, %p3040_p4 }
 0x9eb   : > { %p2795_p11 = por %p2794_p10, %p2793_p12 }
 0x9ec   : > { %p2791_p9 = pneg %p2790_p7 }
 0x9ee   : > { %p2796_p13 = pnand %p2795_p11, %p2791_p9 }
 0x9f0   : > { %2799 = shalt.err (!%p2796_p13)
}
 0x9f1   : > { %s2912_s1 = smov 128   ;;  %s2913_s2 = smov 256   ;;  %v2449_v24 = vld [vmem:[%s3587_s14] ss:$0 sm:$0xff] }
 0x9f2   : > { %s3617_s21 = smov 8   ;;  %s3618_s20 = scalar_lea.sflag [#allocation12], %s3136_s25 }
 0x9f3   : > { %2606 = dma.vmem_to_hbm [thread:$0]  (%p3040_p4), %s3488_s30, 256, %s3485_s29, %s3618_s20, %s2912_s1, %s2913_s2, %s3617_s21  }
 0x9f4   : > { %s2254_s28 = sshll.u32 %s3248_s23, 4  ;;  %s3619_s17 = sshll.u32 %s2880_s24, 7  ;;  %s3526_s28 = int_to_ptr.vmem [resolvable:$true] %s2254_s28 }
 0x9f5   : > { %s3524_s4 = scalar_lea.hbm %s3588_s15, %s3619_s17  ;;  %s2235_s29 = scalar_lea.sflag [#allocation9], %s3136_s25 }
 0x9f6   : > { %s2800_s30 = scalar_lea.vmem %s3526_s28, 128  ;;  %s2914_s24 = smov [#allocation10]  }
 0x9f7   : > { %p2801_p0 = scmp.ne.s32.totalorder %s3526_s28, %s2800_s30  ;;  %s2804_s1 = sshll.u32 %s2914_s24, 4  ;;  %s2805_s1 = int_to_ptr.vmem [resolvable:$false] %s2804_s1 }
 0x9f8   : > { %s2806_s3 = scalar_lea.vmem %s2805_s1, 256  ;;  %p2807_p3 = scmp.lt.s32.totalorder %s3526_s28, %s2805_s1 }
 0x9f9   : > { %p2802_p1 = pnand %p2801_p0, %p3040_p4  ;;  %p2808_p5 = scmp.lt.s32.totalorder %s2806_s3, %s2800_s30 }
 0x9fb   : > { %p2803_p2 = pneg %p2802_p1  ;;  %p2809_p6 = por %p2808_p5, %p2807_p3 }
 0x9fd   : > { %p2810_p7 = pnand %p2809_p6, %p2803_p2 }
 0xaa5   : > { %v2226_v31 = vpop.f32.mrf.mxu0 }
 0xaa6   : > { %v2227_v33 = vadd.f32 %v2449_v24, %v2226_v31 }
 0xaa7   : > { %v2599_v34 = vpop.f32.mrf.mxu0 }
 0xaa8   : > { %v2232_v35 = vadd.f32 %v2227_v33, %v3428_v53 }
 0xaa9   : > { %v2229_v36 = vpop.f32.mrf.mxu0 }
 0xaaa   : > { %2233 = vst.msk [vmem:[%s3248_s23] sm:$0xff] %vm573_vm0, %v2232_v35 }
 0xaab   : > { %v2600_v38 = vpop.f32.mrf.mxu0 }
 0xaac   : > { %2813 = shalt.err (!%p2810_p7)
}
 0xaad   : > { %s2814_s23 = scalar_lea.hbm %s3524_s4, 128  ;;  %s2818_s21 = scalar_lea.hbm %s3588_s15, 256 }
 0xaae   : > { %p2815_p9 = scmp.ne.s32.totalorder %s3524_s4, %s2814_s23  ;;  %p2819_p11 = scmp.lt.s32.totalorder %s3524_s4, %s3588_s15 }
 0xaaf   : > { %p2820_p13 = scmp.lt.s32.totalorder %s2818_s21, %s2814_s23 }
 0xab0   : > { %p2816_p12 = pnand %p2815_p9, %p3040_p4 }
 0xab1   : > { %p2821_p0 = por %p2820_p13, %p2819_p11 }
 0xab2   : > { %p2817_p10 = pneg %p2816_p12 }
 0xab4   : > { %p2822_p1 = pnand %p2821_p0, %p2817_p10 }
 0xab6   : > { %2825 = shalt.err (!%p2822_p1)
}
 0xab7   : > { %2605 = dma.vmem_to_hbm [thread:$0]  (%p3040_p4), %s3526_s28, 128, %s3524_s4, %s2235_s29  }
 0xab8 PF: > { %s3620_s27 = sld [smem:[#allocation16_spill]]  ;;  %p2622_p2 = scmp.ge.s32.totalorder %s2888_s26, 2 }
 0xaba   : > { %p2614_p3 = pnand %p2622_p2, %p3047_p8 }
 0xabc   : > { %p2615_p5 = pneg %p2614_p3 }
 0xabe   : > { %s2282_s18 = sand.u32 1, %s3620_s27  }
 0xabf   : > { %s2283_s30 = scalar_lea.sflag [#allocation9], %s2282_s18 }
 0xac0   : > { %2859 = dma.done.wait (%p2615_p5), %s2283_s30, 128  }
 0xac1   : > { %2861 = vsyncadd (%p2615_p5), %s2283_s30, 4294967168  ;;  %s2292_s24 = scalar_lea.sflag [#allocation12], %s2282_s18 }
 0xac2   : > { %2863 = dma.done.wait (%p2615_p5), %s2292_s24, 256  }
 0xac3   : > { %2865 = vsyncadd (%p2615_p5), %s2292_s24, 4294967040  ;;  %s34_s26 = sadd.s32 1, %s2888_s26   ;;  %s3622_s4 = sld [smem:[#allocation17_spill]] }
 0xac4   : > { %p31_p6 = scmp.ge.s32.totalorder %s34_s26, 4   ;;  %s3623_s23 = sld [smem:[#allocation21_spill]] }
 0xac5   : > { %s3624_s24 = sld [smem:[#allocation18_spill]]  ;;  %s3626_s21 = smov %s2872_s22 }
 0xac6   : > { %s3625_s25 = sld [smem:[#allocation19_spill]]  ;;  %33 = sbr.rel (!%p31_p6) target bundleno = 13 (0xd), region = 160 }
 0xac9   : > { %s3627_s22 = smov %s3622_s4 }
 0xacb   :  { %2297 = vsyncpa [#allocation8], 1 }
 0xacc   :  { %2299 = vsyncpa [#allocation8 + $0x1], 1 }
 0xacd   :  { %2300 = vsyncpa [#allocation9], 1 }
 0xace   :  { %2302 = vsyncpa [#allocation9 + $0x1], 1 }
 0xacf   :  { %2303 = vsyncpa [#allocation12], 1 }
 0xad0   :  { %2305 = vsyncpa [#allocation12 + $0x1], 1 }

// kernel: tpu_custom_call.1
= control target key start
LH: loop header
LB: loop body
LE: loop exit
PB: predicated region body
PF: predicated region fallthrough
CT: control target
= control target key end

     0   :  { %s3573_s0 = inlined_call_operand.vmem [shape: f32[2,8,32], index: 0, kind: input, shape index: {}]   ;;  %s3574_s1 = inlined_call_operand.vmem [shape: f32[1,32], index: 1, kind: input, shape index: {}]   ;;  %s3575_s2 = inlined_call_operand.vmem [shape: f32[1,32], index: 2, kind: input, shape index: {}]   ;;  %s3576_s3 = inlined_call_operand.vmem [shape: bf16[32,32], index: 3, kind: input, shape index: {}]   ;;  %s3577_s4 = inlined_call_operand.vmem [shape: f32[1,32], index: 4, kind: input, shape index: {}]   ;;  %s3578_s5 = inlined_call_operand.vmem [shape: bf16[32,64], index: 5, kind: input, shape index: {}]   ;;  %s3579_s6 = inlined_call_operand.vmem [shape: f32[1,64], index: 6, kind: input, shape index: {}]   ;;  %s3580_s7 = inlined_call_operand.vmem [shape: bf16[32,32], index: 7, kind: input, shape index: {}]   ;;  %s3581_s8 = inlined_call_operand.vmem [shape: f32[1,32], index: 8, kind: input, shape index: {}]   ;;  %s3582_s9 = inlined_call_operand.vmem [shape: f32[1,32], index: 9, kind: input, shape index: {}]   ;;  %s3583_s10 = inlined_call_operand.vmem [shape: f32[1,32], index: 10, kind: input, shape index: {}]   ;;  %s3584_s11 = inlined_call_operand.vmem [shape: bf16[32,128], index: 11, kind: input, shape index: {}]   ;;  %s3585_s12 = inlined_call_operand.hbm [shape: f32[1,128], index: 12, kind: input, shape index: {}]   ;;  %s3586_s13 = inlined_call_operand.vmem [shape: bf16[128,32], index: 13, kind: input, shape index: {}]   ;;  %s3587_s14 = inlined_call_operand.vmem [shape: f32[1,32], index: 14, kind: input, shape index: {}]   ;;  %s3588_s15 = inlined_call_operand.hbm [shape: f32[2,8,32], index: 15, kind: output, shape index: {0}]   ;;  %s3589_s16 = inlined_call_operand.hbm [shape: f32[2,2,8,32], index: 16, kind: output, shape index: {1}]  }
   0x1   :  { %3597 = sst [smem:[#allocation22_spill]] %s3573_s0 }
   0x2   :  { %3598 = sst [smem:[#allocation23_spill]] %s3574_s1 }
   0x3   :  { %3599 = sst [smem:[#allocation24_spill]] %s3575_s2 }
   0x4   :  { %3600 = sst [smem:[#allocation25_spill]] %s3576_s3 }
   0x5   :  { %3601 = sst [smem:[#allocation26_spill]] %s3577_s4 }
   0x6   :  { %22 = vsyncpa [#allocation8], 0 }
   0x7   :  { %23 = vsyncpa [#allocation9], 0 }
   0x8   :  { %25 = vsyncpa [#allocation9 + $0x1], 0 }
   0x9   :  { %26 = vsyncpa [#allocation12], 0 }
   0xa   :  { %28 = vsyncpa [#allocation12 + $0x1], 0  ;;  %s3000_s21 = smov 0   ;;  %s3002_s22 = smov 0  }
   0xb   :  { %s3004_s23 = smov 0   ;;  %s3006_s24 = smov 0  }
   0xc   :  { %s3008_s25 = smov 0   ;;  %s3010_s26 = smov 0  }
   0xd LB: > { %3602 = sst [smem:[#allocation16_spill]] %s2868_s21  ;;  %s2399_s27 = sadd.s32 4294967295, %s2888_s26   ;;  %s2888_s26 = sphi %s3010_s26, %s34_s26   ;;  %s2884_s25 = sphi %s3008_s25, %s3625_s25   ;;  %s2880_s24 = sphi %s3006_s24, %s3624_s24   ;;  %s2876_s23 = sphi %s3004_s23, %s3623_s23   ;;  %s2872_s22 = sphi %s3002_s22, %s3627_s22   ;;  %s2868_s21 = sphi %s3000_s21, %s3626_s21  }
   0xe   : > { %3603 = sst [smem:[#allocation17_spill]] %s2876_s23  ;;  %s2400_s28 = sadd.s32 4294967294, %s2888_s26  }
   0xf   : > { %3604 = sst [smem:[#allocation18_spill]] %s2884_s25  ;;  %s46_s29 = sadd.s32 1, %s2884_s25 }
  0x10   : > { %s377_s30 = sadd.s32 1, %s2876_s23  ;;  %p48_p0 = scmp.ge.s32.totalorder %s46_s29, 2 }
  0x11   : > { %p387_p1 = scmp.ne.s32.totalorder %s2876_s23, %s2872_s22  ;;  %p388_p2 = scmp.eq.s32.totalorder %s2399_s27, 1 }
  0x12   : > { %p393_p3 = scmp.ne.s32.totalorder %s2872_s22, %s2868_s21  ;;  %s3629_s29 = smov (%p48_p0, %s46_s29), 0 }
  0x13   : > { %3605 = sst [smem:[#allocation19_spill]] %s3629_s29  ;;  %p3040_p4 = por %p388_p2, %p387_p1 }
  0x14   : > { %p394_p5 = scmp.eq.s32.totalorder %s2400_s28, 1  ;;  %s372_s17 = ssub.s32 %s2884_s25, %s3629_s29 }
  0x15   : > { %p2401_p6 = scmp.ge.s32.totalorder %s2888_s26, 1  ;;  %p375_p7 = scmp.eq.s32.totalorder %s372_s17, 0 }
  0x16   : > { %p3047_p8 = por %p394_p5, %p393_p3  ;;  %p429_p9 = scmp.lt.s32.totalorder %s2888_s26, 3 }
  0x17   : > { %s3053_s19 = scalar_select %p375_p7, %s2876_s23, %s377_s30  }
  0x18   : > { %s3607_s18 = scalar_select %p3047_p8, 1, 0 }
  0x19   : > { %3609 = sst [smem:[#allocation21_spill]] %s3053_s19  ;;  %p3055_p10 = pnand %p2401_p6, %p429_p9 }
  0x1a   : > { %3608 = sst [smem:[#allocation20_spill]] %s3607_s18  ;;  %p3059_p11 = scmp.eq.s32.totalorder %s2399_s27, 0 }
  0x1b   : > { %p2609_p12 = pneg %p3055_p10  ;;  %s2894_s28 = smov [#allocation7]  }
  0x1c   : > { %s475_s17 = sshll.u32 %s2894_s28, 4  ;;  %s476_s17 = int_to_ptr.vmem [resolvable:$true] %s475_s17 }
  0x1d   : > { %p2610_p13 = pnand %p3059_p11, %p2609_p12  ;;  %s2759_s30 = scalar_lea.vmem %s476_s17, 16 }
  0x1e   : > { %p2760_p1 = scmp.ne.s32.totalorder %s476_s17, %s2759_s30  ;;  %s2766_s29 = scalar_lea.vmem %s476_s17, 32 }
  0x1f   : > { %p2750_p0 = pneg %p2610_p13  ;;  %p2767_p5 = scmp.lt.s32.totalorder %s476_s17, %s476_s17 }
  0x20   : > { %p2768_p6 = scmp.lt.s32.totalorder %s2766_s29, %s2759_s30 }
  0x21   : > { %p2762_p2 = pnand %p2760_p1, %p2750_p0 }
  0x22   : > { %p2769_p7 = por %p2768_p6, %p2767_p5 }
  0x23   : > { %p2763_p3 = pneg %p2762_p2 }
  0x25   : > { %p2770_p9 = pnand %p2769_p7, %p2763_p3 }
  0x27   : > { %2773 = shalt.err (!%p2770_p9)
}
  0x28   : > { %2612 = dma.hbm_to_vmem [thread:$0]  (!%p2610_p13), %s3585_s12, 16, %s476_s17, [#allocation8]  }
  0x29   : > { %504 = sbr.rel (%p3055_p10) target bundleno = 2744 (0xab8), region = 80 }
  0x2e   : > { %2855 = dma.done.wait (%p3059_p11), [#allocation8], 16  }
  0x2f   : > { %2857 = vsyncadd (%p3059_p11), [#allocation8], 4294967280  ;;  %p561_p12 = scmp.lt.s32.totalorder %s2880_s24, 1  ;;  %s3612_s23 = sld [smem:[#allocation22_spill]]  ;;  %vm573_vm0 = vcmask 261120   ;;  %vm1206_vm1 = vcmask 7168   ;;  %v690_v37 = vlaneseq }
  0x30   : > { %vm1215_vm2 = vcmask 64512   ;;  %v2698_v7 = vld [vmem:[%s3578_s5 + $0x8] sm:$0xff]   ;;  %v2895_v8 = vmov 0.0   ;;  %v2896_v9 = vmov -1e+30   ;;  %s3613_s3 = sld [smem:[#allocation25_spill]] }
  0x31   : > { %s562_s29 = scalar_select %p561_p12, %s2880_s24, 1  ;;  %2501 = vmatprep.subr.bf16.mxu0 %v2895_v8  ;;  %1207 = vst.msk [vmem:[#allocation4] sm:$0xff] %vm1206_vm1, %v2896_v9  ;;  %1208 = vst.msk [vmem:[#allocation4 + $0x8] sm:$0xff] %vm1206_vm1, %v2896_v9  ;;  %2509 = vmatprep.subr.bf16.mxu1 %v2895_v8  ;;  %v2700_v11 = vld [vmem:[%s3578_s5] sm:$0xff]   ;;  %vm2897_vm3 = vmmov 0   ;;  %v3157_v41 = vshrl.u32 %v690_v37, 7 }
  0x32   : > { %1209 = vst.msk [vmem:[#allocation4 + $0x10] sm:$0xff] %vm1206_vm1, %v2896_v9  ;;  %1210 = vst.msk [vmem:[#allocation4 + $0x18] sm:$0xff] %vm1206_vm1, %v2896_v9  ;;  %2502 = vmatpush3.bf16.msra.mxu0 %v2698_v7  ;;  %2505 = vmatprep.mubr.msk.bf16.mxu0 %vm2897_vm3, %v2895_v8  ;;  %s3614_s1 = sld [smem:[#allocation23_spill]]  ;;  %s3136_s25 = sand.u32 1, %s2872_s22   ;;  %v2411_v23 = vld [vmem:[%s3579_s6] ss:$0 sm:$0xff] }
  0x33   : > { %s2408_s28 = sshll.u32 %s562_s29, 3  ;;  %1211 = vst.msk [vmem:[#allocation5] sm:$0xff] %vm1206_vm1, %v2895_v8  ;;  %1212 = vst.msk [vmem:[#allocation5 + $0x8] sm:$0xff] %vm1206_vm1, %v2895_v8  ;;  %2503 = vmatprep.subr.bf16.mxu0 %v2895_v8  ;;  %2513 = vmatprep.mubr.msk.bf16.mxu1 %vm2897_vm3, %v2895_v8  ;;  %s3615_s2 = sld [smem:[#allocation24_spill]]  ;;  %v2902_v35 = vmov 1983009808  }
  0x34   : > { %1213 = vst.msk [vmem:[#allocation5 + $0x10] sm:$0xff] %vm1206_vm1, %v2895_v8  ;;  %1214 = vst.msk [vmem:[#allocation5 + $0x18] sm:$0xff] %vm1206_vm1, %v2895_v8  ;;  %s3616_s4 = sld [smem:[#allocation26_spill]]  ;;  %s2898_s27 = smov 104   ;;  %v688_v36 = vunpack.c.l.s4 %v2902_v35  ;;  %v2903_v38 = vmov 1934713408  }
  0x35   : > { %s567_s18 = scalar_lea.vmem %s3612_s23, %s2408_s28  ;;  %1216 = vst.msk [vmem:[#allocation6] sm:$0xff] %vm1215_vm2, %v2895_v8  ;;  %1217 = vst.msk [vmem:[#allocation6 + $0x8] sm:$0xff] %vm1215_vm2, %v2895_v8  ;;  %s2407_s23 = sshll.u32 %s3136_s25, 4  ;;  %v720_v39 = vunpack.c.l.s4 %v2903_v38  ;;  %vm829_vm4 = vcmask 60416  }
  0x36   : > { %v3081_v0 = vld [vmem:[%s567_s18] sm:$0xff]  ;;  %1218 = vst.msk [vmem:[#allocation6 + $0x10] sm:$0xff] %vm1215_vm2, %v2895_v8  ;;  %1219 = vst.msk [vmem:[#allocation6 + $0x18] sm:$0xff] %vm1215_vm2, %v2895_v8  ;;  %v2699_v10 = vld [vmem:[%s3613_s3 + $0x8] sm:$0xff]   ;;  %2504 = vmatpush3.bf16.msra.mxu0 %v2700_v11  ;;  %s2899_s29 = smov 120   ;;  %s3145_s28 = scalar_lea.vmem [#allocation11], %s2407_s23  ;;  %v689_v40 = vunpack.c.0.s8 %v688_v36 }
  0x37   : > { %v574_v1 = vsel %vm573_vm0, %v3081_v0, 0.0  ;;  %2510 = vmatpush3.bf16.msra.mxu1 %v2699_v10  ;;  %v2701_v12 = vld [vmem:[%s3613_s3] sm:$0xff]   ;;  %s2900_s30 = smov 112   ;;  %s2901_s21 = smov 96   ;;  %v721_v44 = vunpack.c.0.s8 %v720_v39 }
  0x38   : > { %575 = vadd.xlane.f32.xlu0 %v574_v1  ;;  %2511 = vmatprep.subr.bf16.mxu1 %v2895_v8  ;;  %v2409_v17 = vld [vmem:[%s3614_s1] ss:$0 sm:$0xff]  ;;  %s2406_s18 = sshll.u32 %s3136_s25, 3  ;;  %v3161_v45 = vsub.s32 %v689_v40, %v3157_v41  ;;  %s3250_s19 = smov 0  }
  0x39   : > { %v2410_v19 = vld [vmem:[%s3615_s2] ss:$0 sm:$0xff]  ;;  %v3165_v51 = vsub.s32 %v721_v44, %v3157_v41  ;;  %s3248_s23 = scalar_lea.vmem [#allocation10], %s2406_s18 }
  0x3a   : > { %v2420_v27 = vld [vmem:[%s3616_s4] ss:$0 sm:$0xff] }
  0x3b   : > { %2512 = vmatpush3.bf16.msra.mxu1 %v2701_v12 }
  0xc1   : > { %v576_v2 = vpop.xlane.xlu0 %575 }
  0xc2   : > { %v578_v3 = vmul.f32 0.03125, %v576_v2 }
  0xc4   : > { %v579_v4 = vsub.f32 %v3081_v0, %v578_v3 }
  0xc6   : > { %v580_v5 = vmul.f32 %v579_v4, %v579_v4 }
  0xc8   : > { %v581_v6 = vsel %vm573_vm0, %v580_v5, 0.0 }
  0xc9   : > { %582 = vadd.xlane.f32.xlu0 %v581_v6 }
 0x152   : > { %v583_v13 = vpop.xlane.xlu0 %582 }
 0x153   : > { %v584_v14 = vmul.f32 0.03125, %v583_v13 }
 0x155   : > { %v585_v15 = vadd.f32 1e-05, %v584_v14 }
 0x157   : > { %2702 = vrsqrt.f32 %v585_v15 }
 0x164   : > { %v2703_v16 = vpop.eup %2702 }
 0x165   : > { %v587_v18 = vmul.f32 %v2703_v16, %v579_v4 }
 0x167   : > { %v594_v20 = vmul.f32 %v2409_v17, %v587_v18 }
 0x169   : > { %v601_v21 = vadd.f32 %v2410_v19, %v594_v20 }
 0x16b   : > { %v602_v22 = vpack.c.bf16 %v601_v21, %v601_v21 }
 0x16d   : > { %2506 = vmatmul.mubr.msk.bf16.vlgmr.msra.gmra.mxu0 %vm573_vm0, %v602_v22  ;;  %2514 = vmatmul.mubr.msk.bf16.vlgmr.msra.gmra.mxu1 %vm573_vm0, %v602_v22 }
 0x22d   : > { %v663_v24 = vpop.f32.mrf.mxu0  ;;  %v1046_v25 = vpop.f32.mrf.mxu1 }
 0x22e   : > { %v664_v26 = vadd.f32 %v2411_v23, %v663_v24  ;;  %v3149_v32 = vadd.f32 %v2420_v27, %v1046_v25 }
 0x22f   : > { %v2507_v28 = vpop.f32.mrf.mxu0  ;;  %v2515_v29 = vpop.f32.mrf.mxu1 }
 0x230   : > { %682 = vrot.lane.b32.xlu0 %v664_v26, %s2898_s27  ;;  %676 = vrot.lane.b32.xlu1 %v664_v26, %s2899_s29  ;;  %669 = vst.msk [vmem:[%s3145_s28] sm:$0xff] %vm573_vm0, %v664_v26 }
 0x231   : > { %v666_v30 = vpop.f32.mrf.mxu0  ;;  %v1049_v31 = vpop.f32.mrf.mxu1 }
 0x233   : > { %v2508_v33 = vpop.f32.mrf.mxu0  ;;  %v2516_v34 = vpop.f32.mrf.mxu1 }
 0x234   : > { %1059 = vrot.lane.b32.xlu0 %v3149_v32, %s2898_s27  ;;  %679 = vrot.lane.b32.xlu1 %v664_v26, %s2900_s30 }
 0x238   : > { %671 = vrot.lane.b32.xlu1 %v664_v26, %s2901_s21 }
 0x23c   : > { %1053 = vrot.lane.b32.xlu1 %v3149_v32, %s2899_s29 }
 0x2a2   : > { %v683_v42 = vpop.permute.xlu0 %682  ;;  %v677_v43 = vpop.permute.xlu1 %676 }
 0x2a3   : > { %834 = vrot.lane.b32.xlu1 %v677_v43, %s2901_s21  ;;  %v701_v46 = vcombine.low %v677_v43, %v683_v42  ;;  %v702_v47 = vcombine.high %v677_v43, %v683_v42 }
 0x2a5   : > { %v709_v52 = vrot.slane %v701_v46, %v3161_v45  ;;  %v716_v53 = vrot.slane %v702_v47, %v3161_v45 }
 0x2a6   : > { %v680_v48 = vpop.permute.xlu1 %679  ;;  %v1060_v36 = vpop.permute.xlu0 %1059 }
 0x2a7   : > { %v685_v49 = vcombine.low %v664_v26, %v680_v48  ;;  %v686_v50 = vcombine.high %v664_v26, %v680_v48  ;;  %836 = vrot.lane.b32.xlu1 %v680_v48, %s2901_s21 }
 0x2a9   : > { %v693_v54 = vrot.slane %v685_v49, %v3161_v45  ;;  %v700_v55 = vrot.slane %v686_v50, %v3161_v45 }
 0x2aa   : > { %v672_v56 = vpop.permute.xlu1 %671 }
 0x2ab   : > { %v717_v57 = vcombine.low %v693_v54, %v709_v52  ;;  %v718_v58 = vcombine.high %v693_v54, %v709_v52  ;;  %v733_v59 = vcombine.low %v700_v55, %v716_v53  ;;  %v734_v60 = vcombine.high %v700_v55, %v716_v53  ;;  %2415 = vst.msk [vmem:[%s3145_s28 + $0x8] sm:$0xff] %vm573_vm0, %v672_v56 }
 0x2ac   : > { %838 = vrot.lane.b32.xlu1 %v683_v42, %s2901_s21 }
 0x2ad   : > { %v725_v61 = vrot.slane %v717_v57, %v3165_v51  ;;  %v732_v62 = vrot.slane %v718_v58, %v3165_v51  ;;  %v741_v63 = vrot.slane %v733_v59, %v3165_v51  ;;  %v748_v1 = vrot.slane %v734_v60, %v3165_v51 }
 0x2ae   : > { %v1054_v27 = vpop.permute.xlu1 %1053 }
 0x2af   : > { %v753_v2 = vcombine.low %v725_v61, %v732_v62  ;;  %v2416_v3 = vcombine.high %v725_v61, %v732_v62  ;;  %v769_v4 = vcombine.low %v741_v63, %v748_v1  ;;  %v2417_v5 = vcombine.high %v741_v63, %v748_v1 }
 0x2b0   : > { %1056 = vrot.lane.b32.xlu1 %v3149_v32, %s2900_s30  ;;  %v1078_v43 = vcombine.low %v1054_v27, %v1060_v36  ;;  %v1079_v44 = vcombine.high %v1054_v27, %v1060_v36 }
 0x2b1   : > { %v760_v6 = vrot.slane %v753_v2, %v3161_v45  ;;  %v768_v7 = vrot.slane %v2416_v3, %v3161_v45  ;;  %v776_v9 = vrot.slane %v769_v4, %v3161_v45  ;;  %v784_v10 = vrot.slane %v2417_v5, %v3161_v45 }
 0x2b2   : > { %v1086_v58 = vrot.slane %v1078_v43, %v3161_v45  ;;  %v1093_v59 = vrot.slane %v1079_v44, %v3161_v45 }
 0x2b3   : > { %v785_v11 = vcombine.low %v760_v6, %v768_v7  ;;  %v786_v12 = vcombine.high %v760_v6, %v768_v7  ;;  %v801_v13 = vcombine.low %v776_v9, %v784_v10  ;;  %v802_v14 = vcombine.high %v776_v9, %v784_v10 }
 0x2b5   : > { %v793_v15 = vrot.slane %v785_v11, %v3165_v51  ;;  %v800_v16 = vrot.slane %v786_v12, %v3165_v51  ;;  %v809_v17 = vrot.slane %v801_v13, %v3165_v51  ;;  %v816_v18 = vrot.slane %v802_v14, %v3165_v51 }
 0x2b7   : > { %v817_v19 = vcombine.low %v793_v15, %v809_v17  ;;  %v818_v20 = vcombine.high %v793_v15, %v809_v17  ;;  %v819_v21 = vcombine.low %v800_v16, %v816_v18  ;;  %v820_v22 = vcombine.high %v800_v16, %v816_v18 }
 0x2b9   : > { %v821_v23 = vpack.c.bf16 %v817_v19, %v817_v19  ;;  %v822_v24 = vpack.c.bf16 %v818_v20, %v818_v20  ;;  %v823_v25 = vpack.c.bf16 %v819_v21, %v819_v21  ;;  %v824_v26 = vpack.c.bf16 %v820_v22, %v820_v22 }
 0x2bb   : > { %830 = vst.msk [vmem:[#allocation2] sm:$0xf] %vm829_vm4, %v821_v23  ;;  %831 = vst.msk [vmem:[#allocation2 + $0x4] sm:$0xf] %vm829_vm4, %v822_v24 }
 0x2bc   : > { %832 = vst.msk [vmem:[#allocation2 + $0x8] sm:$0xf] %vm829_vm4, %v823_v25  ;;  %833 = vst.msk [vmem:[#allocation2 + $0xc] sm:$0xf] %vm829_vm4, %v824_v26 }
 0x315   : > { %v835_v28 = vpop.permute.xlu1 %834 }
 0x319   : > { %v837_v29 = vpop.permute.xlu1 %836 }
 0x31a   : > { %v843_v30 = vcombine.low %v672_v56, %v837_v29  ;;  %v844_v31 = vcombine.high %v672_v56, %v837_v29 }
 0x31c   : > { %v851_v38 = vrot.slane %v843_v30, %v3161_v45  ;;  %v858_v39 = vrot.slane %v844_v31, %v3161_v45 }
 0x31e   : > { %v839_v33 = vpop.permute.xlu1 %838 }
 0x31f   : > { %v859_v34 = vcombine.low %v835_v28, %v839_v33  ;;  %v860_v35 = vcombine.high %v835_v28, %v839_v33 }
 0x321   : > { %v867_v40 = vrot.slane %v859_v34, %v3161_v45  ;;  %v874_v42 = vrot.slane %v860_v35, %v3161_v45 }
 0x322   : > { %v1057_v46 = vpop.permute.xlu1 %1056 }
 0x323   : > { %v875_v47 = vcombine.low %v851_v38, %v867_v40  ;;  %v876_v48 = vcombine.high %v851_v38, %v867_v40  ;;  %v891_v49 = vcombine.low %v858_v39, %v874_v42  ;;  %v892_v50 = vcombine.high %v858_v39, %v874_v42 }
 0x324   : > { %v1062_v52 = vcombine.low %v3149_v32, %v1057_v46  ;;  %v1063_v53 = vcombine.high %v3149_v32, %v1057_v46 }
 0x325   : > { %v883_v54 = vrot.slane %v875_v47, %v3165_v51  ;;  %v890_v55 = vrot.slane %v876_v48, %v3165_v51  ;;  %v899_v56 = vrot.slane %v891_v49, %v3165_v51  ;;  %v906_v57 = vrot.slane %v892_v50, %v3165_v51 }
 0x326   : > { %v1070_v60 = vrot.slane %v1062_v52, %v3161_v45  ;;  %v1077_v61 = vrot.slane %v1063_v53, %v3161_v45 }
 0x327   : > { %v911_v62 = vcombine.low %v883_v54, %v890_v55  ;;  %v2418_v63 = vcombine.high %v883_v54, %v890_v55  ;;  %v927_v1 = vcombine.low %v899_v56, %v906_v57  ;;  %v2419_v32 = vcombine.high %v899_v56, %v906_v57 }
 0x328   : > { %v1094_v2 = vcombine.low %v1070_v60, %v1086_v58  ;;  %v1095_v3 = vcombine.high %v1070_v60, %v1086_v58  ;;  %v1110_v4 = vcombine.low %v1077_v61, %v1093_v59  ;;  %v1111_v5 = vcombine.high %v1077_v61, %v1093_v59 }
 0x329   : > { %v918_v6 = vrot.slane %v911_v62, %v3161_v45  ;;  %v926_v7 = vrot.slane %v2418_v63, %v3161_v45  ;;  %v934_v9 = vrot.slane %v927_v1, %v3161_v45  ;;  %v942_v10 = vrot.slane %v2419_v32, %v3161_v45 }
 0x32a   : > { %v1102_v11 = vrot.slane %v1094_v2, %v3165_v51  ;;  %v1109_v12 = vrot.slane %v1095_v3, %v3165_v51  ;;  %v1118_v13 = vrot.slane %v1110_v4, %v3165_v51  ;;  %v1125_v14 = vrot.slane %v1111_v5, %v3165_v51 }
 0x32b   : > { %v943_v15 = vcombine.low %v918_v6, %v926_v7  ;;  %v944_v16 = vcombine.high %v918_v6, %v926_v7  ;;  %v959_v17 = vcombine.low %v934_v9, %v942_v10  ;;  %v960_v18 = vcombine.high %v934_v9, %v942_v10 }
 0x32c   : > { %v1130_v19 = vcombine.low %v1102_v11, %v1109_v12  ;;  %v2424_v20 = vcombine.high %v1102_v11, %v1109_v12  ;;  %v1146_v21 = vcombine.low %v1118_v13, %v1125_v14  ;;  %v2425_v22 = vcombine.high %v1118_v13, %v1125_v14 }
 0x32d   : > { %v951_v23 = vrot.slane %v943_v15, %v3165_v51  ;;  %v958_v24 = vrot.slane %v944_v16, %v3165_v51  ;;  %v967_v25 = vrot.slane %v959_v17, %v3165_v51  ;;  %v974_v26 = vrot.slane %v960_v18, %v3165_v51 }
 0x32e   : > { %v1137_v27 = vrot.slane %v1130_v19, %v3161_v45  ;;  %v1145_v28 = vrot.slane %v2424_v20, %v3161_v45  ;;  %v1153_v29 = vrot.slane %v1146_v21, %v3161_v45  ;;  %v1161_v30 = vrot.slane %v2425_v22, %v3161_v45 }
 0x32f   : > { %v975_v31 = vcombine.low %v951_v23, %v967_v25  ;;  %v976_v33 = vcombine.high %v951_v23, %v967_v25  ;;  %v977_v34 = vcombine.low %v958_v24, %v974_v26  ;;  %v978_v35 = vcombine.high %v958_v24, %v974_v26 }
 0x330   : > { %v1162_v36 = vcombine.low %v1137_v27, %v1145_v28  ;;  %v1163_v38 = vcombine.high %v1137_v27, %v1145_v28  ;;  %v1178_v39 = vcombine.low %v1153_v29, %v1161_v30  ;;  %v1179_v40 = vcombine.high %v1153_v29, %v1161_v30 }
 0x331   : > { %v979_v42 = vpack.c.bf16 %v975_v31, %v975_v31  ;;  %v980_v43 = vpack.c.bf16 %v976_v33, %v976_v33  ;;  %v981_v44 = vpack.c.bf16 %v977_v34, %v977_v34  ;;  %v982_v46 = vpack.c.bf16 %v978_v35, %v978_v35 }
 0x332   : > { %v1170_v47 = vrot.slane %v1162_v36, %v3165_v51  ;;  %v1177_v48 = vrot.slane %v1163_v38, %v3165_v51  ;;  %v1186_v49 = vrot.slane %v1178_v39, %v3165_v51  ;;  %v1193_v50 = vrot.slane %v1179_v40, %v3165_v51 }
 0x333   : > { %985 = vst.msk [vmem:[#allocation3] sm:$0xf] %vm829_vm4, %v979_v42  ;;  %986 = vst.msk [vmem:[#allocation3 + $0x4] sm:$0xf] %vm829_vm4, %v980_v43 }
 0x334   : > { %987 = vst.msk [vmem:[#allocation3 + $0x8] sm:$0xf] %vm829_vm4, %v981_v44  ;;  %988 = vst.msk [vmem:[#allocation3 + $0xc] sm:$0xf] %vm829_vm4, %v982_v46  ;;  %v3230_v52 = vcombine.low %v1170_v47, %v1186_v49  ;;  %v3232_v53 = vcombine.high %v1170_v47, %v1186_v49  ;;  %v3234_v54 = vcombine.low %v1177_v48, %v1193_v50 }
 0x335   : > { %v3236_v55 = vcombine.high %v1177_v48, %v1193_v50 }
 0x336   : > { %v1198_v56 = vpack.c.bf16 %v3230_v52, %v3230_v52  ;;  %v1199_v57 = vpack.c.bf16 %v3232_v53, %v3232_v53  ;;  %v1200_v58 = vpack.c.bf16 %v3234_v54, %v3234_v54 }
 0x337   : > { %v1201_v59 = vpack.c.bf16 %v3236_v55, %v3236_v55 }
 0x338 LB: >> { %v2904_v60 = vmov 0.0   ;;  %s2426_s20 = sshll.u32 %s2892_s19, 3  ;;  %vm2905_vm5 = vmmov 0   ;;  %v1427_v5 = vand.u32 127, %v690_v37  ;;  %v2906_v34 = vmov 0   ;;  %v1437_v35 = vld [vmem:[#allocation4] sm:$0xff]  ;;  %s2892_s19 = sphi %s3250_s19, %s1224_s19  }
 0x339   : >> { %2517 = vmatprep.subr.bf16.mxu0 %v2904_v60  ;;  %2523 = vmatprep.subr.bf16.mxu1 %v2904_v60  ;;  %s3264_s17 = sshra.s32 %s2426_s20, 3  ;;  %v1428_v6 = vstv %s2426_s20  ;;  %v3329_v39 = vld [vmem:[#allocation4 + $0x8] sm:$0xff]  ;;  %v1439_v46 = vld [vmem:[#allocation4 + $0x10] sm:$0xff]  ;;  %v3340_v50 = vld [vmem:[#allocation4 + $0x18] sm:$0xff]  ;;  %vm1564_vm7 = vcmask 1043456   ;;  %s1224_s19 = sadd.s32 1, %s2892_s19  }
 0x33a   : >> { %2519 = vmatprep.mubr.msk.bf16.mxu0 %vm2905_vm5, %v2904_v60  ;;  %2525 = vmatprep.mubr.msk.bf16.mxu1 %vm2905_vm5, %v2904_v60  ;;  %s2427_s27 = sshll.u32 %s3264_s17, 2  ;;  %v1429_v7 = vadd.s32 %v1428_v6, %v1427_v5  ;;  %p1223_p10 = scmp.ge.s32.totalorder %s1224_s19, 1 }
 0x33b   : >> { %s1231_s29 = scalar_lea.vmem [#allocation2], %s2427_s27  ;;  %2704 = vset.pattern.permute.xlu0 %v2906_v34  ;;  %2705 = vset.pattern.permute.xlu1 %v2906_v34  ;;  %s1237_s30 = scalar_lea.vmem [#allocation3], %s2427_s27  ;;  %vm1943_vm8 = vcmask (%p1223_p10), 130048   ;;  %vm1945_vm9 = vcmask (%p1223_p10), 195584  }
 0x33c   : >> { %v1232_v61 = vld [vmem:[%s1231_s29] sm:$0xf]  ;;  %v1233_v62 = vld [vmem:[%s1231_s29 + $0x4] sm:$0xf]  ;;  %v1234_v32 = vld [vmem:[%s1231_s29 + $0x8] sm:$0xf]  ;;  %vm1430_vm6 = vcmp.le.s32.totalorder %v1429_v7, %v3157_v41 }
 0x33d   : >> { %v1246_v63 = vsel %vm1215_vm2, %v1232_v61, 0  ;;  %v1292_v1 = vsel %vm1215_vm2, %v1233_v62, 0  ;;  %v1235_v2 = vld [vmem:[%s1231_s29 + $0xc] sm:$0xf]  ;;  %v1338_v3 = vsel %vm1215_vm2, %v1234_v32, 0  ;;  %s2908_s17 = smov (%p1223_p10), 16  }
 0x33e   : >> { %2518 = vmatpush3.bf16.xpose.msra.mxu0 %v1246_v63  ;;  %2524 = vmatpush3.bf16.xpose.msra.mxu1 %v1292_v1  ;;  %v1384_v4 = vsel %vm1215_vm2, %v1235_v2, 0  ;;  %v1238_v1 = vld [vmem:[%s1237_s30] sm:$0xf]  ;;  %v1240_v6 = vld [vmem:[%s1237_s30 + $0x8] sm:$0xf]  ;;  %s3595_s27 = smov (%p1223_p10), 8  }
 0x33f   : >> { %2529 = vmatprep.subr.bf16.mxu0 %v2904_v60  ;;  %2535 = vmatprep.subr.bf16.mxu1 %v2904_v60  ;;  %v1566_v2 = vsel %vm1564_vm7, %v1238_v1, 0  ;;  %v1658_v7 = vsel %vm1564_vm7, %v1240_v6, 0  ;;  %v1503_v1 = vld [vmem:[#allocation5 + $0x10] sm:$0xff]  ;;  %s2910_s29 = smov (%p1223_p10), 24   ;;  %s3596_s19 = sshll.u32 (%p1223_p10), %s2880_s24, 7 }
 0x340   : > { %s2911_s18 = smov (%p1223_p10), [#allocation11]  }
 0x341   : > { %s2778_s1 = sshll.u32 (%p1223_p10), %s2911_s18, 4  ;;  %s2779_s1 = int_to_ptr.vmem [resolvable:$false] %s2778_s1 }
 0x342   : > { %s2780_s2 = scalar_lea.vmem (%p1223_p10), %s2779_s1, 512 }
 0x345   : >> { %2520 = vmatmul.mubr.msk.bf16.vlgmr.msra.gmra.mxu0 %vm1215_vm2, %v1198_v56  ;;  %2526 = vmatmul.mubr.msk.bf16.vlgmr.msra.gmra.mxu1 %vm1215_vm2, %v1199_v57 }
 0x346   : >> { %2530 = vmatpush3.bf16.xpose.msra.mxu0 %v1338_v3  ;;  %2536 = vmatpush3.bf16.xpose.msra.mxu1 %v1384_v4  ;;  %v1239_v3 = vld [vmem:[%s1237_s30 + $0x4] sm:$0xf] }
 0x347   : >> { %2531 = vmatprep.mubr.msk.bf16.mxu0 %vm2905_vm5, %v2904_v60  ;;  %2537 = vmatprep.mubr.msk.bf16.mxu1 %vm2905_vm5, %v2904_v60  ;;  %v1612_v4 = vsel %vm1564_vm7, %v1239_v3, 0 }
 0x348   : >> { %2541 = vmatprep.subr.bf16.mxu0 %v2904_v60  ;;  %2547 = vmatprep.subr.bf16.mxu1 %v2904_v60 }
 0x34d   : >> { %2532 = vmatmul.mubr.msk.bf16.vlgmr.msra.gmra.mxu0 %vm1215_vm2, %v1200_v58  ;;  %2538 = vmatmul.mubr.msk.bf16.vlgmr.msra.gmra.mxu1 %vm1215_vm2, %v1201_v59 }
 0x34e   : >> { %2543 = vmatprep.mubr.msk.bf16.mxu0 %vm2905_vm5, %v2904_v60  ;;  %2549 = vmatprep.mubr.msk.bf16.mxu1 %vm2905_vm5, %v2904_v60 }
 0x34f   : >> { %2542 = vmatpush3.bf16.msra.mxu0 %v1566_v2  ;;  %2548 = vmatpush3.bf16.msra.mxu1 %v1612_v4  ;;  %v1504_v4 = vld [vmem:[#allocation5 + $0x18] sm:$0xff] }
 0x350   : >> { %2553 = vmatprep.subr.bf16.mxu0 %v2904_v60  ;;  %2559 = vmatprep.subr.bf16.mxu1 %v2904_v60 }
 0x405   : >> { %v1282_v9 = vpop.f32.mrf.mxu0  ;;  %v1328_v10 = vpop.f32.mrf.mxu1 }
 0x406   : >> { %v3307_v11 = vsel %vm1430_vm6, %v1282_v9, -1e+10  ;;  %v3311_v12 = vsel %vm1430_vm6, %v1328_v10, -1e+10  ;;  %v1241_v9 = vld [vmem:[%s1237_s30 + $0xc] sm:$0xf] }
 0x407   : >> { %v2521_v13 = vpop.f32.mrf.mxu0  ;;  %v2527_v14 = vpop.f32.mrf.mxu1  ;;  %v1441_v15 = vsel %vm1215_vm2, %v3307_v11, -inf  ;;  %v1444_v18 = vsel %vm1215_vm2, %v3311_v12, -inf  ;;  %v1704_v10 = vsel %vm1564_vm7, %v1241_v9, 0  ;;  %v1530_v9 = vld [vmem:[#allocation6 + $0x8] sm:$0xff]  ;;  %s2267_s30 = sshll.u32 (%p1223_p10), %s3145_s28, 4  ;;  %s3488_s30 = int_to_ptr.vmem [resolvable:$true] %s2267_s30 }
 0x408   : >> { %1442 = vmax.xlane.f32.xlu0 %v1441_v15  ;;  %s2774_s21 = scalar_lea.vmem (%p1223_p10), %s3488_s30, 256  ;;  %p2781_p1 = scmp.lt.s32.totalorder (%p1223_p10), %s3488_s30, %s2779_s1 }
 0x409   : >> { %v1285_v16 = vpop.f32.mrf.mxu0  ;;  %v1331_v17 = vpop.f32.mrf.mxu1  ;;  %p2775_p11 = scmp.ne.s32.totalorder (%p1223_p10), %s3488_s30, %s2774_s21  ;;  %p2782_p2 = scmp.lt.s32.totalorder (%p1223_p10), %s2780_s2, %s2774_s21 }
 0x40b   : >> { %v2522_v19 = vpop.f32.mrf.mxu0  ;;  %v2528_v20 = vpop.f32.mrf.mxu1  ;;  %p2776_p13 = pnand (%p1223_p10), %p2775_p11, %p3040_p4  ;;  %p2783_p3 = por (%p1223_p10), %p2782_p2, %p2781_p1 }
 0x40c   : >> { %1445 = vmax.xlane.f32.xlu0 %v1444_v18 }
 0x40d   : >> { %v1374_v21 = vpop.f32.mrf.mxu0  ;;  %v1420_v22 = vpop.f32.mrf.mxu1  ;;  %p2777_p0 = pneg (%p1223_p10), %p2776_p13 }
 0x40e   : >> { %v3319_v23 = vsel %vm1430_vm6, %v1374_v21, -1e+10  ;;  %v3323_v24 = vsel %vm1430_vm6, %v1420_v22, -1e+10 }
 0x40f   : >> { %v2533_v25 = vpop.f32.mrf.mxu0  ;;  %v2539_v26 = vpop.f32.mrf.mxu1  ;;  %v1447_v27 = vsel %vm1215_vm2, %v3319_v23, -inf  ;;  %v1450_v30 = vsel %vm1215_vm2, %v3323_v24, -inf  ;;  %p2784_p5 = pnand (%p1223_p10), %p2783_p3, %p2777_p0 }
 0x410   : >> { %1448 = vmax.xlane.f32.xlu1 %v1447_v27 }
 0x411   : >> { %v1377_v28 = vpop.f32.mrf.mxu0  ;;  %v1423_v29 = vpop.f32.mrf.mxu1 }
 0x413   : >> { %v2534_v31 = vpop.f32.mrf.mxu0  ;;  %v2540_v33 = vpop.f32.mrf.mxu1 }
 0x414   : >> { %1451 = vmax.xlane.f32.xlu1 %v1450_v30 }
 0x491   : >> { %v1443_v36 = vpop.xlane.xlu0 %1442 }
 0x492   : >> { %v1453_v38 = vmax.f32 %v1437_v35, %v1443_v36 }
 0x494   : >> { %v1457_v40 = vsub.f32 %v1437_v35, %v1453_v38  ;;  %1754 = vst.msk [vmem:[#allocation4] sm:$0xff] %vm1206_vm1, %v1453_v38  ;;  %1471 = vperm.xlu0 %2704, %v1453_v38  }
 0x495   : >> { %v1446_v42 = vpop.xlane.xlu0 %1445 }
 0x496   : >> { %v1461_v43 = vmul.f32 1.442695, %v1457_v40  ;;  %v3333_v44 = vmax.f32 %v3329_v39, %v1446_v42 }
 0x498   : >> { %2706 = vpow2.f32 %v1461_v43  ;;  %v1458_v47 = vsub.f32 %v3329_v39, %v3333_v44  ;;  %1755 = vst.msk [vmem:[#allocation4 + $0x8] sm:$0xff] %vm1206_vm1, %v3333_v44  ;;  %1476 = vperm.xlu1 %2705, %v3333_v44   ;;  %v1501_v44 = vld [vmem:[#allocation5] sm:$0xff] }
 0x499   : >> { %v1449_v48 = vpop.xlane.xlu1 %1448 }
 0x49a   : >> { %v1455_v49 = vmax.f32 %v1439_v46, %v1449_v48  ;;  %v1463_v33 = vmul.f32 1.442695, %v1458_v47  ;;  %v1502_v48 = vld [vmem:[#allocation5 + $0x8] sm:$0xff] }
 0x49c   : >> { %v1459_v61 = vsub.f32 %v1439_v46, %v1455_v49  ;;  %1756 = vst.msk [vmem:[#allocation4 + $0x10] sm:$0xff] %vm1206_vm1, %v1455_v49  ;;  %1481 = vperm.xlu1 %2705, %v1455_v49  }
 0x49d   : >> { %v1452_v62 = vpop.xlane.xlu1 %1451 }
 0x49e   : >> { %v3344_v63 = vmax.f32 %v3340_v50, %v1452_v62  ;;  %v1465_v28 = vmul.f32 1.442695, %v1459_v61 }
 0x4a0   : >> { %v1460_v32 = vsub.f32 %v3340_v50, %v3344_v63  ;;  %1757 = vst.msk [vmem:[#allocation4 + $0x18] sm:$0xff] %vm1206_vm1, %v3344_v63  ;;  %1486 = vperm.xlu1 %2705, %v3344_v63  }
 0x4a5   : >> { %v2707_v5 = vpop.eup %2706 }
 0x4a6   : >> { %1535 = vperm.xlu1 %2705, %v2707_v5   ;;  %v1505_v46 = vmul.f32 %v2707_v5, %v1501_v44  ;;  %v2907_v44 = vmov (%p1223_p10), 0  }
 0x50f   : >> { %v1472_v13 = vpop.permute.xlu0 %1471 }
 0x510   : >> { %v1489_v14 = vsub.f32 %v3307_v11, %v1472_v13 }
 0x512   : >> { %v1493_v15 = vmul.f32 1.442695, %v1489_v14 }
 0x513   : >> { %v1477_v16 = vpop.permute.xlu1 %1476 }
 0x514   : >> { %2708 = vpow2.f32 %v1493_v15  ;;  %v1490_v17 = vsub.f32 %v3311_v12, %v1477_v16 }
 0x516   : >> { %v1495_v18 = vmul.f32 1.442695, %v1490_v17 }
 0x517   : >> { %v1482_v19 = vpop.permute.xlu1 %1481 }
 0x518   : >> { %2710 = vpow2.f32 %v1495_v18  ;;  %v1491_v20 = vsub.f32 %v3319_v23, %v1482_v19  ;;  %v1531_v19 = vld [vmem:[#allocation6 + $0x10] sm:$0xff] }
 0x51a   : >> { %v1497_v21 = vmul.f32 1.442695, %v1491_v20 }
 0x51b   : >> { %v1487_v22 = vpop.permute.xlu1 %1486 }
 0x51c   : >> { %2712 = vpow2.f32 %v1497_v21  ;;  %v1492_v25 = vsub.f32 %v3323_v24, %v1487_v22 }
 0x51e   : >> { %v1499_v26 = vmul.f32 1.442695, %v1492_v25 }
 0x520   : >> { %2714 = vpow2.f32 %v1499_v26 }
 0x521   : >> { %v2709_v27 = vpop.eup %2708  ;;  %2716 = vpow2.f32 %v1465_v28  ;;  %v1536_v43 = vpop.permute.xlu1 %1535 }
 0x522   : >> { %v1509_v11 = vsel %vm1215_vm2, %v2709_v27, 0.0  ;;  %v1557_v29 = vpack.c.bf16 %v2709_v27, %v2709_v27  ;;  %2718 = vpow2.f32 %v1463_v33 }
 0x523   : >> { %1510 = vadd.xlane.f32.xlu1 %v1509_v11  ;;  %v1532_v11 = vld [vmem:[#allocation6 + $0x18] sm:$0xff] }
 0x524   : >> { %2544 = vmatmul.mubr.msk.bf16.vlgmr.msra.gmra.mxu0 %vm1215_vm2, %v1557_v29 }
 0x525   : >> { %v2711_v12 = vpop.eup %2710  ;;  %2554 = vmatpush3.bf16.msra.mxu0 %v1658_v7  ;;  %2555 = vmatprep.mubr.msk.bf16.mxu0 %vm2905_vm5, %v2904_v60 }
 0x526   : >> { %v1512_v23 = vsel %vm1215_vm2, %v2711_v12, 0.0  ;;  %v1558_v30 = vpack.c.bf16 %v2711_v12, %v2711_v12  ;;  %2581 = vmatprep.subr.bf16.mxu0 (%p1223_p10), %v2895_v8 }
 0x527   : >> { %1513 = vadd.xlane.f32.xlu0 %v1512_v23 }
 0x528   : >> { %2550 = vmatmul.mubr.msk.bf16.vlgmr.msra.gmra.mxu1 %vm1215_vm2, %v1558_v30 }
 0x529   : >> { %v2713_v24 = vpop.eup %2712  ;;  %2560 = vmatpush3.bf16.msra.mxu1 %v1704_v10  ;;  %2561 = vmatprep.mubr.msk.bf16.mxu1 %vm2905_vm5, %v2904_v60  ;;  %v1467_v60 = vmul.f32 1.442695, %v1460_v32  ;;  %v1529_v32 = vld [vmem:[#allocation6] sm:$0xff] }
 0x52a   : >> { %v1559_v31 = vpack.c.bf16 %v2713_v24, %v2713_v24  ;;  %v1515_v40 = vsel %vm1215_vm2, %v2713_v24, 0.0  ;;  %v1553_v7 = vmul.f32 %v1536_v43, %v1529_v32  ;;  %2565 = vmatprep.subr.bf16.mxu1 (%p1223_p10), %v2895_v8 }
 0x52b   : >> { %2720 = vpow2.f32 %v1467_v60 }
 0x52c   : >> { %2556 = vmatmul.mubr.msk.bf16.vlgmr.msra.gmra.mxu0 %vm1215_vm2, %v1559_v31 }
 0x52d   : >> { %v2715_v34 = vpop.eup %2714  ;;  %2597 = vmatprep.mubr.msk.bf16.mxu0 (%p1223_p10), %vm2897_vm3, %v2895_v8 }
 0x52e   : >> { %v1560_v35 = vpack.c.bf16 %v2715_v34, %v2715_v34  ;;  %v2717_v36 = vpop.eup %2716  ;;  %v1518_v42 = vsel %vm1215_vm2, %v2715_v34, 0.0 }
 0x52f   : >> { %v2719_v38 = vpop.eup %2718  ;;  %v1507_v2 = vmul.f32 %v2717_v36, %v1503_v1 }
 0x530   : >> { %2562 = vmatmul.mubr.msk.bf16.vlgmr.msra.gmra.mxu1 %vm1215_vm2, %v1560_v35  ;;  %v1506_v50 = vmul.f32 %v2719_v38, %v1502_v48 }
 0x531   : > { %2569 = vmatprep.mubr.msk.bf16.mxu1 (%p1223_p10), %vm2897_vm3, %v2895_v8 }
 0x534   : >> { %1545 = vperm.xlu1 %2705, %v2717_v36  }
 0x538   : >> { %v2721_v39 = vpop.eup %2720 }
 0x539   : >> { %v1508_v13 = vmul.f32 %v2721_v39, %v1504_v4 }
 0x53d   : >> { %1540 = vperm.xlu0 %2704, %v2719_v38  }
 0x541   : > { %2722 = vset.pattern.permute.xlu0 (%p1223_p10), %v2907_v44 }
 0x558   : >> { %1516 = vadd.xlane.f32.xlu1 %v1515_v40 }
 0x55c   : >> { %1519 = vadd.xlane.f32.xlu1 %v1518_v42 }
 0x56d   : >> { %1550 = vperm.xlu1 %2705, %v2721_v39  }
 0x571   : > { %2723 = vset.pattern.permute.xlu1 (%p1223_p10), %v2907_v44 }
 0x5ac   : >> { %v1511_v47 = vpop.xlane.xlu1 %1510 }
 0x5ad   : >> { %v1521_v49 = vadd.f32 %v1511_v47, %v1505_v46 }
 0x5af   : >> { %1525 = vst.msk [vmem:[#allocation5] sm:$0xff] %vm1206_vm1, %v1521_v49 }
 0x5b0   : >> { %v1514_v61 = vpop.xlane.xlu0 %1513  ;;  %v1546_v63 = vpop.permute.xlu1 %1545 }
 0x5b1   : >> { %v1522_v62 = vadd.f32 %v1514_v61, %v1506_v50  ;;  %v1555_v27 = vmul.f32 %v1546_v63, %v1531_v19  ;;  %v2725_v19 = vld [vmem:[%s3580_s7] sm:$0xff] (%p1223_p10)  }
 0x5b3   : >> { %1526 = vst.msk [vmem:[#allocation5 + $0x8] sm:$0xff] %vm1206_vm1, %v1522_v62 }
 0x5b6   : > { %v1762_v39 = vld [vmem:[#allocation5] sm:$0xff] (%p1223_p10) }
 0x5b8   : >> { %v1541_v5 = vpop.permute.xlu0 %1540 }
 0x5b9   : >> { %v1554_v18 = vmul.f32 %v1541_v5, %v1530_v9  ;;  %v2724_v9 = vld [vmem:[%s3580_s7 + $0x8] sm:$0xff] (%p1223_p10)  }
 0x5ba   : > { %v1763_v46 = vld [vmem:[#allocation5 + $0x8] sm:$0xff] (%p1223_p10)  ;;  %2566 = vmatpush3.bf16.msra.mxu1 (%p1223_p10), %v2724_v9  ;;  %v2729_v9 = vld [vmem:[%s3586_s13 + $0x30] sm:$0xff] (%p1223_p10)  }
 0x5bb   : > { %2567 = vmatprep.subr.bf16.mxu1 (%p1223_p10), %v2895_v8 }
 0x5be   : > { %2568 = vmatpush3.bf16.msra.mxu1 (%p1223_p10), %v2725_v19 }
 0x5bf   : > { %2573 = vmatprep.subr.bf16.mxu1 (%p1223_p10), %v2895_v8 }
 0x5e1   : >> { %v1517_v3 = vpop.xlane.xlu1 %1516 }
 0x5e2   : >> { %v1523_v6 = vadd.f32 %v1517_v3, %v1507_v2 }
 0x5e4   : >> { %1527 = vst.msk [vmem:[#allocation5 + $0x10] sm:$0xff] %vm1206_vm1, %v1523_v6  ;;  %v1602_v10 = vpop.f32.mrf.mxu0 }
 0x5e5   : >> { %v1746_v14 = vadd.f32 %v1602_v10, %v1553_v7  ;;  %v1520_v15 = vpop.xlane.xlu1 %1519 }
 0x5e6   : >> { %v1524_v16 = vadd.f32 %v1520_v15, %v1508_v13  ;;  %v2545_v17 = vpop.f32.mrf.mxu0 }
 0x5e7   : >> { %1750 = vst.msk [vmem:[#allocation6] sm:$0xff] %vm1215_vm2, %v1746_v14 }
 0x5e8   : >> { %1528 = vst.msk [vmem:[#allocation5 + $0x18] sm:$0xff] %vm1206_vm1, %v1524_v16  ;;  %v1605_v20 = vpop.f32.mrf.mxu0  ;;  %v1648_v21 = vpop.f32.mrf.mxu1 }
 0x5e9   : >> { %v1747_v22 = vadd.f32 %v1648_v21, %v1554_v18  ;;  %v1551_v28 = vpop.permute.xlu1 %1550 }
 0x5ea   : >> { %v2546_v25 = vpop.f32.mrf.mxu0  ;;  %v2551_v26 = vpop.f32.mrf.mxu1  ;;  %v1556_v31 = vmul.f32 %v1551_v28, %v1532_v11 }
 0x5eb   : >> { %1751 = vst.msk [vmem:[#allocation6 + $0x8] sm:$0xff] %vm1215_vm2, %v1747_v22  ;;  %v1764_v42 = vld [vmem:[#allocation5 + $0x10] sm:$0xff] (%p1223_p10) }
 0x5ec   : >> { %v1651_v29 = vpop.f32.mrf.mxu1  ;;  %v1694_v12 = vpop.f32.mrf.mxu0  ;;  %2736 = vrcp.f32 (%p1223_p10), %v1764_v42 }
 0x5ed   : >> { %v1748_v23 = vadd.f32 %v1694_v12, %v1555_v27  ;;  %2738 = vrcp.f32 (%p1223_p10), %v1762_v39 }
 0x5ee   : >> { %v2552_v30 = vpop.f32.mrf.mxu1  ;;  %v2557_v24 = vpop.f32.mrf.mxu0  ;;  %v1758_v55 = vld [vmem:[#allocation6] sm:$0xff] (%p1223_p10) }
 0x5ef   : >> { %1752 = vst.msk [vmem:[#allocation6 + $0x10] sm:$0xff] %vm1215_vm2, %v1748_v23  ;;  %v1765_v43 = vld [vmem:[#allocation5 + $0x18] sm:$0xff] (%p1223_p10) }
 0x5f0   : >> { %v1697_v33 = vpop.f32.mrf.mxu0  ;;  %v1740_v34 = vpop.f32.mrf.mxu1  ;;  %2740 = vrcp.f32 (%p1223_p10), %v1765_v43 }
 0x5f1   : >> { %v1749_v35 = vadd.f32 %v1740_v34, %v1556_v31  ;;  %2742 = vrcp.f32 (%p1223_p10), %v1763_v46  ;;  %v2439_v46 = vld [vmem:[%s3581_s8] ss:$0 sm:$0xff] (%p1223_p10) }
 0x5f2   : >> { %v2558_v36 = vpop.f32.mrf.mxu0  ;;  %v2563_v38 = vpop.f32.mrf.mxu1  ;;  %1226 = sbr.rel (!%p1223_p10) target bundleno = 824 (0x338), region = 149  ;;  %v1759_v48 = vld [vmem:[#allocation6 + $0x8] sm:$0xff] (%p1223_p10) }
 0x5f3   : >> { %1753 = vst.msk [vmem:[#allocation6 + $0x18] sm:$0xff] %vm1215_vm2, %v1749_v35 }
 0x5f4   : >> { %v1743_v40 = vpop.f32.mrf.mxu1 }
 0x5f6   : >> { %v2564_v60 = vpop.f32.mrf.mxu1  ;;  %v1760_v54 = vld [vmem:[#allocation6 + $0x10] sm:$0xff] (%p1223_p10) }
 0x5f9   : > { %v2737_v37 = vpop.eup %2736 }
 0x5fa   : > { %v2739_v41 = vpop.eup %2738  ;;  %1782 = vperm.xlu1 %2723, %v2737_v37   ;;  %v1761_v47 = vld [vmem:[#allocation6 + $0x18] sm:$0xff] }
 0x5fb   : > { %1772 = vperm.xlu0 %2722, %v2739_v41  }
 0x5fd   : > { %v2741_v52 = vpop.eup %2740 }
 0x5fe   : > { %v2743_v53 = vpop.eup %2742  ;;  %1787 = vperm.xlu1 %2723, %v2741_v52  }
 0x5ff   : > { %1777 = vperm.xlu0 %2722, %v2743_v53  }
 0x675   : > { %v1783_v56 = vpop.permute.xlu1 %1782 }
 0x676   : > { %v1773_v57 = vpop.permute.xlu0 %1772  ;;  %v1792_v58 = vmul.f32 %v1783_v56, %v1760_v54 }
 0x677   : > { %v1790_v59 = vmul.f32 %v1773_v57, %v1758_v55 }
 0x679   : > { %v1788_v49 = vpop.permute.xlu1 %1787  ;;  %v1794_v62 = vcombine.low %v1790_v59, %v1792_v58  ;;  %v1795_v63 = vcombine.high %v1790_v59, %v1792_v58 }
 0x67a   : > { %v1793_v50 = vmul.f32 %v1788_v49, %v1761_v47  ;;  %v1778_v61 = vpop.permute.xlu0 %1777  ;;  %v2726_v49 = vld [vmem:[%s3584_s11 + $0x8] sm:$0xff]  }
 0x67b   : > { %v1791_v1 = vmul.f32 %v1778_v61, %v1759_v48  ;;  %v1802_v3 = vrot.slane %v1794_v62, %v3161_v45  ;;  %v1809_v4 = vrot.slane %v1795_v63, %v3161_v45 }
 0x67d   : > { %v1810_v32 = vcombine.low %v1791_v1, %v1793_v50  ;;  %v1811_v2 = vcombine.high %v1791_v1, %v1793_v50  ;;  %v2443_v1 = vld [vmem:[%s3582_s9] ss:$0 sm:$0xff] }
 0x67f   : > { %v1818_v6 = vrot.slane %v1810_v32, %v3161_v45  ;;  %v1825_v7 = vrot.slane %v1811_v2, %v3161_v45  ;;  %v2444_v2 = vld [vmem:[%s3583_s10] ss:$0 sm:$0xff] }
 0x681   : > { %v1826_v5 = vcombine.low %v1802_v3, %v1818_v6  ;;  %v1827_v10 = vcombine.high %v1802_v3, %v1818_v6  ;;  %v1842_v13 = vcombine.low %v1809_v4, %v1825_v7  ;;  %v1843_v14 = vcombine.high %v1809_v4, %v1825_v7  ;;  %v2728_v7 = vld [vmem:[%s3586_s13 + $0x38] sm:$0xff]  }
 0x682   : > { %2582 = vmatpush3.bf16.msra.mxu0 %v2728_v7 }
 0x683   : > { %v1834_v15 = vrot.slane %v1826_v5, %v3165_v51  ;;  %v1841_v16 = vrot.slane %v1827_v10, %v3165_v51  ;;  %v1850_v17 = vrot.slane %v1842_v13, %v3165_v51  ;;  %v1857_v18 = vrot.slane %v1843_v14, %v3165_v51  ;;  %2583 = vmatprep.subr.bf16.mxu0 %v2895_v8  ;;  %v2730_v5 = vld [vmem:[%s3586_s13 + $0x28] sm:$0xff]   ;;  %v2731_v10 = vld [vmem:[%s3586_s13 + $0x20] sm:$0xff]   ;;  %v2732_v13 = vld [vmem:[%s3586_s13 + $0x18] sm:$0xff]  }
 0x684   : > { %v2733_v14 = vld [vmem:[%s3586_s13 + $0x10] sm:$0xff]  }
 0x685   : > { %v1862_v20 = vcombine.low %v1834_v15, %v1841_v16  ;;  %v2437_v21 = vcombine.high %v1834_v15, %v1841_v16  ;;  %v1878_v22 = vcombine.low %v1850_v17, %v1857_v18  ;;  %v2438_v25 = vcombine.high %v1850_v17, %v1857_v18  ;;  %v2734_v15 = vld [vmem:[%s3586_s13 + $0x8] sm:$0xff]   ;;  %v2735_v16 = vld [vmem:[%s3586_s13] sm:$0xff]  }
 0x686   : > { %2584 = vmatpush3.bf16.msra.mxu0 %v2729_v9  ;;  %v2445_v17 = vld [vmem:[#allocation7] ss:$0 sm:$0xff] }
 0x687   : > { %v1869_v26 = vrot.slane %v1862_v20, %v3161_v45  ;;  %v1877_v27 = vrot.slane %v2437_v21, %v3161_v45  ;;  %v1885_v28 = vrot.slane %v1878_v22, %v3161_v45  ;;  %v1893_v11 = vrot.slane %v2438_v25, %v3161_v45  ;;  %2585 = vmatprep.subr.bf16.mxu0 %v2895_v8 }
 0x689   : > { %v1895_v29 = vcombine.high %v1869_v26, %v1877_v27  ;;  %v1911_v12 = vcombine.high %v1885_v28, %v1893_v11  ;;  %v1894_v23 = vcombine.low %v1869_v26, %v1877_v27  ;;  %v1910_v30 = vcombine.low %v1885_v28, %v1893_v11 }
 0x68a   : > { %2586 = vmatpush3.bf16.msra.mxu0 %v2730_v5 }
 0x68b   : > { %v1909_v24 = vrot.slane %v1895_v29, %v3165_v51  ;;  %v1925_v31 = vrot.slane %v1911_v12, %v3165_v51  ;;  %v1902_v33 = vrot.slane %v1894_v23, %v3165_v51  ;;  %v1918_v34 = vrot.slane %v1910_v30, %v3165_v51  ;;  %2587 = vmatprep.subr.bf16.mxu0 %v2895_v8 }
 0x68d   : > { %v1928_v35 = vcombine.low %v1909_v24, %v1925_v31  ;;  %v1927_v36 = vcombine.high %v1902_v33, %v1918_v34  ;;  %v1926_v38 = vcombine.low %v1902_v33, %v1918_v34  ;;  %v1929_v45 = vcombine.high %v1909_v24, %v1925_v31 }
 0x68e   : > { %2588 = vmatpush3.bf16.msra.mxu0 %v2731_v10 }
 0x68f   : > { %1935 = vrot.lane.b32.xlu1 %v1928_v35, %s2908_s17  ;;  %1931 = vrot.lane.b32.xlu0 %v1927_v36, %s3595_s27 }
 0x690   : > { %2589 = vmatprep.subr.bf16.mxu0 %v2895_v8 }
 0x692   : > { %2590 = vmatpush3.bf16.msra.mxu0 %v2732_v13 }
 0x693   : > { %1939 = vrot.lane.b32.xlu0 %v1929_v45, %s2910_s29  ;;  %2591 = vmatprep.subr.bf16.mxu0 %v2895_v8  ;;  %s3485_s29 = scalar_lea.hbm %s3589_s16, %s3596_s19 }
 0x696   : > { %2592 = vmatpush3.bf16.msra.mxu0 %v2733_v14 }
 0x697   : > { %2593 = vmatprep.subr.bf16.mxu0 %v2895_v8 }
 0x69a   : > { %2594 = vmatpush3.bf16.msra.mxu0 %v2734_v15 }
 0x69b   : > { %2595 = vmatprep.subr.bf16.mxu0 %v2895_v8 }
 0x69e   : > { %2596 = vmatpush3.bf16.msra.mxu0 %v2735_v16 }
 0x701   : > { %v1932_v40 = vpop.permute.xlu0 %1931  ;;  %v1936_v60 = vpop.permute.xlu1 %1935 }
 0x702   : > { %v1942_v42 = vsel %vm1215_vm2, %v1926_v38, %v1932_v40 }
 0x703   : > { %v1944_v39 = vsel %vm1943_vm8, %v1942_v42, %v1936_v60 }
 0x705   : > { %v1940_v43 = vpop.permute.xlu0 %1939 }
 0x706   : > { %v1946_v51 = vsel %vm1945_vm9, %v1944_v39, %v1940_v43 }
 0x707   : > { %v1947_v44 = vpack.c.bf16 %v1946_v51, %v1946_v51 }
 0x709   : > { %2570 = vmatmul.mubr.msk.bf16.vlgmr.msra.gmra.mxu1 %vm573_vm0, %v1947_v44 }
 0x70a   : > { %2577 = vmatprep.mubr.msk.bf16.mxu1 %vm2897_vm3, %v2895_v8  ;;  %2574 = vmatpush3.bf16.msra.mxu1 %v2726_v49 }
 0x70b   : > { %2575 = vmatprep.subr.bf16.mxu1 %v2895_v8 }
 0x7c9   : > { %v2008_v37 = vpop.f32.mrf.mxu1 }
 0x7ca   : > { %v2009_v41 = vadd.f32 %v2439_v46, %v2008_v37 }
 0x7cb   : > { %v2571_v52 = vpop.f32.mrf.mxu1 }
 0x7cc   : > { %v3428_v53 = vadd.f32 %v2009_v41, %v3081_v0  ;;  %v2727_v0 = vld [vmem:[%s3584_s11] sm:$0xff]  }
 0x7cd   : > { %v2011_v54 = vpop.f32.mrf.mxu1  ;;  %2576 = vmatpush3.bf16.msra.mxu1 %v2727_v0 }
 0x7ce   : > { %v2017_v55 = vsel %vm573_vm0, %v3428_v53, 0.0 }
 0x7cf   : > { %2018 = vadd.xlane.f32.xlu1 %v2017_v55  ;;  %v2572_v56 = vpop.f32.mrf.mxu1 }
 0x858   : > { %v2019_v57 = vpop.xlane.xlu1 %2018 }
 0x859   : > { %v2020_v58 = vmul.f32 0.03125, %v2019_v57 }
 0x85b   : > { %v2021_v59 = vsub.f32 %v3428_v53, %v2020_v58 }
 0x85d   : > { %v2022_v47 = vmul.f32 %v2021_v59, %v2021_v59 }
 0x85f   : > { %v2023_v48 = vsel %vm573_vm0, %v2022_v47, 0.0 }
 0x860   : > { %2024 = vadd.xlane.f32.xlu0 %v2023_v48 }
 0x8e9   : > { %v2025_v50 = vpop.xlane.xlu0 %2024 }
 0x8ea   : > { %v2026_v61 = vmul.f32 0.03125, %v2025_v50 }
 0x8ec   : > { %v2027_v62 = vadd.f32 1e-05, %v2026_v61 }
 0x8ee   : > { %2744 = vrsqrt.f32 %v2027_v62 }
 0x8fb   : > { %v2745_v63 = vpop.eup %2744 }
 0x8fc   : > { %v2029_v32 = vmul.f32 %v2745_v63, %v2021_v59 }
 0x8fe   : > { %v2036_v3 = vmul.f32 %v2443_v1, %v2029_v32 }
 0x900   : > { %v2043_v4 = vadd.f32 %v2444_v2, %v2036_v3 }
 0x902   : > { %v2044_v6 = vpack.c.bf16 %v2043_v4, %v2043_v4 }
 0x904   : > { %2578 = vmatmul.mubr.msk.bf16.vlgmr.msra.gmra.mxu1 %vm573_vm0, %v2044_v6 }
 0x9c4   : > { %v2105_v18 = vpop.f32.mrf.mxu1 }
 0x9c5   : > { %v2106_v19 = vadd.f32 %v2445_v17, %v2105_v18 }
 0x9c6   : > { %v2579_v20 = vpop.f32.mrf.mxu1 }
 0x9c7   : > { %v2112_v21 = vmul.f32 0.044715, %v2106_v19  ;;  %v2111_v8 = vmul.f32 0.5, %v2106_v19 }
 0x9c8   : > { %v2108_v22 = vpop.f32.mrf.mxu1 }
 0x9c9   : > { %v2113_v25 = vmul.f32 %v2112_v21, %v2106_v19 }
 0x9ca   : > { %v2580_v26 = vpop.f32.mrf.mxu1 }
 0x9cb   : > { %v2114_v27 = vmul.f32 %v2113_v25, %v2106_v19 }
 0x9cd   : > { %v2115_v28 = vadd.f32 %v2114_v27, %v2106_v19 }
 0x9cf   : > { %v2116_v11 = vmul.f32 0.7978846, %v2115_v28 }
 0x9d1   : > { %2746 = vtanh.f32 %v2116_v11 }
 0x9de   : > { %v2747_v29 = vpop.eup %2746 }
 0x9df   : > { %v2118_v12 = vadd.f32 1.0, %v2747_v29 }
 0x9e1   : > { %v2119_v23 = vmul.f32 %v2118_v12, %v2111_v8 }
 0x9e3   : > { %v2120_v30 = vpack.c.bf16 %v2119_v23, %v2119_v23 }
 0x9e5   : > { %2598 = vmatmul.mubr.bf16.vlgmr.msra.gmra.mxu0 %v2120_v30 }
 0x9e6   : > { %2787 = shalt.err (!%p2784_p5)
}
 0x9e7   : > { %s2788_s28 = scalar_lea.hbm %s3485_s29, 256  ;;  %s2792_s18 = scalar_lea.hbm %s3589_s16, 512 }
 0x9e8   : > { %p2789_p6 = scmp.ne.s32.totalorder %s3485_s29, %s2788_s28  ;;  %p2793_p12 = scmp.lt.s32.totalorder %s3485_s29, %s3589_s16 }
 0x9e9   : > { %p2794_p10 = scmp.lt.s32.totalorder %s2792_s18, %s2788_s28 }
 0x9ea   : > { %p2790_p7 = pnand %p2789_p6, %p3040_p4 }
 0x9eb   : > { %p2795_p11 = por %p2794_p10, %p2793_p12 }
 0x9ec   : > { %p2791_p9 = pneg %p2790_p7 }
 0x9ee   : > { %p2796_p13 = pnand %p2795_p11, %p2791_p9 }
 0x9f0   : > { %2799 = shalt.err (!%p2796_p13)
}
 0x9f1   : > { %s2912_s1 = smov 128   ;;  %s2913_s2 = smov 256   ;;  %v2449_v24 = vld [vmem:[%s3587_s14] ss:$0 sm:$0xff] }
 0x9f2   : > { %s3617_s21 = smov 8   ;;  %s3618_s20 = scalar_lea.sflag [#allocation12], %s3136_s25 }
 0x9f3   : > { %2606 = dma.vmem_to_hbm [thread:$0]  (%p3040_p4), %s3488_s30, 256, %s3485_s29, %s3618_s20, %s2912_s1, %s2913_s2, %s3617_s21  }
 0x9f4   : > { %s2254_s28 = sshll.u32 %s3248_s23, 4  ;;  %s3619_s17 = sshll.u32 %s2880_s24, 7  ;;  %s3526_s28 = int_to_ptr.vmem [resolvable:$true] %s2254_s28 }
 0x9f5   : > { %s3524_s4 = scalar_lea.hbm %s3588_s15, %s3619_s17  ;;  %s2235_s29 = scalar_lea.sflag [#allocation9], %s3136_s25 }
 0x9f6   : > { %s2800_s30 = scalar_lea.vmem %s3526_s28, 128  ;;  %s2914_s24 = smov [#allocation10]  }
 0x9f7   : > { %p2801_p0 = scmp.ne.s32.totalorder %s3526_s28, %s2800_s30  ;;  %s2804_s1 = sshll.u32 %s2914_s24, 4  ;;  %s2805_s1 = int_to_ptr.vmem [resolvable:$false] %s2804_s1 }
 0x9f8   : > { %s2806_s3 = scalar_lea.vmem %s2805_s1, 256  ;;  %p2807_p3 = scmp.lt.s32.totalorder %s3526_s28, %s2805_s1 }
 0x9f9   : > { %p2802_p1 = pnand %p2801_p0, %p3040_p4  ;;  %p2808_p5 = scmp.lt.s32.totalorder %s2806_s3, %s2800_s30 }
 0x9fb   : > { %p2803_p2 = pneg %p2802_p1  ;;  %p2809_p6 = por %p2808_p5, %p2807_p3 }
 0x9fd   : > { %p2810_p7 = pnand %p2809_p6, %p2803_p2 }
 0xaa5   : > { %v2226_v31 = vpop.f32.mrf.mxu0 }
 0xaa6   : > { %v2227_v33 = vadd.f32 %v2449_v24, %v2226_v31 }
 0xaa7   : > { %v2599_v34 = vpop.f32.mrf.mxu0 }
 0xaa8   : > { %v2232_v35 = vadd.f32 %v2227_v33, %v3428_v53 }
 0xaa9   : > { %v2229_v36 = vpop.f32.mrf.mxu0 }
 0xaaa   : > { %2233 = vst.msk [vmem:[%s3248_s23] sm:$0xff] %vm573_vm0, %v2232_v35 }
 0xaab   : > { %v2600_v38 = vpop.f32.mrf.mxu0 }
 0xaac   : > { %2813 = shalt.err (!%p2810_p7)
}
 0xaad   : > { %s2814_s23 = scalar_lea.hbm %s3524_s4, 128  ;;  %s2818_s21 = scalar_lea.hbm %s3588_s15, 256 }
 0xaae   : > { %p2815_p9 = scmp.ne.s32.totalorder %s3524_s4, %s2814_s23  ;;  %p2819_p11 = scmp.lt.s32.totalorder %s3524_s4, %s3588_s15 }
 0xaaf   : > { %p2820_p13 = scmp.lt.s32.totalorder %s2818_s21, %s2814_s23 }
 0xab0   : > { %p2816_p12 = pnand %p2815_p9, %p3040_p4 }
 0xab1   : > { %p2821_p0 = por %p2820_p13, %p2819_p11 }
 0xab2   : > { %p2817_p10 = pneg %p2816_p12 }
 0xab4   : > { %p2822_p1 = pnand %p2821_p0, %p2817_p10 }
 0xab6   : > { %2825 = shalt.err (!%p2822_p1)
}
 0xab7   : > { %2605 = dma.vmem_to_hbm [thread:$0]  (%p3040_p4), %s3526_s28, 128, %s3524_s4, %s2235_s29  }
 0xab8 PF: > { %s3620_s27 = sld [smem:[#allocation16_spill]]  ;;  %p2622_p2 = scmp.ge.s32.totalorder %s2888_s26, 2 }
 0xaba   : > { %p2614_p3 = pnand %p2622_p2, %p3047_p8 }
 0xabc   : > { %p2615_p5 = pneg %p2614_p3 }
 0xabe   : > { %s2282_s18 = sand.u32 1, %s3620_s27  }
 0xabf   : > { %s2283_s30 = scalar_lea.sflag [#allocation9], %s2282_s18 }
 0xac0   : > { %2859 = dma.done.wait (%p2615_p5), %s2283_s30, 128  }
 0xac1   : > { %2861 = vsyncadd (%p2615_p5), %s2283_s30, 4294967168  ;;  %s2292_s24 = scalar_lea.sflag [#allocation12], %s2282_s18 }
 0xac2   : > { %2863 = dma.done.wait (%p2615_p5), %s2292_s24, 256  }
 0xac3   : > { %2865 = vsyncadd (%p2615_p5), %s2292_s24, 4294967040  ;;  %s34_s26 = sadd.s32 1, %s2888_s26   ;;  %s3622_s4 = sld [smem:[#allocation17_spill]] }
 0xac4   : > { %p31_p6 = scmp.ge.s32.totalorder %s34_s26, 4   ;;  %s3623_s23 = sld [smem:[#allocation21_spill]] }
 0xac5   : > { %s3624_s24 = sld [smem:[#allocation18_spill]]  ;;  %s3626_s21 = smov %s2872_s22 }
 0xac6   : > { %s3625_s25 = sld [smem:[#allocation19_spill]]  ;;  %33 = sbr.rel (!%p31_p6) target bundleno = 13 (0xd), region = 160 }
 0xac9   : > { %s3627_s22 = smov %s3622_s4 }
 0xacb   :  { %2297 = vsyncpa [#allocation8], 1 }
 0xacc   :  { %2299 = vsyncpa [#allocation8 + $0x1], 1 }
 0xacd   :  { %2300 = vsyncpa [#allocation9], 1 }
 0xace   :  { %2302 = vsyncpa [#allocation9 + $0x1], 1 }
 0xacf   :  { %2303 = vsyncpa [#allocation12], 1 }
 0xad0   :  { %2305 = vsyncpa [#allocation12 + $0x1], 1 }

</bundles_post_ra>
